<compile_context>
chip_gen: v6e
topology: v6e:2x2x1
jax: 0.10.0
libtpu: 0.0.40
codegen_flags: <defaults>
</compile_context>

<pallas_src>
import functools
import math

import numpy as np
import jax
import jax.numpy as jnp
from jax import lax
from jax.experimental import pallas as pl
from jax.experimental.pallas import tpu as pltpu

_INV_SQRT2 = 0.7071067811865476
_LN_EPS = 1e-5


# -----------------------------------------------------------------------------
# S4 SSM convolution-kernel generation (deterministic parameter setup / glue).
# Complex Cauchy products + inverse FFT have no Pallas TPU equivalent, so this
# is done once on the host in numpy; it depends only on parameters, not on u.
# -----------------------------------------------------------------------------
def _make_dplr_hippo(n):
    p0 = np.sqrt(1.0 + 2.0 * np.arange(n))
    A = p0[:, None] * p0[None, :]
    A = np.tril(A) - np.diag(np.arange(n))
    A = -A                                        # HiPPO-LegS state matrix
    P = np.sqrt(np.arange(n) + 0.5)               # low-rank term
    B = np.sqrt(2.0 * np.arange(n) + 1.0)
    S = A + P[:, None] * P[None, :]               # normal part (diag + skew)
    lam_real = np.mean(np.diagonal(S)) * np.ones(n)
    lam_imag, V = np.linalg.eigh(S * -1j)
    Lambda = lam_real + 1j * lam_imag
    Vc = V.conj().T
    return Lambda, Vc @ P.astype(np.complex128), Vc @ B.astype(np.complex128)


def _s4_conv_kernel(Lambda, P, B, Ct, step, l_max):
    """SSM convolution kernel K of shape (d_model, l_max), DPLR/Cauchy form."""
    omega = np.exp(-2j * np.pi * np.arange(l_max) / l_max)                  # (L,)
    g = (2.0 / step[:, None]) * ((1.0 - omega) / (1.0 + omega))[None, :]    # (H, L)
    c = (2.0 / (1.0 + omega))[None, :]                                      # (1, L)

    def cauchy(v):                                                          # (*, N) -> (H, L)
        return np.sum(v[:, None, :] / (g[:, :, None] - Lambda[None, None, :]), axis=-1)

    a0, a1 = Ct.conj(), P.conj()[None, :]
    b0, b1 = B[None, :], P[None, :]
    k00 = cauchy(a0 * b0)
    k01 = cauchy(a0 * b1)
    k10 = cauchy(a1 * b0)
    k11 = cauchy(a1 * b1)
    at_roots = c * (k00 - k01 * (1.0 / (1.0 + k11)) * k10)                  # (H, L)
    K = np.fft.ifft(at_roots, n=l_max, axis=-1).real                        # (H, L)
    return K.astype(np.float32)


def _toeplitz_tsh(K):
    """Reference-only helper: kt[t, s, h] = K[h, t - s] for t >= s else 0."""
    H, L = K.shape
    t = np.arange(L)[:, None]
    s = np.arange(L)[None, :]
    idx = t - s
    kt = np.where((idx >= 0)[:, :, None], K.T[np.clip(idx, 0, L - 1)], np.float32(0.0))
    return kt.astype(np.float32)


# -----------------------------------------------------------------------------
# Chip / tiling helpers
# -----------------------------------------------------------------------------
def _tensorcores_per_chip():
    """Best-effort TensorCore count per chip (v7x has 2, v5e/v6e have 1)."""
    try:
        kind = jax.devices()[0].device_kind.lower()
    except Exception:
        return 1
    if "v7" in kind or "7x" in kind:
        return 2
    return 1


def _pick_batch_tile(B, L, H, n_cores, vmem_budget_bytes=32 * 1024 * 1024):
    """Largest batch tile whose per-step VMEM footprint fits the budget and whose
    grid extent is a multiple of the TensorCore count (megacore sharding)."""
    def fits(tb):
        # ~4x f32 tile for double-buffered in+out + ~8x f32 tile of intermediates
        return (4 + 8) * tb * L * H * 4 <= vmem_budget_bytes

    divisors = [t for t in range(1, B + 1) if B % t == 0 and fits(t)]
    if not divisors:
        return 1
    core_friendly = [t for t in divisors if (B // t) % n_cores == 0]
    return max(core_friendly) if core_friendly else max(divisors)


# -----------------------------------------------------------------------------
# Pallas kernel: fused S4Block forward for one batch tile (TB rows) per grid step.
# -----------------------------------------------------------------------------
def _s4_block_kernel(u_ref, kpad_ref, w_ref, c_ref, o_ref, *, approx_gelu):
    TB, L, H = u_ref.shape

    c = c_ref[...].astype(jnp.float32)                  # (4, H) packed constants
    d_skip = c[0][None, None, :]                        # S4 skip parameter D
    b_lin = c[1][None, None, :]                         # Linear bias
    gamma = c[2][None, None, :]                         # LayerNorm weight
    beta = c[3][None, None, :]                          # LayerNorm bias

    # ---- S4Layer: depthwise causal conv along L, D*u folded into the init ------
    #   y[b,t,h] = D[h]*u[b,t,h] + sum_{s<=t} K[h,t-s] * u[b,s,h]
    # kpad[j,h] = K[h, j-L] for j >= L else 0, so kpad[L-s : 2L-s] is the causally
    # masked kernel column for source position s.  The loop is a fully-unrolled
    # Python loop with *static* slice starts, so the shifted (L,H) windows lower
    # to in-register sublane shifts (no dynamically-addressed slab copies), and
    # u's full-tile value is not kept live across the loop (only (TB,1,H) reads).
    kpad = kpad_ref[...].astype(jnp.float32)            # (2L, H), read once
    y = d_skip * u_ref[...].astype(jnp.float32)         # accumulator init = D*u

    for s in range(L):
        u_s = u_ref[:, s:s + 1, :].astype(jnp.float32)  # (TB, 1, H)
        y = y + u_s * kpad[L - s:2 * L - s, :][None, :, :]
    # TODO(synk): for production l_max (>=512) this O(L^2*H) VPU loop saturates the
    # VALU while the MXU idles; reformulate as chunked Toeplitz-block MXU matmuls
    # (H on lanes) or a host-side FFT block-conv, with a partially-unrolled fori_loop.

    # ---- GELU (exact erf form == torch.nn.GELU default) -----------------------
    if approx_gelu:
        # tanh approximation rides the EUP slot (relaxes the exact-torch contract)
        a = jax.nn.gelu(y, approximate=True)
    else:
        a = 0.5 * y * (1.0 + lax.erf(y * _INV_SQRT2))

    # ---- Dropout(p=0) identity; Linear(d_model, d_model): a @ W^T + b ---------
    # (TB, L, H) -> (TB*L, H) is layout-preserving (L % 8 == 0): one MXU matmul
    # per grid step with a full M dimension.  Inputs in w_ref.dtype (bf16 by
    # default, pre-cast on the host); accumulation stays f32.
    a2 = a.reshape(TB * L, H).astype(w_ref.dtype)
    z = jnp.dot(a2, w_ref[...], preferred_element_type=jnp.float32).reshape(TB, L, H)
    z = z + b_lin

    # ---- Residual + LayerNorm (one-pass mean / E[x^2] statistics) -------------
    r = z + u_ref[...].astype(jnp.float32)              # re-read u here (short live range)
    mu = jnp.mean(r, axis=-1, keepdims=True)
    var = jnp.mean(r * r, axis=-1, keepdims=True) - mu * mu
    out = (r - mu) * lax.rsqrt(var + _LN_EPS) * gamma + beta

    # pooling=None, trailing Dropout(p=0) -> identity
    o_ref[...] = out.astype(o_ref.dtype)


def s4_block_forward(u, k_pad, w_t, consts, *, tb=None,
                     mm_dtype=jnp.bfloat16, approx_gelu=False):
    """u: (B, L, H); k_pad: (2L, H) zero-padded SSM kernel; w_t: (H, H) = W^T;
    consts: (4, H) = [D, linear bias, LN gamma, LN beta].

    mm_dtype controls the Linear matmul input precision (f32 accumulation either
    way).  bf16 is MXU-native on v5e/v6e/v7x; pass jnp.float32 for exact torch
    numerics."""
    B, L, H = u.shape
    assert k_pad.shape == (2 * L, H)
    assert w_t.shape == (H, H)
    assert consts.shape == (4, H)

    n_cores = _tensorcores_per_chip()
    if tb is None:
        tb = _pick_batch_tile(B, L, H, n_cores)
    assert B % tb == 0, "batch must be divisible by the batch tile"

    # Host-side pre-cast of W^T: halves the grid-invariant weight DMA for bf16 and
    # removes a per-step in-kernel cast.
    w_mm = w_t.astype(mm_dtype)

    # VMEM budget derived from actual tile sizes (leave headroom vs. v7x's 64 MiB).
    tile_bytes = tb * L * H * 4
    resident_bytes = (2 * L * H) * 4 + H * H * np.dtype(mm_dtype).itemsize + 4 * H * 4
    est_bytes = (4 + 8) * tile_bytes + 2 * resident_bytes
    vmem_limit = int(min(max(2 * est_bytes, 16 * 1024 * 1024), 48 * 1024 * 1024))

    # TODO(synk): for memory-bound production sizes, keep u / out as bf16 in HBM
    # and upcast in-kernel (halves activation HBM traffic; relaxes exact numerics).
    kernel = functools.partial(_s4_block_kernel, approx_gelu=approx_gelu)
    return pl.pallas_call(
        kernel,
        out_shape=jax.ShapeDtypeStruct((B, L, H), u.dtype),
        grid_spec=pltpu.PrefetchScalarGridSpec(
            num_scalar_prefetch=0,
            grid=(B // tb,),
            in_specs=[
                pl.BlockSpec((tb, L, H), lambda i: (i, 0, 0)),   # u (batch tile)
                pl.BlockSpec((2 * L, H), lambda i: (0, 0)),      # zero-padded SSM kernel
                pl.BlockSpec((H, H), lambda i: (0, 0)),          # W^T (mm_dtype)
                pl.BlockSpec((4, H), lambda i: (0, 0)),          # packed D/bias/gamma/beta
            ],
            out_specs=pl.BlockSpec((tb, L, H), lambda i: (i, 0, 0)),
        ),
        compiler_params=pltpu.CompilerParams(
            dimension_semantics=("parallel",),
            vmem_limit_bytes=vmem_limit,
        ),
    )(u, k_pad, w_mm, consts)


if __name__ == "__main__":
    # d_model=128 keeps activations/stores lane-dense.  The batch tile is picked
    # per chip: v5e/v6e collapse to one (B*L, H) @ (H, H) step, v7x keeps an even
    # grid so both TensorCores are used.
    d_model, n, l_max, batch = 128, 16, 16, 16

    key = jax.random.PRNGKey(0)
    k_u, k_cr, k_ci, k_step, k_w, k_b, k_d = jax.random.split(key, 7)

    # ---- deterministic S4Layer SSM kernel K (host-side Cauchy + iFFT) ----------
    Lambda, P, B_hippo = _make_dplr_hippo(n)
    ct = (np.asarray(jax.random.normal(k_cr, (d_model, n)))
          + 1j * np.asarray(jax.random.normal(k_ci, (d_model, n)))) * math.sqrt(0.5)
    log_step = (np.asarray(jax.random.uniform(k_step, (d_model,)))
                * (math.log(0.1) - math.log(0.001)) + math.log(0.001))
    step = np.exp(log_step).astype(np.float64)
    K = _s4_conv_kernel(Lambda, P, B_hippo, ct, step, l_max)        # (H, L)

    # zero-padded kernel shipped to the TPU kernel: kpad[L + d, h] = K[h, d]
    k_pad = jnp.asarray(np.concatenate(
        [np.zeros((l_max, d_model), np.float32), K.T.astype(np.float32)], axis=0))

    d_skip = jax.random.normal(k_d, (d_model,), jnp.float32)        # S4 skip param D

    # ---- nn.Linear(d_model, d_model) params (torch default uniform bounds) -----
    bound = 1.0 / math.sqrt(d_model)
    w = jax.random.uniform(k_w, (d_model, d_model), jnp.float32, -bound, bound)
    b_lin = jax.random.uniform(k_b, (d_model,), jnp.float32, -bound, bound)
    w_t = w.T                                                        # kernel does a @ W^T

    # ---- LayerNorm params (torch default init) ---------------------------------
    gamma = jnp.ones((d_model,), jnp.float32)
    beta = jnp.zeros((d_model,), jnp.float32)

    consts = jnp.stack([d_skip, b_lin, gamma, beta], axis=0)         # (4, H)

    # ---- input ------------------------------------------------------------------
    u = jax.random.normal(k_u, (batch, l_max, d_model), jnp.float32)

    # bf16 MXU inputs (f32 accumulation) by default; pass mm_dtype=jnp.float32 for
    # the exact-torch-numerics path.
    out = s4_block_forward(u, k_pad, w_t, consts, mm_dtype=jnp.bfloat16)
    out = jax.block_until_ready(out)

    # ---- pure-JAX reference (Toeplitz built here only for validation) -----------
    kt_tsh = jnp.asarray(_toeplitz_tsh(K))                           # (L, L, H)
    y = jnp.einsum("tsh,bsh->bth", kt_tsh, u,
                   precision=jax.lax.Precision.HIGHEST) + d_skip[None, None, :] * u
    a = 0.5 * y * (1.0 + jax.lax.erf(y * _INV_SQRT2))
    z = jnp.einsum("bth,hd->btd", a, w_t,
                   precision=jax.lax.Precision.HIGHEST) + b_lin[None, None, :]
    r = z + u
    mu = r.mean(-1, keepdims=True)
    var = ((r - mu) ** 2).mean(-1, keepdims=True)
    ref = ((r - mu) * jax.lax.rsqrt(var + _LN_EPS) * gamma[None, None, :]
           + beta[None, None, :])

    # Tolerance covers the bf16-input matmul (f32 accumulation); the f32 path
    # (mm_dtype=jnp.float32) matches well inside this bound too.
    np.testing.assert_allclose(np.asarray(out), np.asarray(ref), rtol=2e-2, atol=2e-2)
    print("KERNEL_OK")
</pallas_src>

<mosaic_0001>
module attributes {stable_mosaic.version = 11 : i64} {
  func.func @_s4_block_kernel(%arg0: i32, %arg1: memref<16x16x128xf32, #tpu.memory_space<vmem>>, %arg2: memref<32x128xf32, #tpu.memory_space<vmem>>, %arg3: memref<128x128xbf16, #tpu.memory_space<vmem>>, %arg4: memref<4x128xf32, #tpu.memory_space<vmem>>, %arg5: memref<16x16x128xf32, #tpu.memory_space<vmem>>) attributes {dimension_semantics = [#tpu.dimension_semantics<parallel>], iteration_bounds = array<i64: 1>, scalar_prefetch = 0 : i64, scratch_operands = 0 : i64, tpu.core_type = #tpu.core_type<tc>, window_params = [{transform_indices = @transform_0, window_bounds = array<i64: 16, 16, 128>}, {pipeline_mode = #tpu.pipeline_mode<synchronous>, transform_indices = @transform_1, window_bounds = array<i64: 32, 128>}, {pipeline_mode = #tpu.pipeline_mode<synchronous>, transform_indices = @transform_2, window_bounds = array<i64: 128, 128>}, {pipeline_mode = #tpu.pipeline_mode<synchronous>, transform_indices = @transform_3, window_bounds = array<i64: 4, 128>}, {transform_indices = @transform_4, window_bounds = array<i64: 16, 16, 128>}]} {
    %c0 = arith.constant 0 : index
    %c0_0 = arith.constant 0 : index
    %0 = vector.load %arg4[%c0, %c0_0] : memref<4x128xf32, #tpu.memory_space<vmem>>, vector<4x128xf32>
    %1 = vector.extract_strided_slice %0 {offsets = [0, 0], sizes = [1, 128], strides = [1, 1]} : vector<4x128xf32> to vector<1x128xf32>
    %2 = vector.shape_cast %1 : vector<1x128xf32> to vector<128xf32>
    %3 = vector.shape_cast %2 : vector<128xf32> to vector<1x1x128xf32>
    %4 = vector.extract_strided_slice %0 {offsets = [1, 0], sizes = [1, 128], strides = [1, 1]} : vector<4x128xf32> to vector<1x128xf32>
    %5 = vector.shape_cast %4 : vector<1x128xf32> to vector<128xf32>
    %6 = vector.shape_cast %5 : vector<128xf32> to vector<1x1x128xf32>
    %7 = vector.extract_strided_slice %0 {offsets = [2, 0], sizes = [1, 128], strides = [1, 1]} : vector<4x128xf32> to vector<1x128xf32>
    %8 = vector.shape_cast %7 : vector<1x128xf32> to vector<128xf32>
    %9 = vector.shape_cast %8 : vector<128xf32> to vector<1x1x128xf32>
    %10 = vector.extract_strided_slice %0 {offsets = [3, 0], sizes = [1, 128], strides = [1, 1]} : vector<4x128xf32> to vector<1x128xf32>
    %11 = vector.shape_cast %10 : vector<1x128xf32> to vector<128xf32>
    %12 = vector.shape_cast %11 : vector<128xf32> to vector<1x1x128xf32>
    %c0_1 = arith.constant 0 : index
    %c0_2 = arith.constant 0 : index
    %13 = vector.load %arg2[%c0_1, %c0_2] : memref<32x128xf32, #tpu.memory_space<vmem>>, vector<32x128xf32>
    %c0_3 = arith.constant 0 : index
    %c0_4 = arith.constant 0 : index
    %c0_5 = arith.constant 0 : index
    %14 = vector.load %arg1[%c0_3, %c0_4, %c0_5] : memref<16x16x128xf32, #tpu.memory_space<vmem>>, vector<16x16x128xf32>
    %15 = vector.broadcast %3 : vector<1x1x128xf32> to vector<16x16x128xf32>
    %16 = arith.mulf %15, %14 : vector<16x16x128xf32>
    %c0_6 = arith.constant 0 : index
    %c0_7 = arith.constant 0 : index
    %c0_8 = arith.constant 0 : index
    %17 = vector.load %arg1[%c0_6, %c0_7, %c0_8] : memref<16x16x128xf32, #tpu.memory_space<vmem>>, vector<16x1x128xf32>
    %18 = vector.extract_strided_slice %13 {offsets = [16, 0], sizes = [16, 128], strides = [1, 1]} : vector<32x128xf32> to vector<16x128xf32>
    %19 = vector.shape_cast %18 : vector<16x128xf32> to vector<1x16x128xf32>
    %20 = vector.broadcast %17 : vector<16x1x128xf32> to vector<16x16x128xf32>
    %21 = vector.broadcast %19 : vector<1x16x128xf32> to vector<16x16x128xf32>
    %22 = arith.mulf %20, %21 : vector<16x16x128xf32>
    %23 = arith.addf %16, %22 : vector<16x16x128xf32>
    %c0_9 = arith.constant 0 : index
    %c1 = arith.constant 1 : index
    %c0_10 = arith.constant 0 : index
    %24 = vector.load %arg1[%c0_9, %c1, %c0_10] : memref<16x16x128xf32, #tpu.memory_space<vmem>>, vector<16x1x128xf32>
    %25 = vector.extract_strided_slice %13 {offsets = [15, 0], sizes = [16, 128], strides = [1, 1]} : vector<32x128xf32> to vector<16x128xf32>
    %26 = vector.shape_cast %25 : vector<16x128xf32> to vector<1x16x128xf32>
    %27 = vector.broadcast %24 : vector<16x1x128xf32> to vector<16x16x128xf32>
    %28 = vector.broadcast %26 : vector<1x16x128xf32> to vector<16x16x128xf32>
    %29 = arith.mulf %27, %28 : vector<16x16x128xf32>
    %30 = arith.addf %23, %29 : vector<16x16x128xf32>
    %c0_11 = arith.constant 0 : index
    %c2 = arith.constant 2 : index
    %c0_12 = arith.constant 0 : index
    %31 = vector.load %arg1[%c0_11, %c2, %c0_12] : memref<16x16x128xf32, #tpu.memory_space<vmem>>, vector<16x1x128xf32>
    %32 = vector.extract_strided_slice %13 {offsets = [14, 0], sizes = [16, 128], strides = [1, 1]} : vector<32x128xf32> to vector<16x128xf32>
    %33 = vector.shape_cast %32 : vector<16x128xf32> to vector<1x16x128xf32>
    %34 = vector.broadcast %31 : vector<16x1x128xf32> to vector<16x16x128xf32>
    %35 = vector.broadcast %33 : vector<1x16x128xf32> to vector<16x16x128xf32>
    %36 = arith.mulf %34, %35 : vector<16x16x128xf32>
    %37 = arith.addf %30, %36 : vector<16x16x128xf32>
    %c0_13 = arith.constant 0 : index
    %c3 = arith.constant 3 : index
    %c0_14 = arith.constant 0 : index
    %38 = vector.load %arg1[%c0_13, %c3, %c0_14] : memref<16x16x128xf32, #tpu.memory_space<vmem>>, vector<16x1x128xf32>
    %39 = vector.extract_strided_slice %13 {offsets = [13, 0], sizes = [16, 128], strides = [1, 1]} : vector<32x128xf32> to vector<16x128xf32>
    %40 = vector.shape_cast %39 : vector<16x128xf32> to vector<1x16x128xf32>
    %41 = vector.broadcast %38 : vector<16x1x128xf32> to vector<16x16x128xf32>
    %42 = vector.broadcast %40 : vector<1x16x128xf32> to vector<16x16x128xf32>
    %43 = arith.mulf %41, %42 : vector<16x16x128xf32>
    %44 = arith.addf %37, %43 : vector<16x16x128xf32>
    %c0_15 = arith.constant 0 : index
    %c4 = arith.constant 4 : index
    %c0_16 = arith.constant 0 : index
    %45 = vector.load %arg1[%c0_15, %c4, %c0_16] : memref<16x16x128xf32, #tpu.memory_space<vmem>>, vector<16x1x128xf32>
    %46 = vector.extract_strided_slice %13 {offsets = [12, 0], sizes = [16, 128], strides = [1, 1]} : vector<32x128xf32> to vector<16x128xf32>
    %47 = vector.shape_cast %46 : vector<16x128xf32> to vector<1x16x128xf32>
    %48 = vector.broadcast %45 : vector<16x1x128xf32> to vector<16x16x128xf32>
    %49 = vector.broadcast %47 : vector<1x16x128xf32> to vector<16x16x128xf32>
    %50 = arith.mulf %48, %49 : vector<16x16x128xf32>
    %51 = arith.addf %44, %50 : vector<16x16x128xf32>
    %c0_17 = arith.constant 0 : index
    %c5 = arith.constant 5 : index
    %c0_18 = arith.constant 0 : index
    %52 = vector.load %arg1[%c0_17, %c5, %c0_18] : memref<16x16x128xf32, #tpu.memory_space<vmem>>, vector<16x1x128xf32>
    %53 = vector.extract_strided_slice %13 {offsets = [11, 0], sizes = [16, 128], strides = [1, 1]} : vector<32x128xf32> to vector<16x128xf32>
    %54 = vector.shape_cast %53 : vector<16x128xf32> to vector<1x16x128xf32>
    %55 = vector.broadcast %52 : vector<16x1x128xf32> to vector<16x16x128xf32>
    %56 = vector.broadcast %54 : vector<1x16x128xf32> to vector<16x16x128xf32>
    %57 = arith.mulf %55, %56 : vector<16x16x128xf32>
    %58 = arith.addf %51, %57 : vector<16x16x128xf32>
    %c0_19 = arith.constant 0 : index
    %c6 = arith.constant 6 : index
    %c0_20 = arith.constant 0 : index
    %59 = vector.load %arg1[%c0_19, %c6, %c0_20] : memref<16x16x128xf32, #tpu.memory_space<vmem>>, vector<16x1x128xf32>
    %60 = vector.extract_strided_slice %13 {offsets = [10, 0], sizes = [16, 128], strides = [1, 1]} : vector<32x128xf32> to vector<16x128xf32>
    %61 = vector.shape_cast %60 : vector<16x128xf32> to vector<1x16x128xf32>
    %62 = vector.broadcast %59 : vector<16x1x128xf32> to vector<16x16x128xf32>
    %63 = vector.broadcast %61 : vector<1x16x128xf32> to vector<16x16x128xf32>
    %64 = arith.mulf %62, %63 : vector<16x16x128xf32>
    %65 = arith.addf %58, %64 : vector<16x16x128xf32>
    %c0_21 = arith.constant 0 : index
    %c7 = arith.constant 7 : index
    %c0_22 = arith.constant 0 : index
    %66 = vector.load %arg1[%c0_21, %c7, %c0_22] : memref<16x16x128xf32, #tpu.memory_space<vmem>>, vector<16x1x128xf32>
    %67 = vector.extract_strided_slice %13 {offsets = [9, 0], sizes = [16, 128], strides = [1, 1]} : vector<32x128xf32> to vector<16x128xf32>
    %68 = vector.shape_cast %67 : vector<16x128xf32> to vector<1x16x128xf32>
    %69 = vector.broadcast %66 : vector<16x1x128xf32> to vector<16x16x128xf32>
    %70 = vector.broadcast %68 : vector<1x16x128xf32> to vector<16x16x128xf32>
    %71 = arith.mulf %69, %70 : vector<16x16x128xf32>
    %72 = arith.addf %65, %71 : vector<16x16x128xf32>
    %c0_23 = arith.constant 0 : index
    %c8 = arith.constant 8 : index
    %c0_24 = arith.constant 0 : index
    %73 = vector.load %arg1[%c0_23, %c8, %c0_24] : memref<16x16x128xf32, #tpu.memory_space<vmem>>, vector<16x1x128xf32>
    %74 = vector.extract_strided_slice %13 {offsets = [8, 0], sizes = [16, 128], strides = [1, 1]} : vector<32x128xf32> to vector<16x128xf32>
    %75 = vector.shape_cast %74 : vector<16x128xf32> to vector<1x16x128xf32>
    %76 = vector.broadcast %73 : vector<16x1x128xf32> to vector<16x16x128xf32>
    %77 = vector.broadcast %75 : vector<1x16x128xf32> to vector<16x16x128xf32>
    %78 = arith.mulf %76, %77 : vector<16x16x128xf32>
    %79 = arith.addf %72, %78 : vector<16x16x128xf32>
    %c0_25 = arith.constant 0 : index
    %c9 = arith.constant 9 : index
    %c0_26 = arith.constant 0 : index
    %80 = vector.load %arg1[%c0_25, %c9, %c0_26] : memref<16x16x128xf32, #tpu.memory_space<vmem>>, vector<16x1x128xf32>
    %81 = vector.extract_strided_slice %13 {offsets = [7, 0], sizes = [16, 128], strides = [1, 1]} : vector<32x128xf32> to vector<16x128xf32>
    %82 = vector.shape_cast %81 : vector<16x128xf32> to vector<1x16x128xf32>
    %83 = vector.broadcast %80 : vector<16x1x128xf32> to vector<16x16x128xf32>
    %84 = vector.broadcast %82 : vector<1x16x128xf32> to vector<16x16x128xf32>
    %85 = arith.mulf %83, %84 : vector<16x16x128xf32>
    %86 = arith.addf %79, %85 : vector<16x16x128xf32>
    %c0_27 = arith.constant 0 : index
    %c10 = arith.constant 10 : index
    %c0_28 = arith.constant 0 : index
    %87 = vector.load %arg1[%c0_27, %c10, %c0_28] : memref<16x16x128xf32, #tpu.memory_space<vmem>>, vector<16x1x128xf32>
    %88 = vector.extract_strided_slice %13 {offsets = [6, 0], sizes = [16, 128], strides = [1, 1]} : vector<32x128xf32> to vector<16x128xf32>
    %89 = vector.shape_cast %88 : vector<16x128xf32> to vector<1x16x128xf32>
    %90 = vector.broadcast %87 : vector<16x1x128xf32> to vector<16x16x128xf32>
    %91 = vector.broadcast %89 : vector<1x16x128xf32> to vector<16x16x128xf32>
    %92 = arith.mulf %90, %91 : vector<16x16x128xf32>
    %93 = arith.addf %86, %92 : vector<16x16x128xf32>
    %c0_29 = arith.constant 0 : index
    %c11 = arith.constant 11 : index
    %c0_30 = arith.constant 0 : index
    %94 = vector.load %arg1[%c0_29, %c11, %c0_30] : memref<16x16x128xf32, #tpu.memory_space<vmem>>, vector<16x1x128xf32>
    %95 = vector.extract_strided_slice %13 {offsets = [5, 0], sizes = [16, 128], strides = [1, 1]} : vector<32x128xf32> to vector<16x128xf32>
    %96 = vector.shape_cast %95 : vector<16x128xf32> to vector<1x16x128xf32>
    %97 = vector.broadcast %94 : vector<16x1x128xf32> to vector<16x16x128xf32>
    %98 = vector.broadcast %96 : vector<1x16x128xf32> to vector<16x16x128xf32>
    %99 = arith.mulf %97, %98 : vector<16x16x128xf32>
    %100 = arith.addf %93, %99 : vector<16x16x128xf32>
    %c0_31 = arith.constant 0 : index
    %c12 = arith.constant 12 : index
    %c0_32 = arith.constant 0 : index
    %101 = vector.load %arg1[%c0_31, %c12, %c0_32] : memref<16x16x128xf32, #tpu.memory_space<vmem>>, vector<16x1x128xf32>
    %102 = vector.extract_strided_slice %13 {offsets = [4, 0], sizes = [16, 128], strides = [1, 1]} : vector<32x128xf32> to vector<16x128xf32>
    %103 = vector.shape_cast %102 : vector<16x128xf32> to vector<1x16x128xf32>
    %104 = vector.broadcast %101 : vector<16x1x128xf32> to vector<16x16x128xf32>
    %105 = vector.broadcast %103 : vector<1x16x128xf32> to vector<16x16x128xf32>
    %106 = arith.mulf %104, %105 : vector<16x16x128xf32>
    %107 = arith.addf %100, %106 : vector<16x16x128xf32>
    %c0_33 = arith.constant 0 : index
    %c13 = arith.constant 13 : index
    %c0_34 = arith.constant 0 : index
    %108 = vector.load %arg1[%c0_33, %c13, %c0_34] : memref<16x16x128xf32, #tpu.memory_space<vmem>>, vector<16x1x128xf32>
    %109 = vector.extract_strided_slice %13 {offsets = [3, 0], sizes = [16, 128], strides = [1, 1]} : vector<32x128xf32> to vector<16x128xf32>
    %110 = vector.shape_cast %109 : vector<16x128xf32> to vector<1x16x128xf32>
    %111 = vector.broadcast %108 : vector<16x1x128xf32> to vector<16x16x128xf32>
    %112 = vector.broadcast %110 : vector<1x16x128xf32> to vector<16x16x128xf32>
    %113 = arith.mulf %111, %112 : vector<16x16x128xf32>
    %114 = arith.addf %107, %113 : vector<16x16x128xf32>
    %c0_35 = arith.constant 0 : index
    %c14 = arith.constant 14 : index
    %c0_36 = arith.constant 0 : index
    %115 = vector.load %arg1[%c0_35, %c14, %c0_36] : memref<16x16x128xf32, #tpu.memory_space<vmem>>, vector<16x1x128xf32>
    %116 = vector.extract_strided_slice %13 {offsets = [2, 0], sizes = [16, 128], strides = [1, 1]} : vector<32x128xf32> to vector<16x128xf32>
    %117 = vector.shape_cast %116 : vector<16x128xf32> to vector<1x16x128xf32>
    %118 = vector.broadcast %115 : vector<16x1x128xf32> to vector<16x16x128xf32>
    %119 = vector.broadcast %117 : vector<1x16x128xf32> to vector<16x16x128xf32>
    %120 = arith.mulf %118, %119 : vector<16x16x128xf32>
    %121 = arith.addf %114, %120 : vector<16x16x128xf32>
    %c0_37 = arith.constant 0 : index
    %c15 = arith.constant 15 : index
    %c0_38 = arith.constant 0 : index
    %122 = vector.load %arg1[%c0_37, %c15, %c0_38] : memref<16x16x128xf32, #tpu.memory_space<vmem>>, vector<16x1x128xf32>
    %123 = vector.extract_strided_slice %13 {offsets = [1, 0], sizes = [16, 128], strides = [1, 1]} : vector<32x128xf32> to vector<16x128xf32>
    %124 = vector.shape_cast %123 : vector<16x128xf32> to vector<1x16x128xf32>
    %125 = vector.broadcast %122 : vector<16x1x128xf32> to vector<16x16x128xf32>
    %126 = vector.broadcast %124 : vector<1x16x128xf32> to vector<16x16x128xf32>
    %127 = arith.mulf %125, %126 : vector<16x16x128xf32>
    %128 = arith.addf %121, %127 : vector<16x16x128xf32>
    %cst = arith.constant 5.000000e-01 : f32
    %129 = vector.broadcast %cst : f32 to vector<16x16x128xf32>
    %130 = arith.mulf %129, %128 : vector<16x16x128xf32>
    %cst_39 = arith.constant 0.707106769 : f32
    %131 = vector.broadcast %cst_39 : f32 to vector<16x16x128xf32>
    %132 = arith.mulf %128, %131 : vector<16x16x128xf32>
    %133 = math.erf %132 : vector<16x16x128xf32>
    %cst_40 = arith.constant 1.000000e+00 : f32
    %134 = vector.broadcast %cst_40 : f32 to vector<16x16x128xf32>
    %135 = arith.addf %134, %133 : vector<16x16x128xf32>
    %136 = arith.mulf %130, %135 : vector<16x16x128xf32>
    %137 = vector.shape_cast %136 : vector<16x16x128xf32> to vector<256x128xf32>
    %138 = arith.truncf %137 : vector<256x128xf32> to vector<256x128xbf16>
    %c0_41 = arith.constant 0 : index
    %c0_42 = arith.constant 0 : index
    %139 = vector.load %arg3[%c0_41, %c0_42] : memref<128x128xbf16, #tpu.memory_space<vmem>>, vector<128x128xbf16>
    %cst_43 = arith.constant dense<0.000000e+00> : vector<256x128xf32>
    %140 = tpu.matmul %138, %139, %cst_43 {dimension_numbers = #tpu.dot_dimension_numbers<[1], [0], [0], [1], [0, 0, 1, 1], [], []>} : vector<256x128xbf16>, vector<128x128xbf16>, vector<256x128xf32> -> vector<256x128xf32>
    %141 = vector.shape_cast %140 : vector<256x128xf32> to vector<16x16x128xf32>
    %142 = vector.broadcast %6 : vector<1x1x128xf32> to vector<16x16x128xf32>
    %143 = arith.addf %141, %142 : vector<16x16x128xf32>
    %c0_44 = arith.constant 0 : index
    %c0_45 = arith.constant 0 : index
    %c0_46 = arith.constant 0 : index
    %144 = vector.load %arg1[%c0_44, %c0_45, %c0_46] : memref<16x16x128xf32, #tpu.memory_space<vmem>>, vector<16x16x128xf32>
    %145 = arith.addf %143, %144 : vector<16x16x128xf32>
    %cst_47 = arith.constant dense<0.000000e+00> : vector<16x16xf32>
    %146 = vector.multi_reduction <add>, %145, %cst_47 [2] : vector<16x16x128xf32> to vector<16x16xf32>
    %147 = vector.shape_cast %146 : vector<16x16xf32> to vector<16x16x1xf32>
    %cst_48 = arith.constant 1.280000e+02 : f32
    %148 = vector.broadcast %cst_48 : f32 to vector<16x16x1xf32>
    %149 = arith.divf %147, %148 : vector<16x16x1xf32>
    %150 = arith.mulf %145, %145 : vector<16x16x128xf32>
    %cst_49 = arith.constant dense<0.000000e+00> : vector<16x16xf32>
    %151 = vector.multi_reduction <add>, %150, %cst_49 [2] : vector<16x16x128xf32> to vector<16x16xf32>
    %152 = vector.shape_cast %151 : vector<16x16xf32> to vector<16x16x1xf32>
    %cst_50 = arith.constant 1.280000e+02 : f32
    %153 = vector.broadcast %cst_50 : f32 to vector<16x16x1xf32>
    %154 = arith.divf %152, %153 : vector<16x16x1xf32>
    %155 = arith.mulf %149, %149 : vector<16x16x1xf32>
    %156 = arith.subf %154, %155 : vector<16x16x1xf32>
    %157 = vector.broadcast %149 : vector<16x16x1xf32> to vector<16x16x128xf32>
    %158 = arith.subf %145, %157 : vector<16x16x128xf32>
    %cst_51 = arith.constant 9.99999974E-6 : f32
    %159 = vector.broadcast %cst_51 : f32 to vector<16x16x1xf32>
    %160 = arith.addf %156, %159 : vector<16x16x1xf32>
    %161 = math.rsqrt %160 : vector<16x16x1xf32>
    %162 = vector.broadcast %161 : vector<16x16x1xf32> to vector<16x16x128xf32>
    %163 = arith.mulf %158, %162 : vector<16x16x128xf32>
    %164 = vector.broadcast %9 : vector<1x1x128xf32> to vector<16x16x128xf32>
    %165 = arith.mulf %163, %164 : vector<16x16x128xf32>
    %166 = vector.broadcast %12 : vector<1x1x128xf32> to vector<16x16x128xf32>
    %167 = arith.addf %165, %166 : vector<16x16x128xf32>
    %c0_52 = arith.constant 0 : index
    %c0_53 = arith.constant 0 : index
    %c0_54 = arith.constant 0 : index
    %168 = vector.load %arg5[%c0_52, %c0_53, %c0_54] : memref<16x16x128xf32, #tpu.memory_space<vmem>>, vector<16x16x128xf32>
    tpu.vector_store %arg5[%c0_52, %c0_53, %c0_54], %167 {strides = array<i32>} : memref<16x16x128xf32, #tpu.memory_space<vmem>>, vector<16x16x128xf32>,
    return
  }
  func.func @transform_0(%arg0: i32) -> (i32, i32, i32) {
    %c0_i32 = arith.constant 0 : i32
    %c0_i32_0 = arith.constant 0 : i32
    %c0_i32_1 = arith.constant 0 : i32
    return %arg0, %c0_i32, %c0_i32_0 : i32, i32, i32
  }
  func.func @transform_1(%arg0: i32) -> (i32, i32) {
    %c0_i32 = arith.constant 0 : i32
    %c0_i32_0 = arith.constant 0 : i32
    %c0_i32_1 = arith.constant 0 : i32
    return %c0_i32, %c0_i32_0 : i32, i32
  }
  func.func @transform_2(%arg0: i32) -> (i32, i32) {
    %c0_i32 = arith.constant 0 : i32
    %c0_i32_0 = arith.constant 0 : i32
    %c0_i32_1 = arith.constant 0 : i32
    return %c0_i32, %c0_i32_0 : i32, i32
  }
  func.func @transform_3(%arg0: i32) -> (i32, i32) {
    %c0_i32 = arith.constant 0 : i32
    %c0_i32_0 = arith.constant 0 : i32
    %c0_i32_1 = arith.constant 0 : i32
    return %c0_i32, %c0_i32_0 : i32, i32
  }
  func.func @transform_4(%arg0: i32) -> (i32, i32, i32) {
    %c0_i32 = arith.constant 0 : i32
    %c0_i32_0 = arith.constant 0 : i32
    %c0_i32_1 = arith.constant 0 : i32
    return %arg0, %c0_i32, %c0_i32_0 : i32, i32, i32
  }
}

</mosaic_0001>

<bundles_post_ra>
// kernel: tpu_custom_call.1
= control target key start
LH: loop header
LB: loop body
LE: loop exit
PB: predicated region body
PF: predicated region fallthrough
CT: control target
= control target key end

     0   :  { %9 = vsyncpa [#allocation3], 0  ;;  %s8437_s0 = inlined_call_operand.hbm [shape: f32[16,16,128], index: 0, kind: input, shape index: {}]   ;;  %s8438_s1 = inlined_call_operand.hbm [shape: f32[32,128], index: 1, kind: input, shape index: {}]   ;;  %s8439_s2 = inlined_call_operand.hbm [shape: bf16[128,128], index: 2, kind: input, shape index: {}]   ;;  %s8440_s3 = inlined_call_operand.vmem [shape: f32[4,128], index: 3, kind: input, shape index: {}]   ;;  %s8441_s4 = inlined_call_operand.hbm [shape: f32[16,16,128], index: 4, kind: output, shape index: {}]  }
   0x1   :  { %10 = vsyncpa [#allocation6], 0 }
   0x2   :  { %11 = vsyncpa [#allocation4], 0  ;;  %s6551_s15 = smov [#allocation5]   ;;  %s6552_s17 = smov [#allocation2]  }
   0x3   :  { %s29_s16 = sshll.u32 %s6551_s15, 4  ;;  %s17_s18 = sshll.u32 %s6552_s17, 4  ;;  %s30_s16 = int_to_ptr.vmem [resolvable:$true] %s29_s16  ;;  %s18_s18 = int_to_ptr.vmem [resolvable:$true] %s17_s18 }
   0x4   :  { %s6473_s19 = scalar_lea.vmem %s30_s16, 512  ;;  %p6478_p1 = scmp.lt.s32.totalorder %s30_s16, %s30_s16 }
   0x5   :  { %p6474_p0 = scmp.ne.s32.totalorder %s30_s16, %s6473_s19  ;;  %p6479_p2 = scmp.lt.s32.totalorder %s6473_s19, %s6473_s19 }
   0x7   :  { %p6480_p3 = por %p6479_p2, %p6478_p1 }
   0x9   :  { %p6481_p4 = pnand %p6480_p3, %p6474_p0 }
   0xb   :  { %6484 = shalt.err (!%p6481_p4)
}
   0xc   :  { %s6553_s20 = smov 128   ;;  %s6554_s21 = smov 8  }
   0xd   :  { %35 = dma.hbm_to_vmem [thread:$0]  %s8438_s1, 512, %s30_s16, [#allocation6], %s6553_s20, %s6553_s20, %s6554_s21  }
   0xe   :  { %s6493_s24 = scalar_lea.vmem %s18_s18, 4096  ;;  %p6498_p6 = scmp.lt.s32.totalorder %s18_s18, %s18_s18 }
   0xf   :  { %p6494_p5 = scmp.ne.s32.totalorder %s18_s18, %s6493_s24  ;;  %p6499_p7 = scmp.lt.s32.totalorder %s6493_s24, %s6493_s24 }
  0x11   :  { %p6500_p8 = por %p6499_p7, %p6498_p6 }
  0x13   :  { %p6501_p9 = pnand %p6500_p8, %p6494_p5 }
  0x15   :  { %6504 = shalt.err (!%p6501_p9)
}
  0x16   :  { %23 = dma.hbm_to_vmem [thread:$0]  %s8437_s0, 4096, %s18_s18, [#allocation3], %s6553_s20, %s6553_s20, %s6554_s21  }
  0x17   :  { %s6555_s27 = smov [#allocation7]  }
  0x18   :  { %s41_s28 = sshll.u32 %s6555_s27, 4  ;;  %s42_s28 = int_to_ptr.vmem [resolvable:$true] %s41_s28 }
  0x19   :  { %s6513_s29 = scalar_lea.vmem %s42_s28, 1024  ;;  %p6518_p11 = scmp.lt.s32.totalorder %s42_s28, %s42_s28 }
  0x1a   :  { %p6514_p10 = scmp.ne.s32.totalorder %s42_s28, %s6513_s29  ;;  %p6519_p12 = scmp.lt.s32.totalorder %s6513_s29, %s6513_s29 }
  0x1c   :  { %p6520_p13 = por %p6519_p12, %p6518_p11 }
  0x1e   :  { %p6521_p0 = pnand %p6520_p13, %p6514_p10 }
  0x20   :  { %6524 = shalt.err (!%p6521_p0)
}
  0x21   :  { %s6556_s1 = smov 64   ;;  %s6557_s30 = smov 4  }
  0x22   :  { %47 = dma.hbm_to_vmem [thread:$0]  %s8439_s2, 1024, %s42_s28, [#allocation6], %s6556_s1, %s6556_s1, %s6557_s30  }
  0x23   :  { %6545 = dma.done.wait [#allocation3], 4096  }
  0x24   :  { %6546 = vsyncadd [#allocation3], 4294963200 }
  0x25   :  { %6547 = dma.done.wait [#allocation6], 1536  }
  0x26   :  { %6548 = vsyncadd [#allocation6], 4294965760  ;;  %v97_v0 = vlaneseq  ;;  %v6276_v1 = vld [vmem:[#allocation7 + $0x38] sm:$0xff]   ;;  %v6277_v2 = vld [vmem:[#allocation7 + $0x30] sm:$0xff]   ;;  %vm453_vm0 = vcmask 1040384   ;;  %vm774_vm1 = vcmask 1041408  }
  0x27   :  { %6204 = vmatprep.subr.bf16.mxu0 %v6276_v1  ;;  %6252 = vmatprep.subr.bf16.mxu1 %v6276_v1  ;;  %v6278_v4 = vld [vmem:[#allocation7 + $0x28] sm:$0xff]   ;;  %v6279_v6 = vld [vmem:[#allocation7 + $0x20] sm:$0xff]   ;;  %v6607_v9 = vld [vmem:[#allocation5 + $0x10] sm:$0xff]  ;;  %vm1095_vm2 = vcmask 1042432   ;;  %vm1416_vm3 = vcmask 1043456   ;;  %vm1737_vm4 = vcmask 1044480  }
  0x28   :  { %v6599_v3 = vshrl.u32 %v97_v0, 7  ;;  %6205 = vmatpush3.bf16.msra.mxu0 %v6276_v1  ;;  %6260 = vmatpush3.bf16.msra.mxu1 %v6276_v1  ;;  %v60_v7 = vld [vmem:[%s8440_s3] sm:$0xf]  ;;  %v6605_v8 = vld [vmem:[#allocation5 + $0x8] sm:$0xff]  ;;  %v6609_v10 = vld [vmem:[#allocation5 + $0x18] sm:$0xff]  ;;  %vm2058_vm5 = vcmask 1045504  }
  0x29   :  { %6206 = vmatprep.subr.bf16.mxu0 %v6277_v2  ;;  %6253 = vmatprep.subr.bf16.mxu1 %v6277_v2  ;;  %v65_v11 = vld [vmem:[#allocation2] sm:$0xff]  ;;  %v66_v13 = vld [vmem:[#allocation2 + $0x8] sm:$0xff]  ;;  %v6280_v20 = vld [vmem:[#allocation7 + $0x18] sm:$0xff]   ;;  %vm2379_vm6 = vcmask 1046528  }
  0x2a   :  { %v99_v5 = vsub.s32 0, %v6599_v3  ;;  %v5916_v14 = vld [vmem:[#allocation2] ss:$0 sm:$0xff]  ;;  %v5932_v15 = vld [vmem:[#allocation2 + $0x1] ss:$0 sm:$0xff]  ;;  %v6281_v37 = vld [vmem:[#allocation7 + $0x10] sm:$0xff]  }
  0x2b   :  { %v213_v18 = vmul.f32 %v5916_v14, %v6607_v9  ;;  %v5948_v19 = vld [vmem:[#allocation2 + $0x2] ss:$0 sm:$0xff]  ;;  %v214_v21 = vmul.f32 %v5916_v14, %v6609_v10  ;;  %v357_v22 = vmul.f32 %v5932_v15, %v6605_v8  ;;  %v358_v23 = vmul.f32 %v5932_v15, %v6607_v9  ;;  %v5964_v24 = vld [vmem:[#allocation2 + $0x3] ss:$0 sm:$0xff]  ;;  %v5980_v42 = vld [vmem:[#allocation2 + $0x4] ss:$0 sm:$0xff] }
  0x2c   :  { %6207 = vmatpush3.bf16.msra.mxu0 %v6277_v2  ;;  %6261 = vmatpush3.bf16.msra.mxu1 %v6277_v2  ;;  %v6611_v12 = vrot.slane %v60_v7, %v99_v5  ;;  %v359_v26 = vmul.f32 %v5932_v15, %v6609_v10  ;;  %v678_v27 = vmul.f32 %v5948_v19, %v6605_v8  ;;  %v5996_v54 = vld [vmem:[#allocation2 + $0x5] ss:$0 sm:$0xff]  ;;  %v6282_v55 = vld [vmem:[#allocation7 + $0x8] sm:$0xff]   ;;  %v6012_v59 = vld [vmem:[#allocation2 + $0x6] ss:$0 sm:$0xff] }
  0x2d   :  { %6208 = vmatprep.subr.bf16.mxu0 %v6278_v4  ;;  %6254 = vmatprep.subr.bf16.mxu1 %v6278_v4  ;;  %v679_v28 = vmul.f32 %v5948_v19, %v6607_v9  ;;  %v454_v30 = vrot.slane %v357_v22, 7  ;;  %v455_v31 = vrot.slane %v358_v23, 7  ;;  %v680_v32 = vmul.f32 %v5948_v19, %v6609_v10  ;;  %v6283_v14 = vld [vmem:[#allocation7] sm:$0xff]   ;;  %v6044_v23 = vld [vmem:[#allocation2 + $0x8] ss:$0 sm:$0xff] }
  0x2e   :  { %v101_v16 = vmul.f32 %v6611_v12, %v65_v11  ;;  %v102_v17 = vmul.f32 %v6611_v12, %v66_v13  ;;  %v457_v33 = vrot.slane %v359_v26, 7  ;;  %v775_v34 = vrot.slane %v678_v27, 6  ;;  %v6028_v13 = vld [vmem:[#allocation2 + $0x7] ss:$0 sm:$0xff] }
  0x2f   :  { %v776_v35 = vrot.slane %v679_v28, 6  ;;  %v999_v36 = vmul.f32 %v5964_v24, %v6605_v8  ;;  %v456_v38 = vsel %vm453_vm0, %v454_v30, %v455_v31  ;;  %v778_v39 = vrot.slane %v680_v32, 6  ;;  %v6646_v28 = vld [vmem:[#allocation5] sm:$0xff] }
  0x30   :  { %6209 = vmatpush3.bf16.msra.mxu0 %v6278_v4  ;;  %6262 = vmatpush3.bf16.msra.mxu1 %v6278_v4  ;;  %v245_v25 = vadd.f32 %v213_v18, %v101_v16  ;;  %v246_v29 = vadd.f32 %v214_v21, %v102_v17  ;;  %v1000_v40 = vmul.f32 %v5964_v24, %v6607_v9 }
  0x31   :  { %6210 = vmatprep.subr.bf16.mxu0 %v6279_v6  ;;  %6255 = vmatprep.subr.bf16.mxu1 %v6279_v6  ;;  %v1001_v41 = vmul.f32 %v5964_v24, %v6609_v10  ;;  %v458_v43 = vsel %vm453_vm0, %v455_v31, %v457_v33  ;;  %v777_v45 = vsel %vm774_vm1, %v775_v34, %v776_v35  ;;  %v1096_v46 = vrot.slane %v999_v36, 5  ;;  %v6060_v33 = vld [vmem:[#allocation2 + $0x9] ss:$0 sm:$0xff] }
  0x32   :  { %v566_v44 = vadd.f32 %v456_v38, %v245_v25  ;;  %v567_v47 = vadd.f32 %v458_v43, %v246_v29  ;;  %v779_v48 = vsel %vm774_vm1, %v776_v35, %v778_v39  ;;  %v1097_v49 = vrot.slane %v1000_v40, 5  ;;  %v6076_v38 = vld [vmem:[#allocation2 + $0xa] ss:$0 sm:$0xff] }
  0x33   :  { %v1099_v50 = vrot.slane %v1001_v41, 5  ;;  %v1320_v52 = vmul.f32 %v5980_v42, %v6605_v8  ;;  %v1321_v53 = vmul.f32 %v5980_v42, %v6607_v9  ;;  %v1322_v61 = vmul.f32 %v5980_v42, %v6609_v10 }
  0x34   :  { %6211 = vmatpush3.bf16.msra.mxu0 %v6279_v6  ;;  %6263 = vmatpush3.bf16.msra.mxu1 %v6279_v6  ;;  %v887_v51 = vadd.f32 %v777_v45, %v566_v44  ;;  %v888_v56 = vadd.f32 %v779_v48, %v567_v47  ;;  %v1098_v57 = vsel %vm1095_vm2, %v1096_v46, %v1097_v49 }
  0x35   :  { %6212 = vmatprep.subr.bf16.mxu0 %v6280_v20  ;;  %6256 = vmatprep.subr.bf16.mxu1 %v6280_v20  ;;  %v1100_v58 = vsel %vm1095_vm2, %v1097_v49, %v1099_v50  ;;  %v1417_v62 = vrot.slane %v1320_v52, 4  ;;  %v1418_v63 = vrot.slane %v1321_v53, 4  ;;  %v1641_v1 = vmul.f32 %v5996_v54, %v6605_v8  ;;  %v6092_v50 = vld [vmem:[#allocation2 + $0xb] ss:$0 sm:$0xff] }
  0x36   :  { %v1208_v60 = vadd.f32 %v1098_v57, %v887_v51  ;;  %v1209_v0 = vadd.f32 %v1100_v58, %v888_v56  ;;  %v1642_v2 = vmul.f32 %v5996_v54, %v6607_v9  ;;  %v1643_v4 = vmul.f32 %v5996_v54, %v6609_v10 }
  0x37   :  { %v1419_v5 = vsel %vm1416_vm3, %v1417_v62, %v1418_v63  ;;  %v1420_v6 = vrot.slane %v1322_v61, 4  ;;  %v1962_v7 = vmul.f32 %v6012_v59, %v6605_v8  ;;  %v1963_v11 = vmul.f32 %v6012_v59, %v6607_v9 }
  0x38   :  { %6213 = vmatpush3.bf16.msra.mxu0 %v6280_v20  ;;  %6264 = vmatpush3.bf16.msra.mxu1 %v6280_v20  ;;  %v1529_v15 = vadd.f32 %v1419_v5, %v1208_v60  ;;  %v1738_v16 = vrot.slane %v1641_v1, 3  ;;  %v1739_v17 = vrot.slane %v1642_v2, 3  ;;  %v1741_v18 = vrot.slane %v1643_v4, 3 }
  0x39   :  { %6214 = vmatprep.subr.bf16.mxu0 %v6281_v37  ;;  %6257 = vmatprep.subr.bf16.mxu1 %v6281_v37  ;;  %v1421_v19 = vsel %vm1416_vm3, %v1418_v63, %v1420_v6  ;;  %v1964_v20 = vmul.f32 %v6012_v59, %v6609_v10  ;;  %v2059_v21 = vrot.slane %v1962_v7, 2  ;;  %v2060_v22 = vrot.slane %v1963_v11, 2  ;;  %v6108_v63 = vld [vmem:[#allocation2 + $0xc] ss:$0 sm:$0xff] }
  0x3a   :  { %v1530_v24 = vadd.f32 %v1421_v19, %v1209_v0  ;;  %v1740_v25 = vsel %vm1737_vm4, %v1738_v16, %v1739_v17  ;;  %v1742_v26 = vsel %vm1737_vm4, %v1739_v17, %v1741_v18  ;;  %v2283_v27 = vmul.f32 %v6028_v13, %v6605_v8 }
  0x3b   :  { %v1850_v29 = vadd.f32 %v1740_v25, %v1529_v15  ;;  %v2061_v30 = vsel %vm2058_vm5, %v2059_v21, %v2060_v22  ;;  %v2062_v31 = vrot.slane %v1964_v20, 2  ;;  %v2284_v32 = vmul.f32 %v6028_v13, %v6607_v9 }
  0x3c   :  { %6215 = vmatpush3.bf16.msra.mxu0 %v6281_v37  ;;  %6265 = vmatpush3.bf16.msra.mxu1 %v6281_v37  ;;  %v1851_v34 = vadd.f32 %v1742_v26, %v1530_v24  ;;  %v2285_v35 = vmul.f32 %v6028_v13, %v6609_v10  ;;  %v2380_v36 = vrot.slane %v2283_v27, 1  ;;  %v2604_v37 = vmul.f32 %v6044_v23, %v6605_v8  ;;  %v6124_v13 = vld [vmem:[#allocation2 + $0xd] ss:$0 sm:$0xff]  ;;  %v6140_v26 = vld [vmem:[#allocation2 + $0xe] ss:$0 sm:$0xff] }
  0x3d   :  { %6216 = vmatprep.subr.bf16.mxu0 %v6282_v55  ;;  %6258 = vmatprep.subr.bf16.mxu1 %v6282_v55  ;;  %v2063_v39 = vsel %vm2058_vm5, %v2060_v22, %v2062_v31  ;;  %v2171_v40 = vadd.f32 %v2061_v30, %v1850_v29  ;;  %v2381_v41 = vrot.slane %v2284_v32, 1  ;;  %v2605_v42 = vmul.f32 %v6044_v23, %v6607_v9 }
  0x3e   :  { %v2172_v43 = vadd.f32 %v2063_v39, %v1851_v34  ;;  %v2383_v44 = vrot.slane %v2285_v35, 1  ;;  %v2748_v45 = vmul.f32 %v6060_v33, %v6646_v28  ;;  %v2749_v46 = vmul.f32 %v6060_v33, %v6605_v8 }
  0x3f   :  { %v2382_v47 = vsel %vm2379_vm6, %v2380_v36, %v2381_v41  ;;  %v2750_v48 = vmul.f32 %v6060_v33, %v6607_v9  ;;  %v3068_v49 = vmul.f32 %v6076_v38, %v6646_v28  ;;  %v3069_v57 = vmul.f32 %v6076_v38, %v6605_v8 }
  0x40   :  { %6217 = vmatpush3.bf16.msra.mxu0 %v6282_v55  ;;  %6266 = vmatpush3.bf16.msra.mxu1 %v6282_v55  ;;  %v2384_v51 = vsel %vm2379_vm6, %v2381_v41, %v2383_v44  ;;  %v2492_v52 = vadd.f32 %v2382_v47, %v2171_v40  ;;  %v2844_v53 = vrot.slane %v2748_v45, 7  ;;  %v2845_v54 = vrot.slane %v2749_v46, 7  ;;  %v6156_v40 = vld [vmem:[#allocation2 + $0xf] ss:$0 sm:$0xff] }
  0x41   :  { %6218 = vmatprep.subr.bf16.mxu0 %v6283_v14  ;;  %6259 = vmatprep.subr.bf16.mxu1 %v6283_v14  ;;  %v2493_v55 = vadd.f32 %v2384_v51, %v2172_v43  ;;  %v2847_v56 = vrot.slane %v2750_v48, 7  ;;  %v3070_v58 = vmul.f32 %v6076_v38, %v6607_v9  ;;  %v3164_v61 = vrot.slane %v3068_v49, 6  ;;  %v81_v49 = vld [vmem:[#allocation2 + $0x80] sm:$0xff] }
  0x42   :  { %v2636_v59 = vadd.f32 %v2604_v37, %v2492_v52  ;;  %v2846_v60 = vsel %vm453_vm0, %v2844_v53, %v2845_v54  ;;  %v3388_v62 = vmul.f32 %v6092_v50, %v6646_v28  ;;  %v3165_v2 = vrot.slane %v3069_v57, 6 }
  0x43   :  { %v2637_v0 = vadd.f32 %v2605_v42, %v2493_v55  ;;  %v2848_v1 = vsel %vm453_vm0, %v2845_v54, %v2847_v56  ;;  %v3167_v4 = vrot.slane %v3070_v58, 6  ;;  %v3389_v6 = vmul.f32 %v6092_v50, %v6605_v8 }
  0x44   :  { %6219 = vmatpush3.bf16.msra.mxu0 %v6283_v14  ;;  %6267 = vmatpush3.bf16.msra.mxu1 %v6283_v14  ;;  %v2956_v5 = vadd.f32 %v2846_v60, %v2636_v59  ;;  %v3390_v7 = vmul.f32 %v6092_v50, %v6607_v9  ;;  %v3484_v11 = vrot.slane %v3388_v62, 5  ;;  %v3166_v15 = vsel %vm774_vm1, %v3164_v61, %v3165_v2  ;;  %v82_v50 = vld [vmem:[#allocation2 + $0x88] sm:$0xff]  ;;  %v5924_v59 = vld [vmem:[#allocation2 + $0x80] ss:$0 sm:$0xff]  ;;  %v5940_v60 = vld [vmem:[#allocation2 + $0x81] ss:$0 sm:$0xff] }
  0x45   :  { %v2957_v14 = vadd.f32 %v2848_v1, %v2637_v0  ;;  %v3168_v16 = vsel %vm774_vm1, %v3165_v2, %v3167_v4  ;;  %v3708_v17 = vmul.f32 %v6108_v63, %v6646_v28  ;;  %v3485_v19 = vrot.slane %v3389_v6, 5 }
  0x46   :  { %v3276_v18 = vadd.f32 %v3166_v15, %v2956_v5  ;;  %v3487_v20 = vrot.slane %v3390_v7, 5  ;;  %v3709_v21 = vmul.f32 %v6108_v63, %v6605_v8  ;;  %v3710_v23 = vmul.f32 %v6108_v63, %v6607_v9 }
  0x47   :  { %v3277_v22 = vadd.f32 %v3168_v16, %v2957_v14  ;;  %v3804_v24 = vrot.slane %v3708_v17, 4  ;;  %v4028_v25 = vmul.f32 %v6124_v13, %v6646_v28  ;;  %v3486_v27 = vsel %vm1095_vm2, %v3484_v11, %v3485_v19  ;;  %v5956_v14 = vld [vmem:[#allocation2 + $0x82] ss:$0 sm:$0xff] }
  0x48   :  { %v3488_v29 = vsel %vm1095_vm2, %v3485_v19, %v3487_v20  ;;  %v3805_v30 = vrot.slane %v3709_v21, 4  ;;  %v4029_v31 = vmul.f32 %v6124_v13, %v6605_v8  ;;  %v3596_v32 = vadd.f32 %v3486_v27, %v3276_v18  ;;  %v5972_v27 = vld [vmem:[#allocation2 + $0x83] ss:$0 sm:$0xff] }
  0x49   :  { %v3597_v33 = vadd.f32 %v3488_v29, %v3277_v22  ;;  %v3807_v34 = vrot.slane %v3710_v23, 4  ;;  %v4030_v35 = vmul.f32 %v6124_v13, %v6607_v9  ;;  %v4124_v37 = vrot.slane %v4028_v25, 3 }
  0x4a   :  { %v3806_v36 = vsel %vm1416_vm3, %v3804_v24, %v3805_v30  ;;  %v4125_v38 = vrot.slane %v4029_v31, 3  ;;  %v4348_v39 = vmul.f32 %v6140_v26, %v6646_v28  ;;  %v4349_v44 = vmul.f32 %v6140_v26, %v6605_v8 }
  0x4b   :  { %v3808_v41 = vsel %vm1416_vm3, %v3805_v30, %v3807_v34  ;;  %v3916_v42 = vadd.f32 %v3806_v36, %v3596_v32  ;;  %v4127_v43 = vrot.slane %v4030_v35, 3  ;;  %v4350_v47 = vmul.f32 %v6140_v26, %v6607_v9 }
  0x4c   :  { %v3917_v45 = vadd.f32 %v3808_v41, %v3597_v33  ;;  %v4126_v46 = vsel %vm1737_vm4, %v4124_v37, %v4125_v38  ;;  %v4444_v48 = vrot.slane %v4348_v39, 2  ;;  %v4445_v53 = vrot.slane %v4349_v44, 2  ;;  %v5988_v37 = vld [vmem:[#allocation2 + $0x84] ss:$0 sm:$0xff] }
  0x4d   :  { %v4128_v51 = vsel %vm1737_vm4, %v4125_v38, %v4127_v43  ;;  %v4236_v52 = vadd.f32 %v4126_v46, %v3916_v42  ;;  %v4668_v54 = vmul.f32 %v6156_v40, %v6646_v28  ;;  %v4447_v56 = vrot.slane %v4350_v47, 2 }
  0x4e   :  { %v4237_v55 = vadd.f32 %v4128_v51, %v3917_v45  ;;  %v4669_v57 = vmul.f32 %v6156_v40, %v6605_v8  ;;  %v4670_v58 = vmul.f32 %v6156_v40, %v6607_v9  ;;  %v4446_v61 = vsel %vm2058_vm5, %v4444_v48, %v4445_v53  ;;  %v6004_v48 = vld [vmem:[#allocation2 + $0x85] ss:$0 sm:$0xff] }
  0x4f   :  { %v4764_v62 = vrot.slane %v4668_v54, 1  ;;  %v117_v63 = vmul.f32 %v6611_v12, %v81_v49  ;;  %v118_v0 = vmul.f32 %v6611_v12, %v82_v50  ;;  %v4448_v1 = vsel %vm2058_vm5, %v4445_v53, %v4447_v56 }
  0x50   :  { %v4556_v2 = vadd.f32 %v4446_v61, %v4236_v52  ;;  %v4765_v4 = vrot.slane %v4669_v57, 1  ;;  %v4767_v5 = vrot.slane %v4670_v58, 1  ;;  %v4557_v6 = vadd.f32 %v4448_v1, %v4237_v55  ;;  %v6020_v61 = vld [vmem:[#allocation2 + $0x86] ss:$0 sm:$0xff] }
  0x51   :  { %v229_v7 = vmul.f32 %v5924_v59, %v6607_v9  ;;  %v230_v11 = vmul.f32 %v5924_v59, %v6609_v10  ;;  %v381_v13 = vmul.f32 %v5940_v60, %v6605_v8  ;;  %v382_v17 = vmul.f32 %v5940_v60, %v6607_v9 }
  0x52   :  { %v4766_v15 = vsel %vm2379_vm6, %v4764_v62, %v4765_v4  ;;  %v4768_v16 = vsel %vm2379_vm6, %v4765_v4, %v4767_v5  ;;  %v383_v18 = vmul.f32 %v5940_v60, %v6609_v10  ;;  %v702_v26 = vmul.f32 %v5956_v14, %v6605_v8 }
  0x53   :  { %v4876_v19 = vadd.f32 %v4766_v15, %v4556_v2  ;;  %v4877_v20 = vadd.f32 %v4768_v16, %v4557_v6  ;;  %v261_v21 = vadd.f32 %v229_v7, %v117_v63  ;;  %v262_v22 = vadd.f32 %v230_v11, %v118_v0  ;;  %v6036_v7 = vld [vmem:[#allocation2 + $0x87] ss:$0 sm:$0xff] }
  0x54   :  { %v494_v23 = vrot.slane %v381_v13, 7  ;;  %v495_v24 = vrot.slane %v382_v17, 7  ;;  %v497_v25 = vrot.slane %v383_v18, 7  ;;  %v703_v35 = vmul.f32 %v5956_v14, %v6607_v9 }
  0x55   :  { %v6699_v29 = vmul.f32 0.5, %v4876_v19  ;;  %v6701_v30 = vmul.f32 0.5, %v4877_v20  ;;  %v4940_v31 = vmul.f32 0.70710677, %v4876_v19  ;;  %v4941_v32 = vmul.f32 0.70710677, %v4877_v20 }
  0x56   :  { %v496_v33 = vsel %vm453_vm0, %v494_v23, %v495_v24  ;;  %v498_v34 = vsel %vm453_vm0, %v495_v24, %v497_v25  ;;  %v704_v36 = vmul.f32 %v5956_v14, %v6609_v10  ;;  %v815_v40 = vrot.slane %v702_v26, 6  ;;  %v6052_v20 = vld [vmem:[#allocation2 + $0x88] ss:$0 sm:$0xff]  ;;  %v6068_v25 = vld [vmem:[#allocation2 + $0x89] ss:$0 sm:$0xff] }
  0x57   :  { %6284 = verf.f32 %v4940_v31  ;;  %v582_v38 = vadd.f32 %v496_v33, %v261_v21  ;;  %v583_v39 = vadd.f32 %v498_v34, %v262_v22  ;;  %v816_v41 = vrot.slane %v703_v35, 6 }
  0x58   :  { %6286 = verf.f32 %v4941_v32  ;;  %v818_v42 = vrot.slane %v704_v36, 6  ;;  %v1023_v43 = vmul.f32 %v5972_v27, %v6605_v8  ;;  %v1024_v44 = vmul.f32 %v5972_v27, %v6607_v9 }
  0x59   :  { %v1025_v45 = vmul.f32 %v5972_v27, %v6609_v10  ;;  %v1344_v46 = vmul.f32 %v5988_v37, %v6605_v8  ;;  %v1345_v47 = vmul.f32 %v5988_v37, %v6607_v9  ;;  %v817_v49 = vsel %vm774_vm1, %v815_v40, %v816_v41 }
  0x5a   :  { %v819_v50 = vsel %vm774_vm1, %v816_v41, %v818_v42  ;;  %v1136_v51 = vrot.slane %v1023_v43, 5  ;;  %v1346_v52 = vmul.f32 %v5988_v37, %v6609_v10  ;;  %v903_v53 = vadd.f32 %v817_v49, %v582_v38  ;;  %v6084_v42 = vld [vmem:[#allocation2 + $0x8a] ss:$0 sm:$0xff] }
  0x5b   :  { %v904_v54 = vadd.f32 %v819_v50, %v583_v39  ;;  %v1137_v55 = vrot.slane %v1024_v44, 5  ;;  %v1139_v56 = vrot.slane %v1025_v45, 5  ;;  %v1457_v57 = vrot.slane %v1344_v46, 4 }
  0x5c   :  { %v1458_v58 = vrot.slane %v1345_v47, 4  ;;  %v1460_v59 = vrot.slane %v1346_v52, 4  ;;  %v1665_v60 = vmul.f32 %v6004_v48, %v6605_v8  ;;  %v1666_v0 = vmul.f32 %v6004_v48, %v6607_v9 }
  0x5d   :  { %v1138_v62 = vsel %vm1095_vm2, %v1136_v51, %v1137_v55  ;;  %v1140_v63 = vsel %vm1095_vm2, %v1137_v55, %v1139_v56  ;;  %v1667_v1 = vmul.f32 %v6004_v48, %v6609_v10  ;;  %v1986_v15 = vmul.f32 %v6020_v61, %v6605_v8 }
  0x5e   :  { %v1224_v2 = vadd.f32 %v1138_v62, %v903_v53  ;;  %v1225_v4 = vadd.f32 %v1140_v63, %v904_v54  ;;  %v1459_v5 = vsel %vm1416_vm3, %v1457_v57, %v1458_v58  ;;  %v1461_v6 = vsel %vm1416_vm3, %v1458_v58, %v1460_v59 }
  0x5f   :  { %v1778_v11 = vrot.slane %v1665_v60, 3  ;;  %v1779_v13 = vrot.slane %v1666_v0, 3  ;;  %v1781_v14 = vrot.slane %v1667_v1, 3  ;;  %v1987_v18 = vmul.f32 %v6020_v61, %v6607_v9  ;;  %v6100_v0 = vld [vmem:[#allocation2 + $0x8b] ss:$0 sm:$0xff] }
  0x60   :  { %v1545_v16 = vadd.f32 %v1459_v5, %v1224_v2  ;;  %v1546_v17 = vadd.f32 %v1461_v6, %v1225_v4  ;;  %v1988_v19 = vmul.f32 %v6020_v61, %v6609_v10  ;;  %v2099_v23 = vrot.slane %v1986_v15, 2  ;;  %v6116_v5 = vld [vmem:[#allocation2 + $0x8c] ss:$0 sm:$0xff] }
  0x61   :  { %v1780_v21 = vsel %vm1737_vm4, %v1778_v11, %v1779_v13  ;;  %v1782_v22 = vsel %vm1737_vm4, %v1779_v13, %v1781_v14  ;;  %v2307_v24 = vmul.f32 %v6036_v7, %v6605_v8  ;;  %v2100_v31 = vrot.slane %v1987_v18, 2 }
  0x62   :  { %v1866_v26 = vadd.f32 %v1780_v21, %v1545_v16  ;;  %v1867_v27 = vadd.f32 %v1782_v22, %v1546_v17  ;;  %v2102_v32 = vrot.slane %v1988_v19, 2  ;;  %v2308_v33 = vmul.f32 %v6036_v7, %v6607_v9  ;;  %v6132_v21 = vld [vmem:[#allocation2 + $0x8d] ss:$0 sm:$0xff] }
  0x63   :  { %v2309_v34 = vmul.f32 %v6036_v7, %v6609_v10  ;;  %v2420_v35 = vrot.slane %v2307_v24, 1  ;;  %v2620_v36 = vmul.f32 %v6052_v20, %v6605_v8  ;;  %v2101_v38 = vsel %vm2058_vm5, %v2099_v23, %v2100_v31 }
  0x64   :  { %v6285_v37 = vpop.eup %6284  ;;  %v2103_v39 = vsel %vm2058_vm5, %v2100_v31, %v2102_v32  ;;  %v2621_v40 = vmul.f32 %v6052_v20, %v6607_v9  ;;  %v2772_v41 = vmul.f32 %v6068_v25, %v6646_v28  ;;  %v2187_v45 = vadd.f32 %v2101_v38, %v1866_v26 }
  0x65   :  { %v6287_v43 = vpop.eup %6286  ;;  %v5004_v44 = vadd.f32 1.0, %v6285_v37  ;;  %v2188_v46 = vadd.f32 %v2103_v39, %v1867_v27  ;;  %v2421_v47 = vrot.slane %v2308_v33, 1  ;;  %v2423_v49 = vrot.slane %v2309_v34, 1  ;;  %v6148_v33 = vld [vmem:[#allocation2 + $0x8e] ss:$0 sm:$0xff] }
  0x66   :  { %v5005_v48 = vadd.f32 1.0, %v6287_v43  ;;  %v2773_v50 = vmul.f32 %v6068_v25, %v6605_v8  ;;  %v2774_v51 = vmul.f32 %v6068_v25, %v6607_v9  ;;  %v2884_v54 = vrot.slane %v2772_v41, 7 }
  0x67   :  { %v5036_v52 = vmul.f32 %v5004_v44, %v6699_v29  ;;  %v2422_v53 = vsel %vm2379_vm6, %v2420_v35, %v2421_v47  ;;  %v3092_v55 = vmul.f32 %v6084_v42, %v6646_v28  ;;  %v2424_v57 = vsel %vm2379_vm6, %v2421_v47, %v2423_v49 }
  0x68   :  { %v5037_v56 = vmul.f32 %v5005_v48, %v6701_v30  ;;  %v2508_v58 = vadd.f32 %v2422_v53, %v2187_v45  ;;  %v2885_v59 = vrot.slane %v2773_v50, 7  ;;  %v2509_v60 = vadd.f32 %v2424_v57, %v2188_v46  ;;  %v6164_v46 = vld [vmem:[#allocation2 + $0x8f] ss:$0 sm:$0xff] }
  0x69   :  { %v2887_v61 = vrot.slane %v2774_v51, 7  ;;  %v3093_v62 = vmul.f32 %v6084_v42, %v6605_v8  ;;  %v3094_v63 = vmul.f32 %v6084_v42, %v6607_v9  ;;  %v3204_v4 = vrot.slane %v3092_v55, 6 }
  0x6a   :  { %v5068_v1 = vpack.c.bf16 %v5037_v56, %v5036_v52  ;;  %v2652_v29 = vadd.f32 %v2620_v36, %v2508_v58  ;;  %v2886_v2 = vsel %vm453_vm0, %v2884_v54, %v2885_v59  ;;  %v2653_v6 = vadd.f32 %v2621_v40, %v2509_v60 }
  0x6b   :  { %v2888_v30 = vsel %vm453_vm0, %v2885_v59, %v2887_v61  ;;  %v3205_v7 = vrot.slane %v3093_v62, 6  ;;  %v3207_v11 = vrot.slane %v3094_v63, 6  ;;  %v3412_v14 = vmul.f32 %v6100_v0, %v6646_v28  ;;  %v67_v59 = vld [vmem:[#allocation2 + $0x10] sm:$0xff] }
  0x6c   :  { %6220 = vmatprep.mubr.bf16.mxu0 %v5068_v1  ;;  %v2972_v13 = vadd.f32 %v2886_v2, %v2652_v29  ;;  %v3413_v15 = vmul.f32 %v6100_v0, %v6605_v8  ;;  %v3414_v16 = vmul.f32 %v6100_v0, %v6607_v9  ;;  %v2973_v17 = vadd.f32 %v2888_v30, %v2653_v6  ;;  %v68_v0 = vld [vmem:[#allocation2 + $0x18] sm:$0xff]  ;;  %v5917_v1 = vld [vmem:[#allocation2 + $0x10] ss:$0 sm:$0xff]  ;;  %v5933_v6 = vld [vmem:[#allocation2 + $0x11] ss:$0 sm:$0xff] }
  0x6d   :  { %v3206_v18 = vsel %vm774_vm1, %v3204_v4, %v3205_v7  ;;  %v3208_v19 = vsel %vm774_vm1, %v3205_v7, %v3207_v11  ;;  %v3732_v20 = vmul.f32 %v6116_v5, %v6646_v28  ;;  %v3524_v23 = vrot.slane %v3412_v14, 5 }
  0x6e   :  { %v3292_v22 = vadd.f32 %v3206_v18, %v2972_v13  ;;  %v3525_v24 = vrot.slane %v3413_v15, 5  ;;  %v3527_v25 = vrot.slane %v3414_v16, 5  ;;  %v3293_v26 = vadd.f32 %v3208_v19, %v2973_v17  ;;  %v5949_v18 = vld [vmem:[#allocation2 + $0x12] ss:$0 sm:$0xff] }
  0x6f   :  { %v3733_v27 = vmul.f32 %v6116_v5, %v6605_v8  ;;  %v3734_v31 = vmul.f32 %v6116_v5, %v6607_v9  ;;  %v3844_v32 = vrot.slane %v3732_v20, 4  ;;  %v4052_v36 = vmul.f32 %v6132_v21, %v6646_v28 }
  0x70   :  { %v3526_v34 = vsel %vm1095_vm2, %v3524_v23, %v3525_v24  ;;  %v3528_v35 = vsel %vm1095_vm2, %v3525_v24, %v3527_v25  ;;  %v4053_v37 = vmul.f32 %v6132_v21, %v6605_v8  ;;  %v4054_v42 = vmul.f32 %v6132_v21, %v6607_v9 }
  0x71   :  { %v3612_v38 = vadd.f32 %v3526_v34, %v3292_v22  ;;  %v3613_v39 = vadd.f32 %v3528_v35, %v3293_v26  ;;  %v3845_v40 = vrot.slane %v3733_v27, 4  ;;  %v3847_v41 = vrot.slane %v3734_v31, 4  ;;  %v5965_v34 = vld [vmem:[#allocation2 + $0x13] ss:$0 sm:$0xff] }
  0x72   :  { %v4164_v43 = vrot.slane %v4052_v36, 3  ;;  %v4165_v44 = vrot.slane %v4053_v37, 3  ;;  %v4372_v45 = vmul.f32 %v6148_v33, %v6646_v28  ;;  %v4373_v49 = vmul.f32 %v6148_v33, %v6605_v8 }
  0x73   :  { %v3846_v47 = vsel %vm1416_vm3, %v3844_v32, %v3845_v40  ;;  %v3848_v48 = vsel %vm1416_vm3, %v3845_v40, %v3847_v41  ;;  %v4374_v50 = vmul.f32 %v6148_v33, %v6607_v9  ;;  %v4167_v54 = vrot.slane %v4054_v42, 3 }
  0x74   :  { %v3932_v51 = vadd.f32 %v3846_v47, %v3612_v38  ;;  %v3933_v52 = vadd.f32 %v3848_v48, %v3613_v39  ;;  %v4166_v53 = vsel %vm1737_vm4, %v4164_v43, %v4165_v44  ;;  %v4484_v55 = vrot.slane %v4372_v45, 2 }
  0x75   :  { %v4485_v56 = vrot.slane %v4373_v49, 2  ;;  %v4487_v57 = vrot.slane %v4374_v50, 2  ;;  %v4692_v58 = vmul.f32 %v6164_v46, %v6646_v28  ;;  %v4168_v60 = vsel %vm1737_vm4, %v4165_v44, %v4167_v54  ;;  %v5997_v54 = vld [vmem:[#allocation2 + $0x15] ss:$0 sm:$0xff] }
  0x76   :  { %v4252_v61 = vadd.f32 %v4166_v53, %v3932_v51  ;;  %v4693_v62 = vmul.f32 %v6164_v46, %v6605_v8  ;;  %v4694_v63 = vmul.f32 %v6164_v46, %v6607_v9  ;;  %v4253_v29 = vadd.f32 %v4168_v60, %v3933_v52  ;;  %v5981_v46 = vld [vmem:[#allocation2 + $0x14] ss:$0 sm:$0xff] }
  0x77   :  { %v4486_v2 = vsel %vm2058_vm5, %v4484_v55, %v4485_v56  ;;  %v4488_v4 = vsel %vm2058_vm5, %v4485_v56, %v4487_v57  ;;  %v4804_v5 = vrot.slane %v4692_v58, 1  ;;  %v103_v13 = vmul.f32 %v6611_v12, %v67_v59 }
  0x78   :  { %v4572_v30 = vadd.f32 %v4486_v2, %v4252_v61  ;;  %v4805_v7 = vrot.slane %v4693_v62, 1  ;;  %v4807_v11 = vrot.slane %v4694_v63, 1  ;;  %v4573_v14 = vadd.f32 %v4488_v4, %v4253_v29  ;;  %v6013_v2 = vld [vmem:[#allocation2 + $0x16] ss:$0 sm:$0xff] }
  0x79   :  { %v104_v15 = vmul.f32 %v6611_v12, %v68_v0  ;;  %v215_v16 = vmul.f32 %v5917_v1, %v6607_v9  ;;  %v216_v17 = vmul.f32 %v5917_v1, %v6609_v10  ;;  %v360_v21 = vmul.f32 %v5933_v6, %v6605_v8 }
  0x7a   :  { %v4806_v19 = vsel %vm2379_vm6, %v4804_v5, %v4805_v7  ;;  %v4808_v20 = vsel %vm2379_vm6, %v4805_v7, %v4807_v11  ;;  %v361_v22 = vmul.f32 %v5933_v6, %v6607_v9  ;;  %v362_v27 = vmul.f32 %v5933_v6, %v6609_v10 }
  0x7b   :  { %v4892_v23 = vadd.f32 %v4806_v19, %v4572_v30  ;;  %v4893_v24 = vadd.f32 %v4808_v20, %v4573_v14  ;;  %v247_v25 = vadd.f32 %v215_v16, %v103_v13  ;;  %v248_v26 = vadd.f32 %v216_v17, %v104_v15  ;;  %v6029_v19 = vld [vmem:[#allocation2 + $0x17] ss:$0 sm:$0xff] }
  0x7c   :  { %v459_v31 = vrot.slane %v360_v21, 7  ;;  %v460_v32 = vrot.slane %v361_v22, 7  ;;  %v681_v33 = vmul.f32 %v5949_v18, %v6605_v8  ;;  %v462_v40 = vrot.slane %v362_v27, 7 }
  0x7d   :  { %v6781_v35 = vmul.f32 0.5, %v4892_v23  ;;  %v6783_v36 = vmul.f32 0.5, %v4893_v24  ;;  %v4956_v37 = vmul.f32 0.70710677, %v4892_v23  ;;  %v4957_v38 = vmul.f32 0.70710677, %v4893_v24 }
  0x7e   :  { %v461_v39 = vsel %vm453_vm0, %v459_v31, %v460_v32  ;;  %v682_v41 = vmul.f32 %v5949_v18, %v6607_v9  ;;  %v683_v42 = vmul.f32 %v5949_v18, %v6609_v10  ;;  %v780_v44 = vrot.slane %v681_v33, 6  ;;  %v6045_v24 = vld [vmem:[#allocation2 + $0x18] ss:$0 sm:$0xff] }
  0x7f   :  { %6288 = verf.f32 %v4956_v37  ;;  %v568_v43 = vadd.f32 %v461_v39, %v247_v25  ;;  %v1002_v45 = vmul.f32 %v5965_v34, %v6605_v8  ;;  %v463_v47 = vsel %vm453_vm0, %v460_v32, %v462_v40 }
  0x80   :  { %6290 = verf.f32 %v4957_v38  ;;  %v781_v48 = vrot.slane %v682_v41, 6  ;;  %v783_v49 = vrot.slane %v683_v42, 6  ;;  %v569_v50 = vadd.f32 %v463_v47, %v248_v26  ;;  %v6061_v42 = vld [vmem:[#allocation2 + $0x19] ss:$0 sm:$0xff] }
  0x81   :  { %v1003_v51 = vmul.f32 %v5965_v34, %v6607_v9  ;;  %v1004_v52 = vmul.f32 %v5965_v34, %v6609_v10  ;;  %v1101_v53 = vrot.slane %v1002_v45, 5  ;;  %v1323_v57 = vmul.f32 %v5981_v46, %v6605_v8 }
  0x82   :  { %v782_v55 = vsel %vm774_vm1, %v780_v44, %v781_v48  ;;  %v784_v56 = vsel %vm774_vm1, %v781_v48, %v783_v49  ;;  %v1324_v58 = vmul.f32 %v5981_v46, %v6607_v9  ;;  %v1325_v63 = vmul.f32 %v5981_v46, %v6609_v10  ;;  %v6077_v48 = vld [vmem:[#allocation2 + $0x1a] ss:$0 sm:$0xff] }
  0x83   :  { %v889_v59 = vadd.f32 %v782_v55, %v568_v43  ;;  %v890_v60 = vadd.f32 %v784_v56, %v569_v50  ;;  %v1102_v61 = vrot.slane %v1003_v51, 5  ;;  %v1104_v62 = vrot.slane %v1004_v52, 5 }
  0x84   :  { %v1422_v0 = vrot.slane %v1323_v57, 4  ;;  %v1423_v1 = vrot.slane %v1324_v58, 4  ;;  %v1644_v29 = vmul.f32 %v5997_v54, %v6605_v8  ;;  %v1645_v6 = vmul.f32 %v5997_v54, %v6607_v9 }
  0x85   :  { %v1103_v4 = vsel %vm1095_vm2, %v1101_v53, %v1102_v61  ;;  %v1105_v5 = vsel %vm1095_vm2, %v1102_v61, %v1104_v62  ;;  %v1646_v30 = vmul.f32 %v5997_v54, %v6609_v10  ;;  %v1425_v14 = vrot.slane %v1325_v63, 4 }
  0x86   :  { %v1210_v7 = vadd.f32 %v1103_v4, %v889_v59  ;;  %v1211_v11 = vadd.f32 %v1105_v5, %v890_v60  ;;  %v1424_v13 = vsel %vm1416_vm3, %v1422_v0, %v1423_v1  ;;  %v1743_v15 = vrot.slane %v1644_v29, 3  ;;  %v6093_v5 = vld [vmem:[#allocation2 + $0x1b] ss:$0 sm:$0xff] }
  0x87   :  { %v1744_v16 = vrot.slane %v1645_v6, 3  ;;  %v1746_v17 = vrot.slane %v1646_v30, 3  ;;  %v1965_v18 = vmul.f32 %v6013_v2, %v6605_v8  ;;  %v1426_v20 = vsel %vm1416_vm3, %v1423_v1, %v1425_v14 }
  0x88   :  { %v1531_v21 = vadd.f32 %v1424_v13, %v1210_v7  ;;  %v1966_v22 = vmul.f32 %v6013_v2, %v6607_v9  ;;  %v1967_v23 = vmul.f32 %v6013_v2, %v6609_v10  ;;  %v1532_v25 = vadd.f32 %v1426_v20, %v1211_v11  ;;  %v6109_v11 = vld [vmem:[#allocation2 + $0x1c] ss:$0 sm:$0xff] }
  0x89   :  { %v1745_v26 = vsel %vm1737_vm4, %v1743_v15, %v1744_v16  ;;  %v1747_v27 = vsel %vm1737_vm4, %v1744_v16, %v1746_v17  ;;  %v2064_v31 = vrot.slane %v1965_v18, 2  ;;  %v2286_v37 = vmul.f32 %v6029_v19, %v6605_v8 }
  0x8a   :  { %v1852_v32 = vadd.f32 %v1745_v26, %v1531_v21  ;;  %v2065_v33 = vrot.slane %v1966_v22, 2  ;;  %v2067_v34 = vrot.slane %v1967_v23, 2  ;;  %v1853_v38 = vadd.f32 %v1747_v27, %v1532_v25  ;;  %v6833_v21 = vld [vmem:[#allocation5 + $0x10] sm:$0xff] }
  0x8b   :  { %v2287_v39 = vmul.f32 %v6029_v19, %v6607_v9  ;;  %v2288_v40 = vmul.f32 %v6029_v19, %v6609_v10  ;;  %v2606_v41 = vmul.f32 %v6045_v24, %v6605_v8  ;;  %v2385_v46 = vrot.slane %v2286_v37, 1  ;;  %v6829_v19 = vld [vmem:[#allocation5 + $0x8] sm:$0xff] }
  0x8c   :  { %v6289_v43 = vpop.eup %6288  ;;  %v2066_v44 = vsel %vm2058_vm5, %v2064_v31, %v2065_v33  ;;  %v2068_v45 = vsel %vm2058_vm5, %v2065_v33, %v2067_v34  ;;  %v2607_v47 = vmul.f32 %v6045_v24, %v6607_v9  ;;  %v2751_v10 = vmul.f32 %v6061_v42, %v6646_v28  ;;  %v6125_v24 = vld [vmem:[#allocation2 + $0x1d] ss:$0 sm:$0xff] }
  0x8d   :  { %v6291_v49 = vpop.eup %6290  ;;  %v5020_v50 = vadd.f32 1.0, %v6289_v43  ;;  %v2173_v51 = vadd.f32 %v2066_v44, %v1852_v32  ;;  %v2174_v52 = vadd.f32 %v2068_v45, %v1853_v38  ;;  %v2386_v53 = vrot.slane %v2287_v39, 1 }
  0x8e   :  { %v5021_v54 = vadd.f32 1.0, %v6291_v49  ;;  %v2388_v55 = vrot.slane %v2288_v40, 1  ;;  %v2752_v56 = vmul.f32 %v6061_v42, %v6605_v8  ;;  %v2753_v59 = vmul.f32 %v6061_v42, %v6607_v9  ;;  %v6141_v42 = vld [vmem:[#allocation2 + $0x1e] ss:$0 sm:$0xff] }
  0x8f   :  { %v5052_v57 = vmul.f32 %v5020_v50, %v6781_v35  ;;  %v2387_v58 = vsel %vm2379_vm6, %v2385_v46, %v2386_v53  ;;  %v3071_v60 = vmul.f32 %v6077_v48, %v6646_v28  ;;  %v2849_v0 = vrot.slane %v2751_v10, 7 }
  0x90   :  { %v5053_v61 = vmul.f32 %v5021_v54, %v6783_v36  ;;  %v2389_v62 = vsel %vm2379_vm6, %v2386_v53, %v2388_v55  ;;  %v2494_v63 = vadd.f32 %v2387_v58, %v2173_v51  ;;  %v2850_v29 = vrot.slane %v2752_v56, 7  ;;  %v6157_v51 = vld [vmem:[#allocation2 + $0x1f] ss:$0 sm:$0xff] }
  0x91   :  { %v2495_v1 = vadd.f32 %v2389_v62, %v2174_v52  ;;  %v2852_v2 = vrot.slane %v2753_v59, 7  ;;  %v3072_v4 = vmul.f32 %v6077_v48, %v6605_v8  ;;  %v3073_v30 = vmul.f32 %v6077_v48, %v6607_v9 }
  0x92   :  { %v5076_v6 = vpack.c.bf16 %v5053_v61, %v5052_v57  ;;  %v2638_v35 = vadd.f32 %v2606_v41, %v2494_v63  ;;  %v3169_v7 = vrot.slane %v3071_v60, 6  ;;  %v2851_v14 = vsel %vm453_vm0, %v2849_v0, %v2850_v29  ;;  %v83_v63 = vld [vmem:[#allocation2 + $0x90] sm:$0xff] }
  0x93   :  { %v2639_v13 = vadd.f32 %v2607_v47, %v2495_v1  ;;  %v2853_v36 = vsel %vm453_vm0, %v2850_v29, %v2852_v2  ;;  %v3170_v15 = vrot.slane %v3072_v4, 6  ;;  %v3172_v17 = vrot.slane %v3073_v30, 6  ;;  %v84_v4 = vld [vmem:[#allocation2 + $0x98] sm:$0xff] }
  0x94   :  { %6236 = vmatprep.mubr.bf16.mxu1 %v5076_v6  ;;  %v2958_v16 = vadd.f32 %v2851_v14, %v2638_v35  ;;  %v3391_v18 = vmul.f32 %v6093_v5, %v6646_v28  ;;  %v3392_v8 = vmul.f32 %v6829_v19, %v6093_v5  ;;  %v3393_v22 = vmul.f32 %v6833_v21, %v6093_v5  ;;  %v5925_v5 = vld [vmem:[#allocation2 + $0x90] ss:$0 sm:$0xff] }
  0x95   :  { %v2959_v20 = vadd.f32 %v2853_v36, %v2639_v13  ;;  %v3171_v9 = vsel %vm774_vm1, %v3169_v7, %v3170_v15  ;;  %v3711_v23 = vmul.f32 %v6109_v11, %v6646_v28  ;;  %v3173_v25 = vsel %vm774_vm1, %v3170_v15, %v3172_v17 }
  0x96   :  { %v3278_v26 = vadd.f32 %v3171_v9, %v2958_v16  ;;  %v3489_v27 = vrot.slane %v3391_v18, 5  ;;  %v3490_v31 = vrot.slane %v3392_v8, 5  ;;  %v3492_v33 = vrot.slane %v3393_v22, 5  ;;  %v6860_v18 = vld [vmem:[#allocation5 + $0x18] sm:$0xff] }
  0x97   :  { %v3279_v32 = vadd.f32 %v3173_v25, %v2959_v20  ;;  %v3712_v34 = vmul.f32 %v6829_v19, %v6109_v11  ;;  %v3713_v37 = vmul.f32 %v6833_v21, %v6109_v11  ;;  %v3809_v39 = vrot.slane %v3711_v23, 4  ;;  %v5941_v11 = vld [vmem:[#allocation2 + $0x91] ss:$0 sm:$0xff]  ;;  %v5957_v20 = vld [vmem:[#allocation2 + $0x92] ss:$0 sm:$0xff] }
  0x98   :  { %v3491_v38 = vsel %vm1095_vm2, %v3489_v27, %v3490_v31  ;;  %v4031_v40 = vmul.f32 %v6125_v24, %v6646_v28  ;;  %v4032_v41 = vmul.f32 %v6829_v19, %v6125_v24  ;;  %v3493_v43 = vsel %vm1095_vm2, %v3490_v31, %v3492_v33 }
  0x99   :  { %v3598_v44 = vadd.f32 %v3491_v38, %v3278_v26  ;;  %v3810_v45 = vrot.slane %v3712_v34, 4  ;;  %v3812_v46 = vrot.slane %v3713_v37, 4  ;;  %v3599_v47 = vadd.f32 %v3493_v43, %v3279_v32 }
  0x9a   :  { %v4033_v48 = vmul.f32 %v6833_v21, %v6125_v24  ;;  %v4129_v49 = vrot.slane %v4031_v40, 3  ;;  %v4130_v50 = vrot.slane %v4032_v41, 3  ;;  %v4351_v54 = vmul.f32 %v6141_v42, %v6646_v28 }
  0x9b   :  { %v3811_v52 = vsel %vm1416_vm3, %v3809_v39, %v3810_v45  ;;  %v3813_v53 = vsel %vm1416_vm3, %v3810_v45, %v3812_v46  ;;  %v4352_v55 = vmul.f32 %v6829_v19, %v6141_v42  ;;  %v4353_v59 = vmul.f32 %v6833_v21, %v6141_v42  ;;  %v5973_v46 = vld [vmem:[#allocation2 + $0x93] ss:$0 sm:$0xff] }
  0x9c   :  { %v3918_v10 = vadd.f32 %v3811_v52, %v3598_v44  ;;  %v3919_v56 = vadd.f32 %v3813_v53, %v3599_v47  ;;  %v4131_v57 = vsel %vm1737_vm4, %v4129_v49, %v4130_v50  ;;  %v4132_v58 = vrot.slane %v4033_v48, 3 }
  0x9d   :  { %v4449_v60 = vrot.slane %v4351_v54, 2  ;;  %v4450_v61 = vrot.slane %v4352_v55, 2  ;;  %v4671_v62 = vmul.f32 %v6157_v51, %v6646_v28  ;;  %v4672_v29 = vmul.f32 %v6829_v19, %v6157_v51 }
  0x9e   :  { %v4133_v0 = vsel %vm1737_vm4, %v4130_v50, %v4132_v58  ;;  %v4238_v1 = vadd.f32 %v4131_v57, %v3918_v10  ;;  %v4673_v2 = vmul.f32 %v6833_v21, %v6157_v51  ;;  %v4452_v30 = vrot.slane %v4353_v59, 2  ;;  %v5989_v50 = vld [vmem:[#allocation2 + $0x94] ss:$0 sm:$0xff]  ;;  %v6005_v57 = vld [vmem:[#allocation2 + $0x95] ss:$0 sm:$0xff] }
  0x9f   :  { %v4239_v6 = vadd.f32 %v4133_v0, %v3919_v56  ;;  %v4451_v35 = vsel %vm2058_vm5, %v4449_v60, %v4450_v61  ;;  %v4769_v7 = vrot.slane %v4671_v62, 1  ;;  %v4770_v14 = vrot.slane %v4672_v29, 1 }
  0xa0   :  { %v4558_v13 = vadd.f32 %v4451_v35, %v4238_v1  ;;  %v4772_v36 = vrot.slane %v4673_v2, 1  ;;  %v119_v28 = vmul.f32 %v6611_v12, %v83_v63  ;;  %v4453_v15 = vsel %vm2058_vm5, %v4450_v61, %v4452_v30 }
  0xa1   :  { %v120_v16 = vmul.f32 %v6611_v12, %v84_v4  ;;  %v231_v17 = vmul.f32 %v6833_v21, %v5925_v5  ;;  %v232_v8 = vmul.f32 %v6860_v18, %v5925_v5  ;;  %v4559_v9 = vadd.f32 %v4453_v15, %v4239_v6 }
  0xa2   :  { %v4771_v22 = vsel %vm2379_vm6, %v4769_v7, %v4770_v14  ;;  %v4773_v23 = vsel %vm2379_vm6, %v4770_v14, %v4772_v36  ;;  %v384_v24 = vmul.f32 %v6829_v19, %v5941_v11  ;;  %v385_v31 = vmul.f32 %v6833_v21, %v5941_v11 }
  0xa3   :  { %v4878_v25 = vadd.f32 %v4771_v22, %v4558_v13  ;;  %v263_v26 = vadd.f32 %v231_v17, %v119_v28  ;;  %v264_v27 = vadd.f32 %v232_v8, %v120_v16  ;;  %v4879_v32 = vadd.f32 %v4773_v23, %v4559_v9 }
  0xa4   :  { %v386_v33 = vmul.f32 %v6860_v18, %v5941_v11  ;;  %v499_v34 = vrot.slane %v384_v24, 7  ;;  %v705_v37 = vmul.f32 %v6829_v19, %v5957_v20  ;;  %v500_v40 = vrot.slane %v385_v31, 7  ;;  %v6021_v11 = vld [vmem:[#allocation2 + $0x96] ss:$0 sm:$0xff] }
  0xa5   :  { %v6869_v38 = vmul.f32 0.5, %v4878_v25  ;;  %v4942_v39 = vmul.f32 0.70710677, %v4878_v25  ;;  %v706_v41 = vmul.f32 %v6833_v21, %v5957_v20  ;;  %v6872_v42 = vmul.f32 0.5, %v4879_v32 }
  0xa6   :  { %v4943_v43 = vmul.f32 0.70710677, %v4879_v32  ;;  %v502_v44 = vrot.slane %v386_v33, 7  ;;  %v707_v45 = vmul.f32 %v6860_v18, %v5957_v20  ;;  %v501_v47 = vsel %vm453_vm0, %v499_v34, %v500_v40  ;;  %v6037_v20 = vld [vmem:[#allocation2 + $0x97] ss:$0 sm:$0xff] }
  0xa7   :  { %6292 = verf.f32 %v4942_v39  ;;  %v820_v48 = vrot.slane %v705_v37, 6  ;;  %v821_v49 = vrot.slane %v706_v41, 6  ;;  %v584_v52 = vadd.f32 %v501_v47, %v263_v26  ;;  %v6053_v32 = vld [vmem:[#allocation2 + $0x98] ss:$0 sm:$0xff] }
  0xa8   :  { %6294 = verf.f32 %v4943_v43  ;;  %v503_v51 = vsel %vm453_vm0, %v500_v40, %v502_v44  ;;  %v823_v53 = vrot.slane %v707_v45, 6  ;;  %v1026_v10 = vmul.f32 %v6829_v19, %v5973_v46  ;;  %v6069_v45 = vld [vmem:[#allocation2 + $0x99] ss:$0 sm:$0xff] }
  0xa9   :  { %v585_v54 = vadd.f32 %v503_v51, %v264_v27  ;;  %v822_v55 = vsel %vm774_vm1, %v820_v48, %v821_v49  ;;  %v1027_v56 = vmul.f32 %v6833_v21, %v5973_v46  ;;  %v1028_v60 = vmul.f32 %v6860_v18, %v5973_v46 }
  0xaa   :  { %v824_v58 = vsel %vm774_vm1, %v821_v49, %v823_v53  ;;  %v905_v59 = vadd.f32 %v822_v55, %v584_v52  ;;  %v1347_v61 = vmul.f32 %v6829_v19, %v5989_v50  ;;  %v1141_v63 = vrot.slane %v1026_v10, 5 }
  0xab   :  { %v906_v62 = vadd.f32 %v824_v58, %v585_v54  ;;  %v1142_v0 = vrot.slane %v1027_v56, 5  ;;  %v1348_v1 = vmul.f32 %v6833_v21, %v5989_v50  ;;  %v1144_v29 = vrot.slane %v1028_v60, 5  ;;  %v6904_v58 = vld [vmem:[#allocation5] sm:$0xff]  ;;  %v6085_v60 = vld [vmem:[#allocation2 + $0x9a] ss:$0 sm:$0xff] }
  0xac   :  { %v1349_v2 = vmul.f32 %v6860_v18, %v5989_v50  ;;  %v1462_v4 = vrot.slane %v1347_v61, 4  ;;  %v1668_v5 = vmul.f32 %v6829_v19, %v6005_v57  ;;  %v1669_v30 = vmul.f32 %v6833_v21, %v6005_v57 }
  0xad   :  { %v1143_v6 = vsel %vm1095_vm2, %v1141_v63, %v1142_v0  ;;  %v1463_v35 = vrot.slane %v1348_v1, 4  ;;  %v1670_v7 = vmul.f32 %v6860_v18, %v6005_v57  ;;  %v1145_v13 = vsel %vm1095_vm2, %v1142_v0, %v1144_v29 }
  0xae   :  { %v1226_v14 = vadd.f32 %v1143_v6, %v905_v59  ;;  %v1465_v36 = vrot.slane %v1349_v2, 4  ;;  %v1783_v28 = vrot.slane %v1668_v5, 3  ;;  %v1227_v15 = vadd.f32 %v1145_v13, %v906_v62 }
  0xaf   :  { %v1464_v16 = vsel %vm1416_vm3, %v1462_v4, %v1463_v35  ;;  %v1784_v17 = vrot.slane %v1669_v30, 3  ;;  %v1786_v8 = vrot.slane %v1670_v7, 3  ;;  %v1989_v23 = vmul.f32 %v6829_v19, %v6021_v11  ;;  %v6101_v7 = vld [vmem:[#allocation2 + $0x9b] ss:$0 sm:$0xff] }
  0xb0   :  { %v1466_v9 = vsel %vm1416_vm3, %v1463_v35, %v1465_v36  ;;  %v1547_v22 = vadd.f32 %v1464_v16, %v1226_v14  ;;  %v1990_v24 = vmul.f32 %v6833_v21, %v6021_v11  ;;  %v1991_v31 = vmul.f32 %v6860_v18, %v6021_v11  ;;  %v6117_v36 = vld [vmem:[#allocation2 + $0x9c] ss:$0 sm:$0xff] }
  0xb1   :  { %v1548_v25 = vadd.f32 %v1466_v9, %v1227_v15  ;;  %v1785_v26 = vsel %vm1737_vm4, %v1783_v28, %v1784_v17  ;;  %v1787_v27 = vsel %vm1737_vm4, %v1784_v17, %v1786_v8  ;;  %v2104_v34 = vrot.slane %v1989_v23, 2 }
  0xb2   :  { %v1868_v33 = vadd.f32 %v1785_v26, %v1547_v22  ;;  %v2105_v37 = vrot.slane %v1990_v24, 2  ;;  %v2310_v39 = vmul.f32 %v6829_v19, %v6037_v20  ;;  %v2107_v41 = vrot.slane %v1991_v31, 2  ;;  %v6133_v26 = vld [vmem:[#allocation2 + $0x9d] ss:$0 sm:$0xff] }
  0xb3   :  { %v1869_v40 = vadd.f32 %v1787_v27, %v1548_v25  ;;  %v2311_v43 = vmul.f32 %v6833_v21, %v6037_v20  ;;  %v2312_v44 = vmul.f32 %v6860_v18, %v6037_v20  ;;  %v2622_v49 = vmul.f32 %v6829_v19, %v6053_v32 }
  0xb4   :  { %v6293_v46 = vpop.eup %6292  ;;  %v2106_v47 = vsel %vm2058_vm5, %v2104_v34, %v2105_v37  ;;  %v2425_v48 = vrot.slane %v2310_v39, 1  ;;  %v2623_v50 = vmul.f32 %v6833_v21, %v6053_v32  ;;  %v2108_v53 = vsel %vm2058_vm5, %v2105_v37, %v2107_v41 }
  0xb5   :  { %v6295_v51 = vpop.eup %6294  ;;  %v5006_v52 = vadd.f32 1.0, %v6293_v46  ;;  %v2189_v54 = vadd.f32 %v2106_v47, %v1868_v33  ;;  %v2426_v55 = vrot.slane %v2311_v43, 1  ;;  %v2190_v56 = vadd.f32 %v2108_v53, %v1869_v40  ;;  %v6149_v46 = vld [vmem:[#allocation2 + $0x9e] ss:$0 sm:$0xff] }
  0xb6   :  { %v5007_v10 = vadd.f32 1.0, %v6295_v51  ;;  %v2428_v57 = vrot.slane %v2312_v44, 1  ;;  %v2775_v59 = vmul.f32 %v6904_v58, %v6069_v45  ;;  %v2776_v63 = vmul.f32 %v6829_v19, %v6069_v45 }
  0xb7   :  { %v5038_v61 = vmul.f32 %v5006_v52, %v6869_v38  ;;  %v2427_v62 = vsel %vm2379_vm6, %v2425_v48, %v2426_v55  ;;  %v2777_v0 = vmul.f32 %v6833_v21, %v6069_v45  ;;  %v3095_v30 = vmul.f32 %v6904_v58, %v6085_v60 }
  0xb8   :  { %v5039_v1 = vmul.f32 %v5007_v10, %v6872_v42  ;;  %v2429_v29 = vsel %vm2379_vm6, %v2426_v55, %v2428_v57  ;;  %v2510_v2 = vadd.f32 %v2427_v62, %v2189_v54  ;;  %v2889_v4 = vrot.slane %v2775_v59, 7  ;;  %v6165_v59 = vld [vmem:[#allocation2 + $0x9f] ss:$0 sm:$0xff] }
  0xb9   :  { %v2511_v5 = vadd.f32 %v2429_v29, %v2190_v56  ;;  %v2890_v6 = vrot.slane %v2776_v63, 7  ;;  %v2892_v35 = vrot.slane %v2777_v0, 7  ;;  %v3096_v13 = vmul.f32 %v6829_v19, %v6085_v60  ;;  %v69_v0 = vld [vmem:[#allocation2 + $0x20] sm:$0xff] }
  0xba   :  { %v5069_v11 = vpack.c.bf16 %v5039_v1, %v5038_v61  ;;  %v2654_v38 = vadd.f32 %v2622_v49, %v2510_v2  ;;  %v3097_v14 = vmul.f32 %v6833_v21, %v6085_v60  ;;  %v3209_v16 = vrot.slane %v3095_v30, 6 }
  0xbb   :  { %v2655_v28 = vadd.f32 %v2623_v50, %v2511_v5  ;;  %v2891_v42 = vsel %vm453_vm0, %v2889_v4, %v2890_v6  ;;  %v2893_v15 = vsel %vm453_vm0, %v2890_v6, %v2892_v35  ;;  %v3210_v8 = vrot.slane %v3096_v13, 6  ;;  %v70_v5 = vld [vmem:[#allocation2 + $0x28] sm:$0xff] }
  0xbc   :  { %6221 = vmatmul.mubr.bf16.vlgmr.msra.gmra.mxu0 %v5069_v11  ;;  %v2974_v17 = vadd.f32 %v2891_v42, %v2654_v38  ;;  %v3212_v20 = vrot.slane %v3097_v14, 6  ;;  %v3415_v9 = vmul.f32 %v6904_v58, %v6101_v7  ;;  %v3416_v23 = vmul.f32 %v6829_v19, %v6101_v7 }
  0xbd   :  { %v2975_v22 = vadd.f32 %v2893_v15, %v2655_v28  ;;  %v3417_v24 = vmul.f32 %v6833_v21, %v6101_v7  ;;  %v3735_v25 = vmul.f32 %v6904_v58, %v6117_v36  ;;  %v3211_v27 = vsel %vm774_vm1, %v3209_v16, %v3210_v8  ;;  %v5934_v28 = vld [vmem:[#allocation2 + $0x21] ss:$0 sm:$0xff] }
  0xbe   :  { %v3213_v31 = vsel %vm774_vm1, %v3210_v8, %v3212_v20  ;;  %v3529_v32 = vrot.slane %v3415_v9, 5  ;;  %v3736_v33 = vmul.f32 %v6829_v19, %v6117_v36  ;;  %v3294_v34 = vadd.f32 %v3211_v27, %v2974_v17  ;;  %v5950_v8 = vld [vmem:[#allocation2 + $0x22] ss:$0 sm:$0xff] }
  0xbf   :  { %v3295_v37 = vadd.f32 %v3213_v31, %v2975_v22  ;;  %v3530_v39 = vrot.slane %v3416_v23, 5  ;;  %v3532_v40 = vrot.slane %v3417_v24, 5  ;;  %v3737_v41 = vmul.f32 %v6833_v21, %v6117_v36  ;;  %v5918_v36 = vld [vmem:[#allocation2 + $0x20] ss:$0 sm:$0xff] }
  0xc0   :  { %v3849_v43 = vrot.slane %v3735_v25, 4  ;;  %v3850_v44 = vrot.slane %v3736_v33, 4  ;;  %v4055_v45 = vmul.f32 %v6904_v58, %v6133_v26  ;;  %v4056_v49 = vmul.f32 %v6829_v19, %v6133_v26 }
  0xc1   :  { %v3531_v47 = vsel %vm1095_vm2, %v3529_v32, %v3530_v39  ;;  %v3533_v48 = vsel %vm1095_vm2, %v3530_v39, %v3532_v40  ;;  %v4057_v50 = vmul.f32 %v6833_v21, %v6133_v26  ;;  %v3852_v54 = vrot.slane %v3737_v41, 4 }
  0xc2   :  { %v3614_v51 = vadd.f32 %v3531_v47, %v3294_v34  ;;  %v3615_v52 = vadd.f32 %v3533_v48, %v3295_v37  ;;  %v3851_v53 = vsel %vm1416_vm3, %v3849_v43, %v3850_v44  ;;  %v4169_v55 = vrot.slane %v4055_v45, 3  ;;  %v5966_v47 = vld [vmem:[#allocation2 + $0x23] ss:$0 sm:$0xff] }
  0xc3   :  { %v4170_v10 = vrot.slane %v4056_v49, 3  ;;  %v4172_v56 = vrot.slane %v4057_v50, 3  ;;  %v4375_v57 = vmul.f32 %v6904_v58, %v6149_v46  ;;  %v3853_v60 = vsel %vm1416_vm3, %v3850_v44, %v3852_v54 }
  0xc4   :  { %v3934_v61 = vadd.f32 %v3851_v53, %v3614_v51  ;;  %v4376_v62 = vmul.f32 %v6829_v19, %v6149_v46  ;;  %v4377_v63 = vmul.f32 %v6833_v21, %v6149_v46  ;;  %v3935_v1 = vadd.f32 %v3853_v60, %v3615_v52 }
  0xc5   :  { %v4171_v29 = vsel %vm1737_vm4, %v4169_v55, %v4170_v10  ;;  %v4173_v2 = vsel %vm1737_vm4, %v4170_v10, %v4172_v56  ;;  %v4489_v4 = vrot.slane %v4375_v57, 2  ;;  %v4695_v7 = vmul.f32 %v6904_v58, %v6165_v59  ;;  %v5982_v10 = vld [vmem:[#allocation2 + $0x24] ss:$0 sm:$0xff] }
  0xc6   :  { %v4254_v6 = vadd.f32 %v4171_v29, %v3934_v61  ;;  %v4490_v35 = vrot.slane %v4376_v62, 2  ;;  %v4492_v30 = vrot.slane %v4377_v63, 2  ;;  %v4255_v11 = vadd.f32 %v4173_v2, %v3935_v1  ;;  %v5998_v2 = vld [vmem:[#allocation2 + $0x25] ss:$0 sm:$0xff] }
  0xc7   :  { %v4696_v38 = vmul.f32 %v6829_v19, %v6165_v59  ;;  %v4697_v13 = vmul.f32 %v6833_v21, %v6165_v59  ;;  %v105_v14 = vmul.f32 %v6611_v12, %v69_v0  ;;  %v4809_v16 = vrot.slane %v4695_v7, 1 }
  0xc8   :  { %v4491_v42 = vsel %vm2058_vm5, %v4489_v4, %v4490_v35  ;;  %v4493_v15 = vsel %vm2058_vm5, %v4490_v35, %v4492_v30  ;;  %v106_v17 = vmul.f32 %v6611_v12, %v70_v5  ;;  %v217_v24 = vmul.f32 %v6833_v21, %v5918_v36 }
  0xc9   :  { %v4574_v20 = vadd.f32 %v4491_v42, %v4254_v6  ;;  %v4575_v9 = vadd.f32 %v4493_v15, %v4255_v11  ;;  %v4810_v22 = vrot.slane %v4696_v38, 1  ;;  %v4812_v23 = vrot.slane %v4697_v13, 1  ;;  %v6014_v42 = vld [vmem:[#allocation2 + $0x26] ss:$0 sm:$0xff] }
  0xca   :  { %v218_v25 = vmul.f32 %v6860_v18, %v5918_v36  ;;  %v363_v26 = vmul.f32 %v6829_v19, %v5934_v28  ;;  %v364_v27 = vmul.f32 %v6833_v21, %v5934_v28  ;;  %v365_v33 = vmul.f32 %v6860_v18, %v5934_v28 }
  0xcb   :  { %v4811_v31 = vsel %vm2379_vm6, %v4809_v16, %v4810_v22  ;;  %v4813_v32 = vsel %vm2379_vm6, %v4810_v22, %v4812_v23  ;;  %v684_v34 = vmul.f32 %v6829_v19, %v5950_v8  ;;  %v249_v40 = vadd.f32 %v217_v24, %v105_v14  ;;  %v6030_v24 = vld [vmem:[#allocation2 + $0x27] ss:$0 sm:$0xff] }
  0xcc   :  { %v4894_v37 = vadd.f32 %v4811_v31, %v4574_v20  ;;  %v4895_v39 = vadd.f32 %v4813_v32, %v4575_v9  ;;  %v250_v41 = vadd.f32 %v218_v25, %v106_v17  ;;  %v464_v43 = vrot.slane %v363_v26, 7 }
  0xcd   :  { %v465_v44 = vrot.slane %v364_v27, 7  ;;  %v467_v45 = vrot.slane %v365_v33, 7  ;;  %v685_v46 = vmul.f32 %v6833_v21, %v5950_v8  ;;  %v686_v54 = vmul.f32 %v6860_v18, %v5950_v8 }
  0xce   :  { %v6954_v48 = vmul.f32 0.5, %v4894_v37  ;;  %v6956_v49 = vmul.f32 0.5, %v4895_v39  ;;  %v4958_v50 = vmul.f32 0.70710677, %v4894_v37  ;;  %v4959_v51 = vmul.f32 0.70710677, %v4895_v39 }
  0xcf   :  { %v466_v52 = vsel %vm453_vm0, %v464_v43, %v465_v44  ;;  %v468_v53 = vsel %vm453_vm0, %v465_v44, %v467_v45  ;;  %v785_v55 = vrot.slane %v684_v34, 6  ;;  %v786_v59 = vrot.slane %v685_v46, 6  ;;  %v6046_v39 = vld [vmem:[#allocation2 + $0x28] ss:$0 sm:$0xff]  ;;  %v6062_v45 = vld [vmem:[#allocation2 + $0x29] ss:$0 sm:$0xff] }
  0xd0   :  { %6296 = verf.f32 %v4958_v50  ;;  %v570_v56 = vadd.f32 %v466_v52, %v249_v40  ;;  %v571_v57 = vadd.f32 %v468_v53, %v250_v41  ;;  %v788_v60 = vrot.slane %v686_v54, 6 }
  0xd1   :  { %6298 = verf.f32 %v4959_v51  ;;  %v1005_v61 = vmul.f32 %v6829_v19, %v5966_v47  ;;  %v1006_v62 = vmul.f32 %v6833_v21, %v5966_v47  ;;  %v787_v63 = vsel %vm774_vm1, %v785_v55, %v786_v59 }
  0xd2   :  { %v1007_v0 = vmul.f32 %v6860_v18, %v5966_v47  ;;  %v1326_v1 = vmul.f32 %v6829_v19, %v5982_v10  ;;  %v1327_v29 = vmul.f32 %v6833_v21, %v5982_v10  ;;  %v789_v4 = vsel %vm774_vm1, %v786_v59, %v788_v60 }
  0xd3   :  { %v891_v5 = vadd.f32 %v787_v63, %v570_v56  ;;  %v1106_v6 = vrot.slane %v1005_v61, 5  ;;  %v1107_v35 = vrot.slane %v1006_v62, 5  ;;  %v892_v30 = vadd.f32 %v789_v4, %v571_v57 }
  0xd4   :  { %v1109_v7 = vrot.slane %v1007_v0, 5  ;;  %v1328_v11 = vmul.f32 %v6860_v18, %v5982_v10  ;;  %v1427_v38 = vrot.slane %v1326_v1, 4  ;;  %v1428_v14 = vrot.slane %v1327_v29, 4 }
  0xd5   :  { %v1108_v13 = vsel %vm1095_vm2, %v1106_v6, %v1107_v35  ;;  %v1647_v36 = vmul.f32 %v6829_v19, %v5998_v2  ;;  %v1648_v28 = vmul.f32 %v6833_v21, %v5998_v2  ;;  %v1649_v8 = vmul.f32 %v6860_v18, %v5998_v2  ;;  %v6078_v6 = vld [vmem:[#allocation2 + $0x2a] ss:$0 sm:$0xff] }
  0xd6   :  { %v1110_v15 = vsel %vm1095_vm2, %v1107_v35, %v1109_v7  ;;  %v1212_v16 = vadd.f32 %v1108_v13, %v891_v5  ;;  %v1430_v17 = vrot.slane %v1328_v11, 4  ;;  %v1429_v9 = vsel %vm1416_vm3, %v1427_v38, %v1428_v14 }
  0xd7   :  { %v1213_v20 = vadd.f32 %v1110_v15, %v892_v30  ;;  %v1748_v22 = vrot.slane %v1647_v36, 3  ;;  %v1749_v23 = vrot.slane %v1648_v28, 3  ;;  %v1751_v27 = vrot.slane %v1649_v8, 3 }
  0xd8   :  { %v1431_v25 = vsel %vm1416_vm3, %v1428_v14, %v1430_v17  ;;  %v1533_v26 = vadd.f32 %v1429_v9, %v1212_v16  ;;  %v1968_v31 = vmul.f32 %v6829_v19, %v6014_v42  ;;  %v1969_v34 = vmul.f32 %v6833_v21, %v6014_v42  ;;  %v6094_v17 = vld [vmem:[#allocation2 + $0x2b] ss:$0 sm:$0xff] }
  0xd9   :  { %v1534_v32 = vadd.f32 %v1431_v25, %v1213_v20  ;;  %v1750_v33 = vsel %vm1737_vm4, %v1748_v22, %v1749_v23  ;;  %v1970_v37 = vmul.f32 %v6860_v18, %v6014_v42  ;;  %v1752_v40 = vsel %vm1737_vm4, %v1749_v23, %v1751_v27  ;;  %v6110_v22 = vld [vmem:[#allocation2 + $0x2c] ss:$0 sm:$0xff] }
  0xda   :  { %v1854_v41 = vadd.f32 %v1750_v33, %v1533_v26  ;;  %v2069_v43 = vrot.slane %v1968_v31, 2  ;;  %v2289_v44 = vmul.f32 %v6829_v19, %v6030_v24  ;;  %v2070_v47 = vrot.slane %v1969_v34, 2 }
  0xdb   :  { %v1855_v46 = vadd.f32 %v1752_v40, %v1534_v32  ;;  %v2072_v50 = vrot.slane %v1970_v37, 2  ;;  %v2290_v51 = vmul.f32 %v6833_v21, %v6030_v24  ;;  %v2291_v52 = vmul.f32 %v6860_v18, %v6030_v24  ;;  %v6126_v40 = vld [vmem:[#allocation2 + $0x2d] ss:$0 sm:$0xff] }
  0xdc   :  { %v2390_v53 = vrot.slane %v2289_v44, 1  ;;  %v2608_v54 = vmul.f32 %v6829_v19, %v6046_v39  ;;  %v2609_v55 = vmul.f32 %v6833_v21, %v6046_v39  ;;  %v2071_v56 = vsel %vm2058_vm5, %v2069_v43, %v2070_v47 }
  0xdd   :  { %v6297_v10 = vpop.eup %6296  ;;  %v2073_v57 = vsel %vm2058_vm5, %v2070_v47, %v2072_v50  ;;  %v2391_v59 = vrot.slane %v2290_v51, 1  ;;  %v2754_v60 = vmul.f32 %v6904_v58, %v6062_v45  ;;  %v2175_v63 = vadd.f32 %v2071_v56, %v1854_v41 }
  0xde   :  { %v6299_v61 = vpop.eup %6298  ;;  %v5022_v62 = vadd.f32 1.0, %v6297_v10  ;;  %v2176_v0 = vadd.f32 %v2073_v57, %v1855_v46  ;;  %v2393_v1 = vrot.slane %v2291_v52, 1  ;;  %v2755_v4 = vmul.f32 %v6829_v19, %v6062_v45  ;;  %v6142_v10 = vld [vmem:[#allocation2 + $0x2e] ss:$0 sm:$0xff] }
  0xdf   :  { %v5023_v29 = vadd.f32 1.0, %v6299_v61  ;;  %v2392_v2 = vsel %vm2379_vm6, %v2390_v53, %v2391_v59  ;;  %v2756_v5 = vmul.f32 %v6833_v21, %v6062_v45  ;;  %v2854_v11 = vrot.slane %v2754_v60, 7 }
  0xe0   :  { %v5054_v35 = vmul.f32 %v5022_v62, %v6954_v48  ;;  %v2394_v30 = vsel %vm2379_vm6, %v2391_v59, %v2393_v1  ;;  %v2496_v7 = vadd.f32 %v2392_v2, %v2175_v63  ;;  %v2855_v14 = vrot.slane %v2755_v4, 7  ;;  %v6158_v1 = vld [vmem:[#allocation2 + $0x2f] ss:$0 sm:$0xff] }
  0xe1   :  { %v5055_v38 = vmul.f32 %v5023_v29, %v6956_v49  ;;  %v2497_v13 = vadd.f32 %v2394_v30, %v2176_v0  ;;  %v2857_v36 = vrot.slane %v2756_v5, 7  ;;  %v3074_v42 = vmul.f32 %v6904_v58, %v6078_v6 }
  0xe2   :  { %v2640_v28 = vadd.f32 %v2608_v54, %v2496_v7  ;;  %v3075_v15 = vmul.f32 %v6829_v19, %v6078_v6  ;;  %v3076_v16 = vmul.f32 %v6833_v21, %v6078_v6  ;;  %v2856_v48 = vsel %vm453_vm0, %v2854_v11, %v2855_v14  ;;  %v71_v11 = vld [vmem:[#allocation2 + $0x30] sm:$0xff] }
  0xe3   :  { %v5077_v8 = vpack.c.bf16 %v5055_v38, %v5054_v35  ;;  %v2641_v20 = vadd.f32 %v2609_v55, %v2497_v13  ;;  %v2858_v9 = vsel %vm453_vm0, %v2855_v14, %v2857_v36  ;;  %v3174_v49 = vrot.slane %v3074_v42, 6  ;;  %v72_v38 = vld [vmem:[#allocation2 + $0x38] sm:$0xff] }
  0xe4   :  { %v2960_v23 = vadd.f32 %v2856_v48, %v2640_v28  ;;  %v3175_v24 = vrot.slane %v3075_v15, 6  ;;  %v3177_v25 = vrot.slane %v3076_v16, 6  ;;  %v3394_v27 = vmul.f32 %v6904_v58, %v6094_v17 }
  0xe5   :  { %6237 = vmatmul.mubr.bf16.vlgmr.msra.gmra.mxu1 %v5077_v8  ;;  %v2961_v26 = vadd.f32 %v2858_v9, %v2641_v20  ;;  %v3395_v31 = vmul.f32 %v6829_v19, %v6094_v17  ;;  %v3396_v32 = vmul.f32 %v6833_v21, %v6094_v17  ;;  %v3714_v37 = vmul.f32 %v6904_v58, %v6110_v22  ;;  %v5919_v8 = vld [vmem:[#allocation2 + $0x30] ss:$0 sm:$0xff]  ;;  %v5935_v20 = vld [vmem:[#allocation2 + $0x31] ss:$0 sm:$0xff] }
  0xe6   :  { %v3176_v33 = vsel %vm774_vm1, %v3174_v49, %v3175_v24  ;;  %v3178_v34 = vsel %vm774_vm1, %v3175_v24, %v3177_v25  ;;  %v3715_v39 = vmul.f32 %v6829_v19, %v6110_v22  ;;  %v3494_v44 = vrot.slane %v3394_v27, 5 }
  0xe7   :  { %v3280_v41 = vadd.f32 %v3176_v33, %v2960_v23  ;;  %v3281_v43 = vadd.f32 %v3178_v34, %v2961_v26  ;;  %v3495_v45 = vrot.slane %v3395_v31, 5  ;;  %v3497_v46 = vrot.slane %v3396_v32, 5  ;;  %v5951_v34 = vld [vmem:[#allocation2 + $0x32] ss:$0 sm:$0xff] }
  0xe8   :  { %v3716_v47 = vmul.f32 %v6833_v21, %v6110_v22  ;;  %v3814_v50 = vrot.slane %v3714_v37, 4  ;;  %v3815_v51 = vrot.slane %v3715_v39, 4  ;;  %v4034_v53 = vmul.f32 %v6904_v58, %v6126_v40 }
  0xe9   :  { %v3496_v52 = vsel %vm1095_vm2, %v3494_v44, %v3495_v45  ;;  %v4035_v54 = vmul.f32 %v6829_v19, %v6126_v40  ;;  %v4036_v55 = vmul.f32 %v6833_v21, %v6126_v40  ;;  %v3498_v56 = vsel %vm1095_vm2, %v3495_v45, %v3497_v46 }
  0xea   :  { %v3600_v57 = vadd.f32 %v3496_v52, %v3280_v41  ;;  %v3816_v59 = vsel %vm1416_vm3, %v3814_v50, %v3815_v51  ;;  %v3817_v60 = vrot.slane %v3716_v47, 4  ;;  %v3601_v61 = vadd.f32 %v3498_v56, %v3281_v43 }
  0xeb   :  { %v4134_v62 = vrot.slane %v4034_v53, 3  ;;  %v4135_v63 = vrot.slane %v4035_v54, 3  ;;  %v4137_v0 = vrot.slane %v4036_v55, 3  ;;  %v4354_v4 = vmul.f32 %v6904_v58, %v6142_v10  ;;  %v5967_v53 = vld [vmem:[#allocation2 + $0x33] ss:$0 sm:$0xff] }
  0xec   :  { %v3818_v29 = vsel %vm1416_vm3, %v3815_v51, %v3817_v60  ;;  %v3920_v2 = vadd.f32 %v3816_v59, %v3600_v57  ;;  %v4355_v5 = vmul.f32 %v6829_v19, %v6142_v10  ;;  %v4356_v7 = vmul.f32 %v6833_v21, %v6142_v10 }
  0xed   :  { %v3921_v6 = vadd.f32 %v3818_v29, %v3601_v61  ;;  %v4136_v35 = vsel %vm1737_vm4, %v4134_v62, %v4135_v63  ;;  %v4138_v30 = vsel %vm1737_vm4, %v4135_v63, %v4137_v0  ;;  %v4454_v14 = vrot.slane %v4354_v4, 2  ;;  %v5983_v62 = vld [vmem:[#allocation2 + $0x34] ss:$0 sm:$0xff] }
  0xee   :  { %v4240_v13 = vadd.f32 %v4136_v35, %v3920_v2  ;;  %v4455_v36 = vrot.slane %v4355_v5, 2  ;;  %v4674_v28 = vmul.f32 %v6904_v58, %v6158_v1  ;;  %v4457_v15 = vrot.slane %v4356_v7, 2  ;;  %v5999_v7 = vld [vmem:[#allocation2 + $0x35] ss:$0 sm:$0xff] }
  0xef   :  { %v4241_v42 = vadd.f32 %v4138_v30, %v3921_v6  ;;  %v4675_v16 = vmul.f32 %v6829_v19, %v6158_v1  ;;  %v4676_v17 = vmul.f32 %v6833_v21, %v6158_v1  ;;  %v107_v22 = vmul.f32 %v6611_v12, %v71_v11 }
  0xf0   :  { %v4456_v48 = vsel %vm2058_vm5, %v4454_v14, %v4455_v36  ;;  %v4774_v9 = vrot.slane %v4674_v28, 1  ;;  %v108_v23 = vmul.f32 %v6611_v12, %v72_v38  ;;  %v4458_v49 = vsel %vm2058_vm5, %v4455_v36, %v4457_v15 }
  0xf1   :  { %v4560_v24 = vadd.f32 %v4456_v48, %v4240_v13  ;;  %v4775_v25 = vrot.slane %v4675_v16, 1  ;;  %v4777_v26 = vrot.slane %v4676_v17, 1  ;;  %v4561_v27 = vadd.f32 %v4458_v49, %v4241_v42  ;;  %v6015_v48 = vld [vmem:[#allocation2 + $0x36] ss:$0 sm:$0xff] }
  0xf2   :  { %v219_v31 = vmul.f32 %v6833_v21, %v5919_v8  ;;  %v220_v32 = vmul.f32 %v6860_v18, %v5919_v8  ;;  %v366_v33 = vmul.f32 %v6829_v19, %v5935_v20  ;;  %v367_v40 = vmul.f32 %v6833_v21, %v5935_v20 }
  0xf3   :  { %v4776_v37 = vsel %vm2379_vm6, %v4774_v9, %v4775_v25  ;;  %v4778_v39 = vsel %vm2379_vm6, %v4775_v25, %v4777_v26  ;;  %v368_v41 = vmul.f32 %v6860_v18, %v5935_v20  ;;  %v687_v52 = vmul.f32 %v6829_v19, %v5951_v34 }
  0xf4   :  { %v4880_v43 = vadd.f32 %v4776_v37, %v4560_v24  ;;  %v4881_v44 = vadd.f32 %v4778_v39, %v4561_v27  ;;  %v251_v45 = vadd.f32 %v219_v31, %v107_v22  ;;  %v252_v46 = vadd.f32 %v220_v32, %v108_v23  ;;  %v6031_v31 = vld [vmem:[#allocation2 + $0x37] ss:$0 sm:$0xff] }
  0xf5   :  { %v469_v47 = vrot.slane %v366_v33, 7  ;;  %v470_v50 = vrot.slane %v367_v40, 7  ;;  %v472_v51 = vrot.slane %v368_v41, 7  ;;  %v688_v60 = vmul.f32 %v6833_v21, %v5951_v34 }
  0xf6   :  { %v7035_v54 = vmul.f32 0.5, %v4880_v43  ;;  %v7037_v55 = vmul.f32 0.5, %v4881_v44  ;;  %v4944_v10 = vmul.f32 0.70710677, %v4880_v43  ;;  %v4945_v56 = vmul.f32 0.70710677, %v4881_v44 }
  0xf7   :  { %v471_v57 = vsel %vm453_vm0, %v469_v47, %v470_v50  ;;  %v473_v59 = vsel %vm453_vm0, %v470_v50, %v472_v51  ;;  %v689_v61 = vmul.f32 %v6860_v18, %v5951_v34  ;;  %v790_v1 = vrot.slane %v687_v52, 6  ;;  %v6047_v44 = vld [vmem:[#allocation2 + $0x38] ss:$0 sm:$0xff]  ;;  %v6063_v51 = vld [vmem:[#allocation2 + $0x39] ss:$0 sm:$0xff] }
  0xf8   :  { %6300 = verf.f32 %v4944_v10  ;;  %v572_v63 = vadd.f32 %v471_v57, %v251_v45  ;;  %v573_v0 = vadd.f32 %v473_v59, %v252_v46  ;;  %v791_v29 = vrot.slane %v688_v60, 6 }
  0xf9   :  { %6302 = verf.f32 %v4945_v56  ;;  %v793_v2 = vrot.slane %v689_v61, 6  ;;  %v1008_v4 = vmul.f32 %v6829_v19, %v5967_v53  ;;  %v1009_v5 = vmul.f32 %v6833_v21, %v5967_v53 }
  0xfa   :  { %v1010_v6 = vmul.f32 %v6860_v18, %v5967_v53  ;;  %v1329_v35 = vmul.f32 %v6829_v19, %v5983_v62  ;;  %v1330_v30 = vmul.f32 %v6833_v21, %v5983_v62  ;;  %v792_v11 = vsel %vm774_vm1, %v790_v1, %v791_v29 }
  0xfb   :  { %v794_v38 = vsel %vm774_vm1, %v791_v29, %v793_v2  ;;  %v1111_v13 = vrot.slane %v1008_v4, 5  ;;  %v1331_v14 = vmul.f32 %v6860_v18, %v5983_v62  ;;  %v893_v36 = vadd.f32 %v792_v11, %v572_v63  ;;  %v6079_v2 = vld [vmem:[#allocation2 + $0x3a] ss:$0 sm:$0xff]  ;;  %v7071_v11 = vld [vmem:[#allocation5 + $0x8] sm:$0xff] }
  0xfc   :  { %v894_v28 = vadd.f32 %v794_v38, %v573_v0  ;;  %v1112_v42 = vrot.slane %v1009_v5, 5  ;;  %v1114_v15 = vrot.slane %v1010_v6, 5  ;;  %v1432_v16 = vrot.slane %v1329_v35, 4  ;;  %v7074_v38 = vld [vmem:[#allocation5 + $0x10] sm:$0xff] }
  0xfd   :  { %v1433_v17 = vrot.slane %v1330_v30, 4  ;;  %v1435_v8 = vrot.slane %v1331_v14, 4  ;;  %v1650_v20 = vmul.f32 %v6829_v19, %v5999_v7  ;;  %v1651_v23 = vmul.f32 %v6833_v21, %v5999_v7 }
  0xfe   :  { %v1113_v9 = vsel %vm1095_vm2, %v1111_v13, %v1112_v42  ;;  %v1115_v22 = vsel %vm1095_vm2, %v1112_v42, %v1114_v15  ;;  %v1652_v49 = vmul.f32 %v6860_v18, %v5999_v7  ;;  %v1971_v37 = vmul.f32 %v6829_v19, %v6015_v48 }
  0xff   :  { %v1214_v24 = vadd.f32 %v1113_v9, %v893_v36  ;;  %v1215_v25 = vadd.f32 %v1115_v22, %v894_v28  ;;  %v1434_v26 = vsel %vm1416_vm3, %v1432_v16, %v1433_v17  ;;  %v1436_v27 = vsel %vm1416_vm3, %v1433_v17, %v1435_v8  ;;  %v6095_v22 = vld [vmem:[#allocation2 + $0x3b] ss:$0 sm:$0xff] }
 0x100   :  { %v1753_v32 = vrot.slane %v1650_v20, 3  ;;  %v1754_v33 = vrot.slane %v1651_v23, 3  ;;  %v1756_v34 = vrot.slane %v1652_v49, 3  ;;  %v1972_v41 = vmul.f32 %v6833_v21, %v6015_v48 }
 0x101   :  { %v1535_v39 = vadd.f32 %v1434_v26, %v1214_v24  ;;  %v1536_v40 = vadd.f32 %v1436_v27, %v1215_v25  ;;  %v1973_v43 = vmul.f32 %v6860_v18, %v6015_v48  ;;  %v2074_v47 = vrot.slane %v1971_v37, 2  ;;  %v6111_v25 = vld [vmem:[#allocation2 + $0x3c] ss:$0 sm:$0xff] }
 0x102   :  { %v1755_v45 = vsel %vm1737_vm4, %v1753_v32, %v1754_v33  ;;  %v1757_v46 = vsel %vm1737_vm4, %v1754_v33, %v1756_v34  ;;  %v2292_v50 = vmul.f32 %v6829_v19, %v6031_v31  ;;  %v2075_v10 = vrot.slane %v1972_v41, 2 }
 0x103   :  { %v1856_v52 = vadd.f32 %v1755_v45, %v1535_v39  ;;  %v1857_v53 = vadd.f32 %v1757_v46, %v1536_v40  ;;  %v2077_v56 = vrot.slane %v1973_v43, 2  ;;  %v2293_v57 = vmul.f32 %v6833_v21, %v6031_v31 }
 0x104   :  { %v2294_v59 = vmul.f32 %v6860_v18, %v6031_v31  ;;  %v2395_v60 = vrot.slane %v2292_v50, 1  ;;  %v2610_v61 = vmul.f32 %v6829_v19, %v6047_v44  ;;  %v2076_v63 = vsel %vm2058_vm5, %v2074_v47, %v2075_v10 }
 0x105   :  { %v6301_v62 = vpop.eup %6300  ;;  %v2078_v0 = vsel %vm2058_vm5, %v2075_v10, %v2077_v56  ;;  %v2611_v1 = vmul.f32 %v6833_v21, %v6047_v44  ;;  %v2757_v29 = vmul.f32 %v6904_v58, %v6063_v51  ;;  %v2177_v6 = vadd.f32 %v2076_v63, %v1856_v52  ;;  %v6127_v44 = vld [vmem:[#allocation2 + $0x3d] ss:$0 sm:$0xff]  ;;  %v6143_v56 = vld [vmem:[#allocation2 + $0x3e] ss:$0 sm:$0xff] }
 0x106   :  { %v6303_v4 = vpop.eup %6302  ;;  %v5008_v5 = vadd.f32 1.0, %v6301_v62  ;;  %v2178_v35 = vadd.f32 %v2078_v0, %v1857_v53  ;;  %v2396_v30 = vrot.slane %v2293_v57, 1  ;;  %v2398_v18 = vrot.slane %v2294_v59, 1 }
 0x107   :  { %v5009_v7 = vadd.f32 1.0, %v6303_v4  ;;  %v2758_v19 = vmul.f32 %v7071_v11, %v6063_v51  ;;  %v2759_v13 = vmul.f32 %v7074_v38, %v6063_v51  ;;  %v2859_v36 = vrot.slane %v2757_v29, 7 }
 0x108   :  { %v5040_v21 = vmul.f32 %v5008_v5, %v7035_v54  ;;  %v2397_v14 = vsel %vm2379_vm6, %v2395_v60, %v2396_v30  ;;  %v3077_v28 = vmul.f32 %v6904_v58, %v6079_v2  ;;  %v2399_v15 = vsel %vm2379_vm6, %v2396_v30, %v2398_v18 }
 0x109   :  { %v5041_v42 = vmul.f32 %v5009_v7, %v7037_v55  ;;  %v2498_v16 = vadd.f32 %v2397_v14, %v2177_v6  ;;  %v2860_v17 = vrot.slane %v2758_v19, 7  ;;  %v2499_v8 = vadd.f32 %v2399_v15, %v2178_v35  ;;  %v6159_v6 = vld [vmem:[#allocation2 + $0x3f] ss:$0 sm:$0xff] }
 0x10a   :  { %v2862_v20 = vrot.slane %v2759_v13, 7  ;;  %v3078_v48 = vmul.f32 %v7071_v11, %v6079_v2  ;;  %v3079_v9 = vmul.f32 %v7074_v38, %v6079_v2  ;;  %v3179_v24 = vrot.slane %v3077_v28, 6 }
 0x10b   :  { %v5070_v23 = vpack.c.bf16 %v5041_v42, %v5040_v21  ;;  %v2642_v54 = vadd.f32 %v2610_v61, %v2498_v16  ;;  %v2861_v49 = vsel %vm453_vm0, %v2859_v36, %v2860_v17  ;;  %v2643_v26 = vadd.f32 %v2611_v1, %v2499_v8  ;;  %v85_v16 = vld [vmem:[#allocation2 + $0xa0] sm:$0xff] }
 0x10c   :  { %v2863_v55 = vsel %vm453_vm0, %v2860_v17, %v2862_v20  ;;  %v3180_v27 = vrot.slane %v3078_v48, 6  ;;  %v3182_v31 = vrot.slane %v3079_v9, 6  ;;  %v3397_v33 = vmul.f32 %v6904_v58, %v6095_v22  ;;  %v86_v9 = vld [vmem:[#allocation2 + $0xa8] sm:$0xff] }
 0x10d   :  { %6224 = vmatprep.mubr.bf16.mxu0 %v5070_v23  ;;  %v2962_v32 = vadd.f32 %v2861_v49, %v2642_v54  ;;  %v3398_v34 = vmul.f32 %v7071_v11, %v6095_v22  ;;  %v3399_v37 = vmul.f32 %v7074_v38, %v6095_v22  ;;  %v2963_v39 = vadd.f32 %v2863_v55, %v2643_v26  ;;  %v5926_v22 = vld [vmem:[#allocation2 + $0xa0] ss:$0 sm:$0xff] }
 0x10e   :  { %v3181_v40 = vsel %vm774_vm1, %v3179_v24, %v3180_v27  ;;  %v3183_v41 = vsel %vm774_vm1, %v3180_v27, %v3182_v31  ;;  %v3717_v43 = vmul.f32 %v6904_v58, %v6111_v25  ;;  %v3499_v46 = vrot.slane %v3397_v33, 5 }
 0x10f   :  { %v3282_v45 = vadd.f32 %v3181_v40, %v2962_v32  ;;  %v3500_v47 = vrot.slane %v3398_v34, 5  ;;  %v3502_v50 = vrot.slane %v3399_v37, 5  ;;  %v3283_v51 = vadd.f32 %v3183_v41, %v2963_v39  ;;  %v7114_v34 = vld [vmem:[#allocation5 + $0x18] sm:$0xff]  ;;  %v5958_v39 = vld [vmem:[#allocation2 + $0xa2] ss:$0 sm:$0xff] }
 0x110   :  { %v3718_v52 = vmul.f32 %v7071_v11, %v6111_v25  ;;  %v3719_v53 = vmul.f32 %v7074_v38, %v6111_v25  ;;  %v3819_v10 = vrot.slane %v3717_v43, 4  ;;  %v4037_v60 = vmul.f32 %v6904_v58, %v6127_v44  ;;  %v5942_v25 = vld [vmem:[#allocation2 + $0xa1] ss:$0 sm:$0xff] }
 0x111   :  { %v3501_v57 = vsel %vm1095_vm2, %v3499_v46, %v3500_v47  ;;  %v3503_v59 = vsel %vm1095_vm2, %v3500_v47, %v3502_v50  ;;  %v4038_v61 = vmul.f32 %v7071_v11, %v6127_v44  ;;  %v4039_v29 = vmul.f32 %v7074_v38, %v6127_v44 }
 0x112   :  { %v3602_v62 = vadd.f32 %v3501_v57, %v3282_v45  ;;  %v3603_v63 = vadd.f32 %v3503_v59, %v3283_v51  ;;  %v3820_v0 = vrot.slane %v3718_v52, 4  ;;  %v3822_v1 = vrot.slane %v3719_v53, 4 }
 0x113   :  { %v4139_v2 = vrot.slane %v4037_v60, 3  ;;  %v4140_v4 = vrot.slane %v4038_v61, 3  ;;  %v4357_v5 = vmul.f32 %v6904_v58, %v6143_v56  ;;  %v4358_v7 = vmul.f32 %v7071_v11, %v6143_v56 }
 0x114   :  { %v3821_v35 = vsel %vm1416_vm3, %v3819_v10, %v3820_v0  ;;  %v3823_v30 = vsel %vm1416_vm3, %v3820_v0, %v3822_v1  ;;  %v4359_v18 = vmul.f32 %v7074_v38, %v6143_v56  ;;  %v4142_v14 = vrot.slane %v4039_v29, 3  ;;  %v5974_v56 = vld [vmem:[#allocation2 + $0xa3] ss:$0 sm:$0xff] }
 0x115   :  { %v3922_v19 = vadd.f32 %v3821_v35, %v3602_v62  ;;  %v3923_v13 = vadd.f32 %v3823_v30, %v3603_v63  ;;  %v4141_v21 = vsel %vm1737_vm4, %v4139_v2, %v4140_v4  ;;  %v4459_v36 = vrot.slane %v4357_v5, 2  ;;  %v5990_v5 = vld [vmem:[#allocation2 + $0xa4] ss:$0 sm:$0xff] }
 0x116   :  { %v4460_v28 = vrot.slane %v4358_v7, 2  ;;  %v4462_v42 = vrot.slane %v4359_v18, 2  ;;  %v4677_v15 = vmul.f32 %v6904_v58, %v6159_v6  ;;  %v4143_v17 = vsel %vm1737_vm4, %v4140_v4, %v4142_v14 }
 0x117   :  { %v4242_v8 = vadd.f32 %v4141_v21, %v3922_v19  ;;  %v4678_v20 = vmul.f32 %v7071_v11, %v6159_v6  ;;  %v4679_v48 = vmul.f32 %v7074_v38, %v6159_v6  ;;  %v4243_v23 = vadd.f32 %v4143_v17, %v3923_v13  ;;  %v6006_v21 = vld [vmem:[#allocation2 + $0xa5] ss:$0 sm:$0xff] }
 0x118   :  { %v4461_v54 = vsel %vm2058_vm5, %v4459_v36, %v4460_v28  ;;  %v4463_v49 = vsel %vm2058_vm5, %v4460_v28, %v4462_v42  ;;  %v4779_v24 = vrot.slane %v4677_v15, 1  ;;  %v121_v27 = vmul.f32 %v6611_v12, %v85_v16 }
 0x119   :  { %v4562_v26 = vadd.f32 %v4461_v54, %v4242_v8  ;;  %v4780_v55 = vrot.slane %v4678_v20, 1  ;;  %v4782_v58 = vrot.slane %v4679_v48, 1  ;;  %v4563_v31 = vadd.f32 %v4463_v49, %v4243_v23  ;;  %v6022_v23 = vld [vmem:[#allocation2 + $0xa6] ss:$0 sm:$0xff] }
 0x11a   :  { %v122_v32 = vmul.f32 %v6611_v12, %v86_v9  ;;  %v233_v33 = vmul.f32 %v7074_v38, %v5926_v22  ;;  %v234_v37 = vmul.f32 %v7114_v34, %v5926_v22  ;;  %v387_v43 = vmul.f32 %v7071_v11, %v5942_v25 }
 0x11b   :  { %v4781_v40 = vsel %vm2379_vm6, %v4779_v24, %v4780_v55  ;;  %v4783_v41 = vsel %vm2379_vm6, %v4780_v55, %v4782_v58  ;;  %v388_v44 = vmul.f32 %v7074_v38, %v5942_v25  ;;  %v389_v51 = vmul.f32 %v7114_v34, %v5942_v25 }
 0x11c   :  { %v4882_v45 = vadd.f32 %v4781_v40, %v4562_v26  ;;  %v4883_v46 = vadd.f32 %v4783_v41, %v4563_v31  ;;  %v265_v47 = vadd.f32 %v233_v33, %v121_v27  ;;  %v266_v50 = vadd.f32 %v234_v37, %v122_v32 }
 0x11d   :  { %v504_v52 = vrot.slane %v387_v43, 7  ;;  %v505_v53 = vrot.slane %v388_v44, 7  ;;  %v708_v10 = vmul.f32 %v7071_v11, %v5958_v39  ;;  %v507_v63 = vrot.slane %v389_v51, 7 }
 0x11e   :  { %v7123_v57 = vmul.f32 0.5, %v4882_v45  ;;  %v7125_v59 = vmul.f32 0.5, %v4883_v46  ;;  %v4946_v60 = vmul.f32 0.70710677, %v4882_v45  ;;  %v4947_v61 = vmul.f32 0.70710677, %v4883_v46 }
 0x11f   :  { %v506_v62 = vsel %vm453_vm0, %v504_v52, %v505_v53  ;;  %v709_v0 = vmul.f32 %v7074_v38, %v5958_v39  ;;  %v710_v1 = vmul.f32 %v7114_v34, %v5958_v39  ;;  %v825_v2 = vrot.slane %v708_v10, 6  ;;  %v6038_v39 = vld [vmem:[#allocation2 + $0xa7] ss:$0 sm:$0xff]  ;;  %v6054_v45 = vld [vmem:[#allocation2 + $0xa8] ss:$0 sm:$0xff] }
 0x120   :  { %6304 = verf.f32 %v4946_v60  ;;  %v586_v29 = vadd.f32 %v506_v62, %v265_v47  ;;  %v1029_v4 = vmul.f32 %v7071_v11, %v5974_v56  ;;  %v508_v6 = vsel %vm453_vm0, %v505_v53, %v507_v63 }
 0x121   :  { %6306 = verf.f32 %v4947_v61  ;;  %v826_v35 = vrot.slane %v709_v0, 6  ;;  %v828_v30 = vrot.slane %v710_v1, 6  ;;  %v587_v7 = vadd.f32 %v508_v6, %v266_v50  ;;  %v6070_v0 = vld [vmem:[#allocation2 + $0xa9] ss:$0 sm:$0xff]  ;;  %v6086_v6 = vld [vmem:[#allocation2 + $0xaa] ss:$0 sm:$0xff] }
 0x122   :  { %v1030_v18 = vmul.f32 %v7074_v38, %v5974_v56  ;;  %v1031_v19 = vmul.f32 %v7114_v34, %v5974_v56  ;;  %v1146_v13 = vrot.slane %v1029_v4, 5  ;;  %v1350_v28 = vmul.f32 %v7071_v11, %v5990_v5 }
 0x123   :  { %v827_v14 = vsel %vm774_vm1, %v825_v2, %v826_v35  ;;  %v829_v36 = vsel %vm774_vm1, %v826_v35, %v828_v30  ;;  %v1351_v42 = vmul.f32 %v7074_v38, %v5990_v5  ;;  %v1352_v20 = vmul.f32 %v7114_v34, %v5990_v5 }
 0x124   :  { %v907_v15 = vadd.f32 %v827_v14, %v586_v29  ;;  %v908_v16 = vadd.f32 %v829_v36, %v587_v7  ;;  %v1147_v17 = vrot.slane %v1030_v18, 5  ;;  %v1149_v8 = vrot.slane %v1031_v19, 5  ;;  %v7158_v14 = vld [vmem:[#allocation5] sm:$0xff] }
 0x125   :  { %v1467_v48 = vrot.slane %v1350_v28, 4  ;;  %v1468_v9 = vrot.slane %v1351_v42, 4  ;;  %v1671_v22 = vmul.f32 %v7071_v11, %v6006_v21  ;;  %v1672_v24 = vmul.f32 %v7074_v38, %v6006_v21 }
 0x126   :  { %v1148_v54 = vsel %vm1095_vm2, %v1146_v13, %v1147_v17  ;;  %v1150_v49 = vsel %vm1095_vm2, %v1147_v17, %v1149_v8  ;;  %v1673_v25 = vmul.f32 %v7114_v34, %v6006_v21  ;;  %v1470_v27 = vrot.slane %v1352_v20, 4 }
 0x127   :  { %v1228_v26 = vadd.f32 %v1148_v54, %v907_v15  ;;  %v1229_v55 = vadd.f32 %v1150_v49, %v908_v16  ;;  %v1469_v58 = vsel %vm1416_vm3, %v1467_v48, %v1468_v9  ;;  %v1788_v31 = vrot.slane %v1671_v22, 3 }
 0x128   :  { %v1789_v32 = vrot.slane %v1672_v24, 3  ;;  %v1791_v33 = vrot.slane %v1673_v25, 3  ;;  %v1992_v37 = vmul.f32 %v7071_v11, %v6022_v23  ;;  %v1471_v40 = vsel %vm1416_vm3, %v1468_v9, %v1470_v27  ;;  %v6102_v24 = vld [vmem:[#allocation2 + $0xab] ss:$0 sm:$0xff] }
 0x129   :  { %v1549_v41 = vadd.f32 %v1469_v58, %v1228_v26  ;;  %v1993_v43 = vmul.f32 %v7074_v38, %v6022_v23  ;;  %v1994_v44 = vmul.f32 %v7114_v34, %v6022_v23  ;;  %v1550_v46 = vadd.f32 %v1471_v40, %v1229_v55  ;;  %v6118_v58 = vld [vmem:[#allocation2 + $0xac] ss:$0 sm:$0xff] }
 0x12a   :  { %v1790_v47 = vsel %vm1737_vm4, %v1788_v31, %v1789_v32  ;;  %v1792_v50 = vsel %vm1737_vm4, %v1789_v32, %v1791_v33  ;;  %v2109_v51 = vrot.slane %v1992_v37, 2  ;;  %v2313_v56 = vmul.f32 %v7071_v11, %v6038_v39 }
 0x12b   :  { %v1870_v52 = vadd.f32 %v1790_v47, %v1549_v41  ;;  %v2110_v53 = vrot.slane %v1993_v43, 2  ;;  %v2112_v10 = vrot.slane %v1994_v44, 2  ;;  %v1871_v60 = vadd.f32 %v1792_v50, %v1550_v46  ;;  %v6134_v46 = vld [vmem:[#allocation2 + $0xad] ss:$0 sm:$0xff] }
 0x12c   :  { %v2314_v61 = vmul.f32 %v7074_v38, %v6038_v39  ;;  %v2315_v62 = vmul.f32 %v7114_v34, %v6038_v39  ;;  %v2624_v63 = vmul.f32 %v7071_v11, %v6054_v45  ;;  %v2430_v4 = vrot.slane %v2313_v56, 1 }
 0x12d   :  { %v6305_v1 = vpop.eup %6304  ;;  %v2111_v29 = vsel %vm2058_vm5, %v2109_v51, %v2110_v53  ;;  %v2113_v2 = vsel %vm2058_vm5, %v2110_v53, %v2112_v10  ;;  %v2625_v5 = vmul.f32 %v7074_v38, %v6054_v45  ;;  %v2778_v36 = vmul.f32 %v7158_v14, %v6070_v0 }
 0x12e   :  { %v6307_v35 = vpop.eup %6306  ;;  %v5010_v30 = vadd.f32 1.0, %v6305_v1  ;;  %v2191_v7 = vadd.f32 %v2111_v29, %v1870_v52  ;;  %v2192_v18 = vadd.f32 %v2113_v2, %v1871_v60  ;;  %v2431_v19 = vrot.slane %v2314_v61, 1  ;;  %v6150_v1 = vld [vmem:[#allocation2 + $0xae] ss:$0 sm:$0xff] }
 0x12f   :  { %v5011_v13 = vadd.f32 1.0, %v6307_v35  ;;  %v2433_v21 = vrot.slane %v2315_v62, 1  ;;  %v2779_v28 = vmul.f32 %v7071_v11, %v6070_v0  ;;  %v2780_v16 = vmul.f32 %v7074_v38, %v6070_v0 }
 0x130   :  { %v5042_v42 = vmul.f32 %v5010_v30, %v7123_v57  ;;  %v2432_v15 = vsel %vm2379_vm6, %v2430_v4, %v2431_v19  ;;  %v3098_v17 = vmul.f32 %v7158_v14, %v6086_v6  ;;  %v2894_v9 = vrot.slane %v2778_v36, 7 }
 0x131   :  { %v5043_v8 = vmul.f32 %v5011_v13, %v7125_v59  ;;  %v2434_v20 = vsel %vm2379_vm6, %v2431_v19, %v2433_v21  ;;  %v2512_v48 = vadd.f32 %v2432_v15, %v2191_v7  ;;  %v2895_v23 = vrot.slane %v2779_v28, 7 }
 0x132   :  { %v2513_v22 = vadd.f32 %v2434_v20, %v2192_v18  ;;  %v2897_v54 = vrot.slane %v2780_v16, 7  ;;  %v3099_v49 = vmul.f32 %v7071_v11, %v6086_v6  ;;  %v3100_v26 = vmul.f32 %v7074_v38, %v6086_v6  ;;  %v6166_v18 = vld [vmem:[#allocation2 + $0xaf] ss:$0 sm:$0xff] }
 0x133   :  { %v5071_v25 = vpack.c.bf16 %v5043_v8, %v5042_v42  ;;  %v2656_v57 = vadd.f32 %v2624_v63, %v2512_v48  ;;  %v3214_v55 = vrot.slane %v3098_v17, 6  ;;  %v2896_v31 = vsel %vm453_vm0, %v2894_v9, %v2895_v23  ;;  %v87_v9 = vld [vmem:[#allocation2 + $0xb0] sm:$0xff] }
 0x134   :  { %v2657_v27 = vadd.f32 %v2625_v5, %v2513_v22  ;;  %v2898_v59 = vsel %vm453_vm0, %v2895_v23, %v2897_v54  ;;  %v3215_v32 = vrot.slane %v3099_v49, 6  ;;  %v3217_v37 = vrot.slane %v3100_v26, 6 }
 0x135   :  { %6225 = vmatmul.mubr.bf16.gmra.mxu0 %v5071_v25  ;;  %v2976_v33 = vadd.f32 %v2896_v31, %v2656_v57  ;;  %v3418_v39 = vmul.f32 %v7158_v14, %v6102_v24  ;;  %v3419_v40 = vmul.f32 %v7071_v11, %v6102_v24  ;;  %v3420_v44 = vmul.f32 %v7074_v38, %v6102_v24  ;;  %v88_v24 = vld [vmem:[#allocation2 + $0xb8] sm:$0xff]  ;;  %v5927_v25 = vld [vmem:[#allocation2 + $0xb0] ss:$0 sm:$0xff] }
 0x136   :  { %v2977_v41 = vadd.f32 %v2898_v59, %v2657_v27  ;;  %v3216_v43 = vsel %vm774_vm1, %v3214_v55, %v3215_v32  ;;  %v3738_v45 = vmul.f32 %v7158_v14, %v6118_v58  ;;  %v3218_v47 = vsel %vm774_vm1, %v3215_v32, %v3217_v37  ;;  %v5943_v27 = vld [vmem:[#allocation2 + $0xb1] ss:$0 sm:$0xff] }
 0x137   :  { %v3296_v50 = vadd.f32 %v3216_v43, %v2976_v33  ;;  %v3534_v51 = vrot.slane %v3418_v39, 5  ;;  %v3535_v52 = vrot.slane %v3419_v40, 5  ;;  %v3537_v10 = vrot.slane %v3420_v44, 5  ;;  %v5959_v43 = vld [vmem:[#allocation2 + $0xb2] ss:$0 sm:$0xff] }
 0x138   :  { %v3297_v53 = vadd.f32 %v3218_v47, %v2977_v41  ;;  %v3739_v56 = vmul.f32 %v7071_v11, %v6118_v58  ;;  %v3740_v60 = vmul.f32 %v7074_v38, %v6118_v58  ;;  %v3854_v62 = vrot.slane %v3738_v45, 4 }
 0x139   :  { %v3536_v61 = vsel %vm1095_vm2, %v3534_v51, %v3535_v52  ;;  %v4058_v63 = vmul.f32 %v7158_v14, %v6134_v46  ;;  %v4059_v0 = vmul.f32 %v7071_v11, %v6134_v46  ;;  %v3538_v29 = vsel %vm1095_vm2, %v3535_v52, %v3537_v10 }
 0x13a   :  { %v3616_v2 = vadd.f32 %v3536_v61, %v3296_v50  ;;  %v3855_v4 = vrot.slane %v3739_v56, 4  ;;  %v3857_v5 = vrot.slane %v3740_v60, 4  ;;  %v3617_v6 = vadd.f32 %v3538_v29, %v3297_v53 }
 0x13b   :  { %v4060_v35 = vmul.f32 %v7074_v38, %v6134_v46  ;;  %v4174_v30 = vrot.slane %v4058_v63, 3  ;;  %v4175_v7 = vrot.slane %v4059_v0, 3  ;;  %v4378_v21 = vmul.f32 %v7158_v14, %v6150_v1 }
 0x13c   :  { %v3856_v19 = vsel %vm1416_vm3, %v3854_v62, %v3855_v4  ;;  %v3858_v13 = vsel %vm1416_vm3, %v3855_v4, %v3857_v5  ;;  %v4379_v36 = vmul.f32 %v7071_v11, %v6150_v1  ;;  %v4380_v17 = vmul.f32 %v7074_v38, %v6150_v1 }
 0x13d   :  { %v3936_v28 = vadd.f32 %v3856_v19, %v3616_v2  ;;  %v3937_v42 = vadd.f32 %v3858_v13, %v3617_v6  ;;  %v4176_v15 = vsel %vm1737_vm4, %v4174_v30, %v4175_v7  ;;  %v4177_v16 = vrot.slane %v4060_v35, 3  ;;  %v5975_v6 = vld [vmem:[#allocation2 + $0xb3] ss:$0 sm:$0xff] }
 0x13e   :  { %v4494_v8 = vrot.slane %v4378_v21, 2  ;;  %v4495_v20 = vrot.slane %v4379_v36, 2  ;;  %v4698_v48 = vmul.f32 %v7158_v14, %v6166_v18  ;;  %v4699_v54 = vmul.f32 %v7071_v11, %v6166_v18 }
 0x13f   :  { %v4178_v22 = vsel %vm1737_vm4, %v4175_v7, %v4177_v16  ;;  %v4256_v23 = vadd.f32 %v4176_v15, %v3936_v28  ;;  %v4700_v49 = vmul.f32 %v7074_v38, %v6166_v18  ;;  %v4497_v55 = vrot.slane %v4380_v17, 2  ;;  %v5991_v18 = vld [vmem:[#allocation2 + $0xb4] ss:$0 sm:$0xff]  ;;  %v6007_v16 = vld [vmem:[#allocation2 + $0xb5] ss:$0 sm:$0xff] }
 0x140   :  { %v4257_v57 = vadd.f32 %v4178_v22, %v3937_v42  ;;  %v4496_v26 = vsel %vm2058_vm5, %v4494_v8, %v4495_v20  ;;  %v4814_v58 = vrot.slane %v4698_v48, 1  ;;  %v4815_v59 = vrot.slane %v4699_v54, 1 }
 0x141   :  { %v4576_v31 = vadd.f32 %v4496_v26, %v4256_v23  ;;  %v4817_v32 = vrot.slane %v4700_v49, 1  ;;  %v123_v33 = vmul.f32 %v6611_v12, %v87_v9  ;;  %v4498_v37 = vsel %vm2058_vm5, %v4495_v20, %v4497_v55 }
 0x142   :  { %v124_v39 = vmul.f32 %v6611_v12, %v88_v24  ;;  %v235_v40 = vmul.f32 %v7074_v38, %v5927_v25  ;;  %v236_v41 = vmul.f32 %v7114_v34, %v5927_v25  ;;  %v4577_v44 = vadd.f32 %v4498_v37, %v4257_v57 }
 0x143   :  { %v4816_v45 = vsel %vm2379_vm6, %v4814_v58, %v4815_v59  ;;  %v4818_v46 = vsel %vm2379_vm6, %v4815_v59, %v4817_v32  ;;  %v390_v47 = vmul.f32 %v7071_v11, %v5943_v27  ;;  %v391_v53 = vmul.f32 %v7074_v38, %v5943_v27 }
 0x144   :  { %v4896_v50 = vadd.f32 %v4816_v45, %v4576_v31  ;;  %v267_v51 = vadd.f32 %v235_v40, %v123_v33  ;;  %v268_v52 = vadd.f32 %v236_v41, %v124_v39  ;;  %v4897_v10 = vadd.f32 %v4818_v46, %v4577_v44  ;;  %v6023_v31 = vld [vmem:[#allocation2 + $0xb6] ss:$0 sm:$0xff]  ;;  %v6039_v44 = vld [vmem:[#allocation2 + $0xb7] ss:$0 sm:$0xff] }
 0x145   :  { %v392_v56 = vmul.f32 %v7114_v34, %v5943_v27  ;;  %v509_v60 = vrot.slane %v390_v47, 7  ;;  %v711_v61 = vmul.f32 %v7071_v11, %v5959_v43  ;;  %v510_v0 = vrot.slane %v391_v53, 7 }
 0x146   :  { %v7207_v62 = vmul.f32 0.5, %v4896_v50  ;;  %v4960_v63 = vmul.f32 0.70710677, %v4896_v50  ;;  %v712_v1 = vmul.f32 %v7074_v38, %v5959_v43  ;;  %v7210_v29 = vmul.f32 0.5, %v4897_v10 }
 0x147   :  { %v4961_v2 = vmul.f32 0.70710677, %v4897_v10  ;;  %v512_v4 = vrot.slane %v392_v56, 7  ;;  %v713_v5 = vmul.f32 %v7114_v34, %v5959_v43  ;;  %v511_v35 = vsel %vm453_vm0, %v509_v60, %v510_v0  ;;  %v6055_v56 = vld [vmem:[#allocation2 + $0xb8] ss:$0 sm:$0xff] }
 0x148   :  { %6308 = verf.f32 %v4960_v63  ;;  %v830_v30 = vrot.slane %v711_v61, 6  ;;  %v831_v7 = vrot.slane %v712_v1, 6  ;;  %v588_v13 = vadd.f32 %v511_v35, %v267_v51 }
 0x149   :  { %6310 = verf.f32 %v4961_v2  ;;  %v513_v19 = vsel %vm453_vm0, %v510_v0, %v512_v4  ;;  %v833_v21 = vrot.slane %v713_v5, 6  ;;  %v1032_v42 = vmul.f32 %v7071_v11, %v5975_v6 }
 0x14a   :  { %v589_v36 = vadd.f32 %v513_v19, %v268_v52  ;;  %v832_v28 = vsel %vm774_vm1, %v830_v30, %v831_v7  ;;  %v1033_v15 = vmul.f32 %v7074_v38, %v5975_v6  ;;  %v1034_v20 = vmul.f32 %v7114_v34, %v5975_v6  ;;  %v6071_v6 = vld [vmem:[#allocation2 + $0xb9] ss:$0 sm:$0xff] }
 0x14b   :  { %v834_v17 = vsel %vm774_vm1, %v831_v7, %v833_v21  ;;  %v909_v8 = vadd.f32 %v832_v28, %v588_v13  ;;  %v1353_v48 = vmul.f32 %v7071_v11, %v5991_v18  ;;  %v1151_v22 = vrot.slane %v1032_v42, 5 }
 0x14c   :  { %v910_v9 = vadd.f32 %v834_v17, %v589_v36  ;;  %v1152_v23 = vrot.slane %v1033_v15, 5  ;;  %v1354_v54 = vmul.f32 %v7074_v38, %v5991_v18  ;;  %v1154_v49 = vrot.slane %v1034_v20, 5  ;;  %v6087_v20 = vld [vmem:[#allocation2 + $0xba] ss:$0 sm:$0xff] }
 0x14d   :  { %v1355_v24 = vmul.f32 %v7114_v34, %v5991_v18  ;;  %v1472_v25 = vrot.slane %v1353_v48, 4  ;;  %v1674_v57 = vmul.f32 %v7071_v11, %v6007_v16  ;;  %v1675_v58 = vmul.f32 %v7074_v38, %v6007_v16 }
 0x14e   :  { %v1153_v26 = vsel %vm1095_vm2, %v1151_v22, %v1152_v23  ;;  %v1473_v55 = vrot.slane %v1354_v54, 4  ;;  %v1676_v27 = vmul.f32 %v7114_v34, %v6007_v16  ;;  %v1155_v59 = vsel %vm1095_vm2, %v1152_v23, %v1154_v49 }
 0x14f   :  { %v1230_v32 = vadd.f32 %v1153_v26, %v909_v8  ;;  %v1475_v33 = vrot.slane %v1355_v24, 4  ;;  %v1793_v37 = vrot.slane %v1674_v57, 3  ;;  %v1231_v39 = vadd.f32 %v1155_v59, %v910_v9 }
 0x150   :  { %v1474_v40 = vsel %vm1416_vm3, %v1472_v25, %v1473_v55  ;;  %v1794_v41 = vrot.slane %v1675_v58, 3  ;;  %v1796_v43 = vrot.slane %v1676_v27, 3  ;;  %v1995_v47 = vmul.f32 %v7071_v11, %v6023_v31  ;;  %v6103_v27 = vld [vmem:[#allocation2 + $0xbb] ss:$0 sm:$0xff] }
 0x151   :  { %v1476_v45 = vsel %vm1416_vm3, %v1473_v55, %v1475_v33  ;;  %v1551_v46 = vadd.f32 %v1474_v40, %v1230_v32  ;;  %v1996_v50 = vmul.f32 %v7074_v38, %v6023_v31  ;;  %v1997_v10 = vmul.f32 %v7114_v34, %v6023_v31  ;;  %v6119_v33 = vld [vmem:[#allocation2 + $0xbc] ss:$0 sm:$0xff] }
 0x152   :  { %v1552_v51 = vadd.f32 %v1476_v45, %v1231_v39  ;;  %v1795_v52 = vsel %vm1737_vm4, %v1793_v37, %v1794_v41  ;;  %v1797_v53 = vsel %vm1737_vm4, %v1794_v41, %v1796_v43  ;;  %v2114_v61 = vrot.slane %v1995_v47, 2 }
 0x153   :  { %v1872_v60 = vadd.f32 %v1795_v52, %v1551_v46  ;;  %v2115_v63 = vrot.slane %v1996_v50, 2  ;;  %v2316_v0 = vmul.f32 %v7071_v11, %v6039_v44  ;;  %v2117_v2 = vrot.slane %v1997_v10, 2  ;;  %v6135_v52 = vld [vmem:[#allocation2 + $0xbd] ss:$0 sm:$0xff] }
 0x154   :  { %v1873_v1 = vadd.f32 %v1797_v53, %v1552_v51  ;;  %v2317_v4 = vmul.f32 %v7074_v38, %v6039_v44  ;;  %v2318_v5 = vmul.f32 %v7114_v34, %v6039_v44  ;;  %v2626_v18 = vmul.f32 %v7071_v11, %v6055_v56 }
 0x155   :  { %v6309_v35 = vpop.eup %6308  ;;  %v2116_v30 = vsel %vm2058_vm5, %v2114_v61, %v2115_v63  ;;  %v2435_v7 = vrot.slane %v2316_v0, 1  ;;  %v2627_v19 = vmul.f32 %v7074_v38, %v6055_v56  ;;  %v2118_v36 = vsel %vm2058_vm5, %v2115_v63, %v2117_v2 }
 0x156   :  { %v6311_v13 = vpop.eup %6310  ;;  %v5024_v21 = vadd.f32 1.0, %v6309_v35  ;;  %v2193_v28 = vadd.f32 %v2116_v30, %v1872_v60  ;;  %v2436_v42 = vrot.slane %v2317_v4, 1  ;;  %v2194_v16 = vadd.f32 %v2118_v36, %v1873_v1  ;;  %v6151_v35 = vld [vmem:[#allocation2 + $0xbe] ss:$0 sm:$0xff] }
 0x157   :  { %v5025_v15 = vadd.f32 1.0, %v6311_v13  ;;  %v2438_v17 = vrot.slane %v2318_v5, 1  ;;  %v2781_v8 = vmul.f32 %v7158_v14, %v6071_v6  ;;  %v2782_v22 = vmul.f32 %v7071_v11, %v6071_v6 }
 0x158   :  { %v5056_v48 = vmul.f32 %v5024_v21, %v7207_v62  ;;  %v2437_v9 = vsel %vm2379_vm6, %v2435_v7, %v2436_v42  ;;  %v2783_v23 = vmul.f32 %v7074_v38, %v6071_v6  ;;  %v3101_v58 = vmul.f32 %v7158_v14, %v6087_v20 }
 0x159   :  { %v5057_v54 = vmul.f32 %v5025_v15, %v7210_v29  ;;  %v2439_v49 = vsel %vm2379_vm6, %v2436_v42, %v2438_v17  ;;  %v2514_v24 = vadd.f32 %v2437_v9, %v2193_v28  ;;  %v2899_v25 = vrot.slane %v2781_v8, 7  ;;  %v6167_v8 = vld [vmem:[#allocation2 + $0xbf] ss:$0 sm:$0xff] }
 0x15a   :  { %v2515_v57 = vadd.f32 %v2439_v49, %v2194_v16  ;;  %v2900_v26 = vrot.slane %v2782_v22, 7  ;;  %v2902_v55 = vrot.slane %v2783_v23, 7  ;;  %v3102_v59 = vmul.f32 %v7071_v11, %v6087_v20  ;;  %v73_v23 = vld [vmem:[#allocation2 + $0x40] sm:$0xff] }
 0x15b   :  { %v5078_v31 = vpack.c.bf16 %v5057_v54, %v5056_v48  ;;  %v2658_v62 = vadd.f32 %v2626_v18, %v2514_v24  ;;  %v3103_v32 = vmul.f32 %v7074_v38, %v6087_v20  ;;  %v3219_v40 = vrot.slane %v3101_v58, 6 }
 0x15c   :  { %v2659_v37 = vadd.f32 %v2627_v19, %v2515_v57  ;;  %v2901_v29 = vsel %vm453_vm0, %v2899_v25, %v2900_v26  ;;  %v2903_v39 = vsel %vm453_vm0, %v2900_v26, %v2902_v55  ;;  %v3220_v43 = vrot.slane %v3102_v59, 6  ;;  %v74_v57 = vld [vmem:[#allocation2 + $0x48] sm:$0xff] }
 0x15d   :  { %6240 = vmatprep.mubr.bf16.mxu1 %v5078_v31  ;;  %v2978_v41 = vadd.f32 %v2901_v29, %v2658_v62  ;;  %v3222_v44 = vrot.slane %v3103_v32, 6  ;;  %v3421_v45 = vmul.f32 %v7158_v14, %v6103_v27  ;;  %v3422_v47 = vmul.f32 %v7071_v11, %v6103_v27 }
 0x15e   :  { %v2979_v46 = vadd.f32 %v2903_v39, %v2659_v37  ;;  %v3423_v50 = vmul.f32 %v7074_v38, %v6103_v27  ;;  %v3741_v51 = vmul.f32 %v7158_v14, %v6119_v33  ;;  %v3221_v53 = vsel %vm774_vm1, %v3219_v40, %v3220_v43  ;;  %v5936_v37 = vld [vmem:[#allocation2 + $0x41] ss:$0 sm:$0xff] }
 0x15f   :  { %v3223_v10 = vsel %vm774_vm1, %v3220_v43, %v3222_v44  ;;  %v3539_v56 = vrot.slane %v3421_v45, 5  ;;  %v3742_v60 = vmul.f32 %v7071_v11, %v6119_v33  ;;  %v3298_v61 = vadd.f32 %v3221_v53, %v2978_v41  ;;  %v5952_v43 = vld [vmem:[#allocation2 + $0x42] ss:$0 sm:$0xff] }
 0x160   :  { %v3299_v63 = vadd.f32 %v3223_v10, %v2979_v46  ;;  %v3540_v0 = vrot.slane %v3422_v47, 5  ;;  %v3542_v1 = vrot.slane %v3423_v50, 5  ;;  %v3743_v2 = vmul.f32 %v7074_v38, %v6119_v33  ;;  %v5920_v33 = vld [vmem:[#allocation2 + $0x40] ss:$0 sm:$0xff] }
 0x161   :  { %v3859_v4 = vrot.slane %v3741_v51, 4  ;;  %v3860_v5 = vrot.slane %v3742_v60, 4  ;;  %v4061_v6 = vmul.f32 %v7158_v14, %v6135_v52  ;;  %v4062_v18 = vmul.f32 %v7071_v11, %v6135_v52 }
 0x162   :  { %v3541_v30 = vsel %vm1095_vm2, %v3539_v56, %v3540_v0  ;;  %v3543_v7 = vsel %vm1095_vm2, %v3540_v0, %v3542_v1  ;;  %v4063_v19 = vmul.f32 %v7074_v38, %v6135_v52  ;;  %v3862_v28 = vrot.slane %v3743_v2, 4 }
 0x163   :  { %v3618_v13 = vadd.f32 %v3541_v30, %v3298_v61  ;;  %v3619_v21 = vadd.f32 %v3543_v7, %v3299_v63  ;;  %v3861_v36 = vsel %vm1416_vm3, %v3859_v4, %v3860_v5  ;;  %v4179_v42 = vrot.slane %v4061_v6, 3  ;;  %v5968_v30 = vld [vmem:[#allocation2 + $0x43] ss:$0 sm:$0xff] }
 0x164   :  { %v4180_v15 = vrot.slane %v4062_v18, 3  ;;  %v4182_v16 = vrot.slane %v4063_v19, 3  ;;  %v4381_v17 = vmul.f32 %v7158_v14, %v6151_v35  ;;  %v3863_v20 = vsel %vm1416_vm3, %v3860_v5, %v3862_v28 }
 0x165   :  { %v3938_v48 = vadd.f32 %v3861_v36, %v3618_v13  ;;  %v4382_v9 = vmul.f32 %v7071_v11, %v6151_v35  ;;  %v4383_v22 = vmul.f32 %v7074_v38, %v6151_v35  ;;  %v3939_v54 = vadd.f32 %v3863_v20, %v3619_v21 }
 0x166   :  { %v4181_v49 = vsel %vm1737_vm4, %v4179_v42, %v4180_v15  ;;  %v4183_v24 = vsel %vm1737_vm4, %v4180_v15, %v4182_v16  ;;  %v4499_v25 = vrot.slane %v4381_v17, 2  ;;  %v4701_v27 = vmul.f32 %v7158_v14, %v6167_v8  ;;  %v5984_v15 = vld [vmem:[#allocation2 + $0x44] ss:$0 sm:$0xff] }
 0x167   :  { %v4258_v26 = vadd.f32 %v4181_v49, %v3938_v48  ;;  %v4500_v55 = vrot.slane %v4382_v9, 2  ;;  %v4502_v58 = vrot.slane %v4383_v22, 2  ;;  %v4259_v31 = vadd.f32 %v4183_v24, %v3939_v54  ;;  %v6000_v24 = vld [vmem:[#allocation2 + $0x45] ss:$0 sm:$0xff] }
 0x168   :  { %v4702_v62 = vmul.f32 %v7071_v11, %v6167_v8  ;;  %v4703_v59 = vmul.f32 %v7074_v38, %v6167_v8  ;;  %v109_v32 = vmul.f32 %v6611_v12, %v73_v23  ;;  %v4819_v40 = vrot.slane %v4701_v27, 1 }
 0x169   :  { %v4501_v29 = vsel %vm2058_vm5, %v4499_v25, %v4500_v55  ;;  %v4503_v39 = vsel %vm2058_vm5, %v4500_v55, %v4502_v58  ;;  %v110_v41 = vmul.f32 %v6611_v12, %v74_v57  ;;  %v221_v50 = vmul.f32 %v7074_v38, %v5920_v33 }
 0x16a   :  { %v4578_v44 = vadd.f32 %v4501_v29, %v4258_v26  ;;  %v4579_v45 = vadd.f32 %v4503_v39, %v4259_v31  ;;  %v4820_v46 = vrot.slane %v4702_v62, 1  ;;  %v4822_v47 = vrot.slane %v4703_v59, 1  ;;  %v6016_v29 = vld [vmem:[#allocation2 + $0x46] ss:$0 sm:$0xff] }
 0x16b   :  { %v222_v51 = vmul.f32 %v7114_v34, %v5920_v33  ;;  %v369_v52 = vmul.f32 %v7071_v11, %v5936_v37  ;;  %v370_v53 = vmul.f32 %v7074_v38, %v5936_v37  ;;  %v371_v60 = vmul.f32 %v7114_v34, %v5936_v37 }
 0x16c   :  { %v4821_v10 = vsel %vm2379_vm6, %v4819_v40, %v4820_v46  ;;  %v4823_v56 = vsel %vm2379_vm6, %v4820_v46, %v4822_v47  ;;  %v690_v61 = vmul.f32 %v7071_v11, %v5952_v43  ;;  %v253_v1 = vadd.f32 %v221_v50, %v109_v32  ;;  %v6032_v50 = vld [vmem:[#allocation2 + $0x47] ss:$0 sm:$0xff] }
 0x16d   :  { %v4898_v63 = vadd.f32 %v4821_v10, %v4578_v44  ;;  %v4899_v0 = vadd.f32 %v4823_v56, %v4579_v45  ;;  %v254_v2 = vadd.f32 %v222_v51, %v110_v41  ;;  %v474_v4 = vrot.slane %v369_v52, 7 }
 0x16e   :  { %v475_v5 = vrot.slane %v370_v53, 7  ;;  %v477_v6 = vrot.slane %v371_v60, 7  ;;  %v691_v35 = vmul.f32 %v7074_v38, %v5952_v43  ;;  %v692_v28 = vmul.f32 %v7114_v34, %v5952_v43  ;;  %v7316_v60 = vld [vmem:[#allocation5 + $0x10] sm:$0xff] }
 0x16f   :  { %v7290_v7 = vmul.f32 0.5, %v4898_v63  ;;  %v7292_v18 = vmul.f32 0.5, %v4899_v0  ;;  %v4962_v19 = vmul.f32 0.70710677, %v4898_v63  ;;  %v4963_v13 = vmul.f32 0.70710677, %v4899_v0 }
 0x170   :  { %v476_v21 = vsel %vm453_vm0, %v474_v4, %v475_v5  ;;  %v478_v36 = vsel %vm453_vm0, %v475_v5, %v477_v6  ;;  %v795_v42 = vrot.slane %v690_v61, 6  ;;  %v796_v8 = vrot.slane %v691_v35, 6  ;;  %v6048_v0 = vld [vmem:[#allocation2 + $0x48] ss:$0 sm:$0xff]  ;;  %v6064_v6 = vld [vmem:[#allocation2 + $0x49] ss:$0 sm:$0xff] }
 0x171   :  { %6312 = verf.f32 %v4962_v19  ;;  %v574_v16 = vadd.f32 %v476_v21, %v253_v1  ;;  %v575_v17 = vadd.f32 %v478_v36, %v254_v2  ;;  %v798_v20 = vrot.slane %v692_v28, 6 }
 0x172   :  { %6314 = verf.f32 %v4963_v13  ;;  %v1011_v48 = vmul.f32 %v7071_v11, %v5968_v30  ;;  %v1012_v9 = vmul.f32 %v7074_v38, %v5968_v30  ;;  %v797_v22 = vsel %vm774_vm1, %v795_v42, %v796_v8 }
 0x173   :  { %v1013_v23 = vmul.f32 %v7114_v34, %v5968_v30  ;;  %v1332_v54 = vmul.f32 %v7071_v11, %v5984_v15  ;;  %v1333_v49 = vmul.f32 %v7074_v38, %v5984_v15  ;;  %v799_v25 = vsel %vm774_vm1, %v796_v8, %v798_v20 }
 0x174   :  { %v895_v57 = vadd.f32 %v797_v22, %v574_v16  ;;  %v1116_v26 = vrot.slane %v1011_v48, 5  ;;  %v1117_v55 = vrot.slane %v1012_v9, 5  ;;  %v896_v58 = vadd.f32 %v799_v25, %v575_v17 }
 0x175   :  { %v1119_v27 = vrot.slane %v1013_v23, 5  ;;  %v1334_v31 = vmul.f32 %v7114_v34, %v5984_v15  ;;  %v1437_v62 = vrot.slane %v1332_v54, 4  ;;  %v1438_v32 = vrot.slane %v1333_v49, 4 }
 0x176   :  { %v1118_v59 = vsel %vm1095_vm2, %v1116_v26, %v1117_v55  ;;  %v1653_v33 = vmul.f32 %v7071_v11, %v6000_v24  ;;  %v1654_v37 = vmul.f32 %v7074_v38, %v6000_v24  ;;  %v1655_v43 = vmul.f32 %v7114_v34, %v6000_v24  ;;  %v7312_v11 = vld [vmem:[#allocation5 + $0x8] sm:$0xff] }
 0x177   :  { %v1120_v39 = vsel %vm1095_vm2, %v1117_v55, %v1119_v27  ;;  %v1216_v40 = vadd.f32 %v1118_v59, %v895_v57  ;;  %v1440_v41 = vrot.slane %v1334_v31, 4  ;;  %v1439_v45 = vsel %vm1416_vm3, %v1437_v62, %v1438_v32  ;;  %v6080_v57 = vld [vmem:[#allocation2 + $0x4a] ss:$0 sm:$0xff] }
 0x178   :  { %v1217_v44 = vadd.f32 %v1120_v39, %v896_v58  ;;  %v1758_v46 = vrot.slane %v1653_v33, 3  ;;  %v1759_v47 = vrot.slane %v1654_v37, 3  ;;  %v1761_v53 = vrot.slane %v1655_v43, 3 }
 0x179   :  { %v1441_v51 = vsel %vm1416_vm3, %v1438_v32, %v1440_v41  ;;  %v1537_v52 = vadd.f32 %v1439_v45, %v1216_v40  ;;  %v1974_v38 = vmul.f32 %v7312_v11, %v6016_v29  ;;  %v1975_v61 = vmul.f32 %v7316_v60, %v6016_v29  ;;  %v6096_v40 = vld [vmem:[#allocation2 + $0x4b] ss:$0 sm:$0xff]  ;;  %v6112_v45 = vld [vmem:[#allocation2 + $0x4c] ss:$0 sm:$0xff] }
 0x17a   :  { %v1538_v10 = vadd.f32 %v1441_v51, %v1217_v44  ;;  %v1760_v56 = vsel %vm1737_vm4, %v1758_v46, %v1759_v47  ;;  %v1976_v63 = vmul.f32 %v7114_v34, %v6016_v29  ;;  %v1762_v1 = vsel %vm1737_vm4, %v1759_v47, %v1761_v53 }
 0x17b   :  { %v1858_v2 = vadd.f32 %v1760_v56, %v1537_v52  ;;  %v2079_v4 = vrot.slane %v1974_v38, 2  ;;  %v2295_v5 = vmul.f32 %v7312_v11, %v6032_v50  ;;  %v2080_v30 = vrot.slane %v1975_v61, 2 }
 0x17c   :  { %v1859_v35 = vadd.f32 %v1762_v1, %v1538_v10  ;;  %v2082_v19 = vrot.slane %v1976_v63, 2  ;;  %v2296_v13 = vmul.f32 %v7316_v60, %v6032_v50  ;;  %v2297_v21 = vmul.f32 %v7114_v34, %v6032_v50 }
 0x17d   :  { %v2400_v36 = vrot.slane %v2295_v5, 1  ;;  %v2612_v28 = vmul.f32 %v7312_v11, %v6048_v0  ;;  %v2613_v42 = vmul.f32 %v7316_v60, %v6048_v0  ;;  %v2081_v16 = vsel %vm2058_vm5, %v2079_v4, %v2080_v30  ;;  %v6128_v0 = vld [vmem:[#allocation2 + $0x4d] ss:$0 sm:$0xff] }
 0x17e   :  { %v6313_v15 = vpop.eup %6312  ;;  %v2083_v17 = vsel %vm2058_vm5, %v2080_v30, %v2082_v19  ;;  %v2401_v8 = vrot.slane %v2296_v13, 1  ;;  %v2760_v20 = vmul.f32 %v7158_v14, %v6064_v6  ;;  %v2179_v22 = vadd.f32 %v2081_v16, %v1858_v2 }
 0x17f   :  { %v6315_v48 = vpop.eup %6314  ;;  %v5026_v9 = vadd.f32 1.0, %v6313_v15  ;;  %v2180_v23 = vadd.f32 %v2083_v17, %v1859_v35  ;;  %v2403_v54 = vrot.slane %v2297_v21, 1  ;;  %v2761_v24 = vmul.f32 %v7312_v11, %v6064_v6 }
 0x180   :  { %v5027_v49 = vadd.f32 1.0, %v6315_v48  ;;  %v2402_v34 = vsel %vm2379_vm6, %v2400_v36, %v2401_v8  ;;  %v2762_v25 = vmul.f32 %v7316_v60, %v6064_v6  ;;  %v2864_v27 = vrot.slane %v2760_v20, 7 }
 0x181   :  { %v5058_v26 = vmul.f32 %v5026_v9, %v7290_v7  ;;  %v2404_v55 = vsel %vm2379_vm6, %v2401_v8, %v2403_v54  ;;  %v2500_v58 = vadd.f32 %v2402_v34, %v2179_v22  ;;  %v2865_v59 = vrot.slane %v2761_v24, 7 }
 0x182   :  { %v5059_v31 = vmul.f32 %v5027_v49, %v7292_v18  ;;  %v2501_v62 = vadd.f32 %v2404_v55, %v2180_v23  ;;  %v2867_v32 = vrot.slane %v2762_v25, 7  ;;  %v3080_v37 = vmul.f32 %v7158_v14, %v6080_v57  ;;  %v6160_v23 = vld [vmem:[#allocation2 + $0x4f] ss:$0 sm:$0xff] }
 0x183   :  { %v2644_v33 = vadd.f32 %v2612_v28, %v2500_v58  ;;  %v3081_v29 = vmul.f32 %v7312_v11, %v6080_v57  ;;  %v3082_v39 = vmul.f32 %v7316_v60, %v6080_v57  ;;  %v2866_v7 = vsel %vm453_vm0, %v2864_v27, %v2865_v59  ;;  %v75_v58 = vld [vmem:[#allocation2 + $0x50] sm:$0xff]  ;;  %v76_v27 = vld [vmem:[#allocation2 + $0x58] sm:$0xff] }
 0x184   :  { %v5079_v41 = vpack.c.bf16 %v5059_v31, %v5058_v26  ;;  %v2645_v43 = vadd.f32 %v2613_v42, %v2501_v62  ;;  %v2868_v44 = vsel %vm453_vm0, %v2865_v59, %v2867_v32  ;;  %v3184_v18 = vrot.slane %v3080_v37, 6  ;;  %v6144_v42 = vld [vmem:[#allocation2 + $0x4e] ss:$0 sm:$0xff] }
 0x185   :  { %v2964_v46 = vadd.f32 %v2866_v7, %v2644_v33  ;;  %v3185_v47 = vrot.slane %v3081_v29, 6  ;;  %v3187_v50 = vrot.slane %v3082_v39, 6  ;;  %v3400_v52 = vmul.f32 %v7158_v14, %v6096_v40 }
 0x186   :  { %6241 = vmatmul.mubr.bf16.gmra.mxu1 %v5079_v41  ;;  %v2965_v51 = vadd.f32 %v2868_v44, %v2645_v43  ;;  %v3401_v53 = vmul.f32 %v7312_v11, %v6096_v40  ;;  %v3402_v38 = vmul.f32 %v7316_v60, %v6096_v40  ;;  %v3720_v61 = vmul.f32 %v7158_v14, %v6112_v45  ;;  %v5921_v40 = vld [vmem:[#allocation2 + $0x50] ss:$0 sm:$0xff]  ;;  %v5937_v41 = vld [vmem:[#allocation2 + $0x51] ss:$0 sm:$0xff] }
 0x187   :  { %v3186_v10 = vsel %vm774_vm1, %v3184_v18, %v3185_v47  ;;  %v3188_v56 = vsel %vm774_vm1, %v3185_v47, %v3187_v50  ;;  %v3721_v63 = vmul.f32 %v7312_v11, %v6112_v45  ;;  %v3504_v4 = vrot.slane %v3400_v52, 5  ;;  %v7368_v52 = vld [vmem:[#allocation5 + $0x18] sm:$0xff] }
 0x188   :  { %v3284_v1 = vadd.f32 %v3186_v10, %v2964_v46  ;;  %v3285_v2 = vadd.f32 %v3188_v56, %v2965_v51  ;;  %v3505_v5 = vrot.slane %v3401_v53, 5  ;;  %v3507_v6 = vrot.slane %v3402_v38, 5  ;;  %v5953_v10 = vld [vmem:[#allocation2 + $0x52] ss:$0 sm:$0xff] }
 0x189   :  { %v3722_v35 = vmul.f32 %v7316_v60, %v6112_v45  ;;  %v3824_v30 = vrot.slane %v3720_v61, 4  ;;  %v3825_v19 = vrot.slane %v3721_v63, 4  ;;  %v4040_v21 = vmul.f32 %v7158_v14, %v6128_v0 }
 0x18a   :  { %v3506_v13 = vsel %vm1095_vm2, %v3504_v4, %v3505_v5  ;;  %v4041_v36 = vmul.f32 %v7312_v11, %v6128_v0  ;;  %v4042_v28 = vmul.f32 %v7316_v60, %v6128_v0  ;;  %v3508_v15 = vsel %vm1095_vm2, %v3505_v5, %v3507_v6 }
 0x18b   :  { %v3604_v16 = vadd.f32 %v3506_v13, %v3284_v1  ;;  %v3826_v17 = vsel %vm1416_vm3, %v3824_v30, %v3825_v19  ;;  %v3827_v8 = vrot.slane %v3722_v35, 4  ;;  %v3605_v20 = vadd.f32 %v3508_v15, %v3285_v2  ;;  %v5969_v13 = vld [vmem:[#allocation2 + $0x53] ss:$0 sm:$0xff] }
 0x18c   :  { %v4144_v48 = vrot.slane %v4040_v21, 3  ;;  %v4145_v9 = vrot.slane %v4041_v36, 3  ;;  %v4147_v22 = vrot.slane %v4042_v28, 3  ;;  %v4360_v34 = vmul.f32 %v7158_v14, %v6144_v42 }
 0x18d   :  { %v3828_v54 = vsel %vm1416_vm3, %v3825_v19, %v3827_v8  ;;  %v3924_v49 = vadd.f32 %v3826_v17, %v3604_v16  ;;  %v4361_v24 = vmul.f32 %v7312_v11, %v6144_v42  ;;  %v4362_v55 = vmul.f32 %v7316_v60, %v6144_v42 }
 0x18e   :  { %v3925_v25 = vadd.f32 %v3828_v54, %v3605_v20  ;;  %v4146_v57 = vsel %vm1737_vm4, %v4144_v48, %v4145_v9  ;;  %v4148_v26 = vsel %vm1737_vm4, %v4145_v9, %v4147_v22  ;;  %v4464_v62 = vrot.slane %v4360_v34, 2  ;;  %v5985_v20 = vld [vmem:[#allocation2 + $0x54] ss:$0 sm:$0xff] }
 0x18f   :  { %v4244_v31 = vadd.f32 %v4146_v57, %v3924_v49  ;;  %v4465_v59 = vrot.slane %v4361_v24, 2  ;;  %v4680_v32 = vmul.f32 %v7158_v14, %v6160_v23  ;;  %v4467_v37 = vrot.slane %v4362_v55, 2 }
 0x190   :  { %v4245_v33 = vadd.f32 %v4148_v26, %v3925_v25  ;;  %v4681_v29 = vmul.f32 %v7312_v11, %v6160_v23  ;;  %v4682_v39 = vmul.f32 %v7316_v60, %v6160_v23  ;;  %v111_v44 = vmul.f32 %v6611_v12, %v75_v58  ;;  %v6001_v26 = vld [vmem:[#allocation2 + $0x55] ss:$0 sm:$0xff] }
 0x191   :  { %v4466_v43 = vsel %vm2058_vm5, %v4464_v62, %v4465_v59  ;;  %v4784_v7 = vrot.slane %v4680_v32, 1  ;;  %v112_v45 = vmul.f32 %v6611_v12, %v76_v27  ;;  %v4468_v46 = vsel %vm2058_vm5, %v4465_v59, %v4467_v37 }
 0x192   :  { %v4564_v18 = vadd.f32 %v4466_v43, %v4244_v31  ;;  %v4785_v47 = vrot.slane %v4681_v29, 1  ;;  %v4787_v14 = vrot.slane %v4682_v39, 1  ;;  %v4565_v50 = vadd.f32 %v4468_v46, %v4245_v33 }
 0x193   :  { %v223_v51 = vmul.f32 %v7316_v60, %v5921_v40  ;;  %v224_v53 = vmul.f32 %v7368_v52, %v5921_v40  ;;  %v372_v38 = vmul.f32 %v7312_v11, %v5937_v41  ;;  %v373_v63 = vmul.f32 %v7316_v60, %v5937_v41 }
 0x194   :  { %v4786_v56 = vsel %vm2379_vm6, %v4784_v7, %v4785_v47  ;;  %v4788_v61 = vsel %vm2379_vm6, %v4785_v47, %v4787_v14  ;;  %v374_v0 = vmul.f32 %v7368_v52, %v5937_v41  ;;  %v693_v19 = vmul.f32 %v7312_v11, %v5953_v10  ;;  %v6017_v41 = vld [vmem:[#allocation2 + $0x56] ss:$0 sm:$0xff] }
 0x195   :  { %v4884_v1 = vadd.f32 %v4786_v56, %v4564_v18  ;;  %v4885_v2 = vadd.f32 %v4788_v61, %v4565_v50  ;;  %v255_v4 = vadd.f32 %v223_v51, %v111_v44  ;;  %v256_v5 = vadd.f32 %v224_v53, %v112_v45  ;;  %v6033_v50 = vld [vmem:[#allocation2 + $0x57] ss:$0 sm:$0xff] }
 0x196   :  { %v479_v6 = vrot.slane %v372_v38, 7  ;;  %v480_v35 = vrot.slane %v373_v63, 7  ;;  %v482_v30 = vrot.slane %v374_v0, 7  ;;  %v694_v17 = vmul.f32 %v7316_v60, %v5953_v10 }
 0x197   :  { %v7377_v21 = vmul.f32 0.5, %v4884_v1  ;;  %v7379_v36 = vmul.f32 0.5, %v4885_v2  ;;  %v4948_v28 = vmul.f32 0.70710677, %v4884_v1  ;;  %v4949_v42 = vmul.f32 0.70710677, %v4885_v2 }
 0x198   :  { %v481_v15 = vsel %vm453_vm0, %v479_v6, %v480_v35  ;;  %v483_v16 = vsel %vm453_vm0, %v480_v35, %v482_v30  ;;  %v695_v8 = vmul.f32 %v7368_v52, %v5953_v10  ;;  %v800_v22 = vrot.slane %v693_v19, 6  ;;  %v6049_v1 = vld [vmem:[#allocation2 + $0x58] ss:$0 sm:$0xff]  ;;  %v6065_v35 = vld [vmem:[#allocation2 + $0x59] ss:$0 sm:$0xff] }
 0x199   :  { %6316 = verf.f32 %v4948_v28  ;;  %v576_v48 = vadd.f32 %v481_v15, %v255_v4  ;;  %v577_v9 = vadd.f32 %v483_v16, %v256_v5  ;;  %v801_v23 = vrot.slane %v694_v17, 6 }
 0x19a   :  { %6318 = verf.f32 %v4949_v42  ;;  %v803_v54 = vrot.slane %v695_v8, 6  ;;  %v1014_v49 = vmul.f32 %v7312_v11, %v5969_v13  ;;  %v1015_v34 = vmul.f32 %v7316_v60, %v5969_v13 }
 0x19b   :  { %v1016_v24 = vmul.f32 %v7368_v52, %v5969_v13  ;;  %v1335_v25 = vmul.f32 %v7312_v11, %v5985_v20  ;;  %v1336_v57 = vmul.f32 %v7316_v60, %v5985_v20  ;;  %v802_v55 = vsel %vm774_vm1, %v800_v22, %v801_v23  ;;  %v7412_v22 = vld [vmem:[#allocation5] sm:$0xff] }
 0x19c   :  { %v804_v58 = vsel %vm774_vm1, %v801_v23, %v803_v54  ;;  %v1121_v27 = vrot.slane %v1014_v49, 5  ;;  %v1337_v31 = vmul.f32 %v7368_v52, %v5985_v20  ;;  %v897_v62 = vadd.f32 %v802_v55, %v576_v48  ;;  %v6081_v54 = vld [vmem:[#allocation2 + $0x5a] ss:$0 sm:$0xff] }
 0x19d   :  { %v898_v59 = vadd.f32 %v804_v58, %v577_v9  ;;  %v1122_v32 = vrot.slane %v1015_v34, 5  ;;  %v1124_v33 = vrot.slane %v1016_v24, 5  ;;  %v1442_v37 = vrot.slane %v1335_v25, 4 }
 0x19e   :  { %v1443_v29 = vrot.slane %v1336_v57, 4  ;;  %v1445_v39 = vrot.slane %v1337_v31, 4  ;;  %v1656_v40 = vmul.f32 %v7312_v11, %v6001_v26  ;;  %v1657_v44 = vmul.f32 %v7316_v60, %v6001_v26 }
 0x19f   :  { %v1123_v43 = vsel %vm1095_vm2, %v1121_v27, %v1122_v32  ;;  %v1125_v7 = vsel %vm1095_vm2, %v1122_v32, %v1124_v33  ;;  %v1658_v45 = vmul.f32 %v7368_v52, %v6001_v26  ;;  %v1977_v10 = vmul.f32 %v7312_v11, %v6017_v41 }
 0x1a0   :  { %v1218_v46 = vadd.f32 %v1123_v43, %v897_v62  ;;  %v1219_v18 = vadd.f32 %v1125_v7, %v898_v59  ;;  %v1444_v47 = vsel %vm1416_vm3, %v1442_v37, %v1443_v29  ;;  %v1446_v14 = vsel %vm1416_vm3, %v1443_v29, %v1445_v39 }
 0x1a1   :  { %v1763_v51 = vrot.slane %v1656_v40, 3  ;;  %v1764_v53 = vrot.slane %v1657_v44, 3  ;;  %v1766_v38 = vrot.slane %v1658_v45, 3  ;;  %v1978_v63 = vmul.f32 %v7316_v60, %v6017_v41  ;;  %v6097_v44 = vld [vmem:[#allocation2 + $0x5b] ss:$0 sm:$0xff] }
 0x1a2   :  { %v1539_v56 = vadd.f32 %v1444_v47, %v1218_v46  ;;  %v1540_v61 = vadd.f32 %v1446_v14, %v1219_v18  ;;  %v1979_v0 = vmul.f32 %v7368_v52, %v6017_v41  ;;  %v2084_v5 = vrot.slane %v1977_v10, 2  ;;  %v6113_v47 = vld [vmem:[#allocation2 + $0x5c] ss:$0 sm:$0xff] }
 0x1a3   :  { %v1765_v2 = vsel %vm1737_vm4, %v1763_v51, %v1764_v53  ;;  %v1767_v4 = vsel %vm1737_vm4, %v1764_v53, %v1766_v38  ;;  %v2298_v6 = vmul.f32 %v7312_v11, %v6033_v50  ;;  %v2085_v13 = vrot.slane %v1978_v63, 2 }
 0x1a4   :  { %v1860_v30 = vadd.f32 %v1765_v2, %v1539_v56  ;;  %v1861_v19 = vadd.f32 %v1767_v4, %v1540_v61  ;;  %v2087_v28 = vrot.slane %v1979_v0, 2  ;;  %v2299_v42 = vmul.f32 %v7316_v60, %v6033_v50  ;;  %v6129_v2 = vld [vmem:[#allocation2 + $0x5d] ss:$0 sm:$0xff] }
 0x1a5   :  { %v2300_v15 = vmul.f32 %v7368_v52, %v6033_v50  ;;  %v2405_v16 = vrot.slane %v2298_v6, 1  ;;  %v2614_v17 = vmul.f32 %v7312_v11, %v6049_v1  ;;  %v2086_v20 = vsel %vm2058_vm5, %v2084_v5, %v2085_v13 }
 0x1a6   :  { %v6317_v8 = vpop.eup %6316  ;;  %v2088_v48 = vsel %vm2058_vm5, %v2085_v13, %v2087_v28  ;;  %v2615_v9 = vmul.f32 %v7316_v60, %v6049_v1  ;;  %v2763_v23 = vmul.f32 %v7412_v22, %v6065_v35  ;;  %v2181_v24 = vadd.f32 %v2086_v20, %v1860_v30 }
 0x1a7   :  { %v6319_v49 = vpop.eup %6318  ;;  %v5012_v34 = vadd.f32 1.0, %v6317_v8  ;;  %v2182_v25 = vadd.f32 %v2088_v48, %v1861_v19  ;;  %v2406_v57 = vrot.slane %v2299_v42, 1  ;;  %v2408_v55 = vrot.slane %v2300_v15, 1  ;;  %v6145_v42 = vld [vmem:[#allocation2 + $0x5e] ss:$0 sm:$0xff] }
 0x1a8   :  { %v5013_v26 = vadd.f32 1.0, %v6319_v49  ;;  %v2764_v58 = vmul.f32 %v7312_v11, %v6065_v35  ;;  %v2765_v27 = vmul.f32 %v7316_v60, %v6065_v35  ;;  %v2869_v59 = vrot.slane %v2763_v23, 7 }
 0x1a9   :  { %v5044_v31 = vmul.f32 %v5012_v34, %v7377_v21  ;;  %v2407_v62 = vsel %vm2379_vm6, %v2405_v16, %v2406_v57  ;;  %v3083_v32 = vmul.f32 %v7412_v22, %v6081_v54  ;;  %v2409_v37 = vsel %vm2379_vm6, %v2406_v57, %v2408_v55 }
 0x1aa   :  { %v5045_v33 = vmul.f32 %v5013_v26, %v7379_v36  ;;  %v2502_v29 = vadd.f32 %v2407_v62, %v2181_v24  ;;  %v2870_v39 = vrot.slane %v2764_v58, 7  ;;  %v2503_v40 = vadd.f32 %v2409_v37, %v2182_v25  ;;  %v6161_v25 = vld [vmem:[#allocation2 + $0x5f] ss:$0 sm:$0xff] }
 0x1ab   :  { %v2872_v41 = vrot.slane %v2765_v27, 7  ;;  %v3084_v43 = vmul.f32 %v7312_v11, %v6081_v54  ;;  %v3085_v7 = vmul.f32 %v7316_v60, %v6081_v54  ;;  %v3189_v18 = vrot.slane %v3083_v32, 6 }
 0x1ac   :  { %v5072_v45 = vpack.c.bf16 %v5045_v33, %v5044_v31  ;;  %v2646_v21 = vadd.f32 %v2614_v17, %v2502_v29  ;;  %v2871_v46 = vsel %vm453_vm0, %v2869_v59, %v2870_v39  ;;  %v2647_v14 = vadd.f32 %v2615_v9, %v2503_v40 }
 0x1ad   :  { %v2873_v36 = vsel %vm453_vm0, %v2870_v39, %v2872_v41  ;;  %v3190_v50 = vrot.slane %v3084_v43, 6  ;;  %v3192_v51 = vrot.slane %v3085_v7, 6  ;;  %v3403_v38 = vmul.f32 %v7412_v22, %v6097_v44  ;;  %v89_v39 = vld [vmem:[#allocation2 + $0xc0] sm:$0xff] }
 0x1ae   :  { %6228 = vmatprep.mubr.bf16.mxu0 %v5072_v45  ;;  %v2966_v53 = vadd.f32 %v2871_v46, %v2646_v21  ;;  %v3404_v10 = vmul.f32 %v7312_v11, %v6097_v44  ;;  %v3405_v56 = vmul.f32 %v7316_v60, %v6097_v44  ;;  %v2967_v61 = vadd.f32 %v2873_v36, %v2647_v14  ;;  %v90_v44 = vld [vmem:[#allocation2 + $0xc8] sm:$0xff]  ;;  %v5928_v45 = vld [vmem:[#allocation2 + $0xc0] ss:$0 sm:$0xff]  ;;  %v5944_v14 = vld [vmem:[#allocation2 + $0xc1] ss:$0 sm:$0xff] }
 0x1af   :  { %v3191_v63 = vsel %vm774_vm1, %v3189_v18, %v3190_v50  ;;  %v3193_v0 = vsel %vm774_vm1, %v3190_v50, %v3192_v51  ;;  %v3723_v1 = vmul.f32 %v7412_v22, %v6113_v47  ;;  %v3509_v5 = vrot.slane %v3403_v38, 5 }
 0x1b0   :  { %v3286_v4 = vadd.f32 %v3191_v63, %v2966_v53  ;;  %v3510_v6 = vrot.slane %v3404_v10, 5  ;;  %v3512_v35 = vrot.slane %v3405_v56, 5  ;;  %v3287_v30 = vadd.f32 %v3193_v0, %v2967_v61  ;;  %v5960_v63 = vld [vmem:[#allocation2 + $0xc2] ss:$0 sm:$0xff] }
 0x1b1   :  { %v3724_v19 = vmul.f32 %v7312_v11, %v6113_v47  ;;  %v3725_v13 = vmul.f32 %v7316_v60, %v6113_v47  ;;  %v3829_v28 = vrot.slane %v3723_v1, 4  ;;  %v4043_v17 = vmul.f32 %v7412_v22, %v6129_v2 }
 0x1b2   :  { %v3511_v15 = vsel %vm1095_vm2, %v3509_v5, %v3510_v6  ;;  %v3513_v16 = vsel %vm1095_vm2, %v3510_v6, %v3512_v35  ;;  %v4044_v8 = vmul.f32 %v7312_v11, %v6129_v2  ;;  %v4045_v54 = vmul.f32 %v7316_v60, %v6129_v2 }
 0x1b3   :  { %v3606_v20 = vadd.f32 %v3511_v15, %v3286_v4  ;;  %v3607_v48 = vadd.f32 %v3513_v16, %v3287_v30  ;;  %v3830_v9 = vrot.slane %v3724_v19, 4  ;;  %v3832_v23 = vrot.slane %v3725_v13, 4  ;;  %v5976_v15 = vld [vmem:[#allocation2 + $0xc3] ss:$0 sm:$0xff] }
 0x1b4   :  { %v4149_v49 = vrot.slane %v4043_v17, 3  ;;  %v4150_v34 = vrot.slane %v4044_v8, 3  ;;  %v4363_v24 = vmul.f32 %v7412_v22, %v6145_v42  ;;  %v4364_v55 = vmul.f32 %v7312_v11, %v6145_v42 }
 0x1b5   :  { %v3831_v57 = vsel %vm1416_vm3, %v3829_v28, %v3830_v9  ;;  %v3833_v26 = vsel %vm1416_vm3, %v3830_v9, %v3832_v23  ;;  %v4365_v58 = vmul.f32 %v7316_v60, %v6145_v42  ;;  %v4152_v59 = vrot.slane %v4045_v54, 3 }
 0x1b6   :  { %v3926_v27 = vadd.f32 %v3831_v57, %v3606_v20  ;;  %v3927_v31 = vadd.f32 %v3833_v26, %v3607_v48  ;;  %v4151_v62 = vsel %vm1737_vm4, %v4149_v49, %v4150_v34  ;;  %v4469_v32 = vrot.slane %v4363_v24, 2 }
 0x1b7   :  { %v4470_v33 = vrot.slane %v4364_v55, 2  ;;  %v4472_v37 = vrot.slane %v4365_v58, 2  ;;  %v4683_v29 = vmul.f32 %v7412_v22, %v6161_v25  ;;  %v4153_v40 = vsel %vm1737_vm4, %v4150_v34, %v4152_v59  ;;  %v6008_v59 = vld [vmem:[#allocation2 + $0xc5] ss:$0 sm:$0xff] }
 0x1b8   :  { %v4246_v41 = vadd.f32 %v4151_v62, %v3926_v27  ;;  %v4684_v43 = vmul.f32 %v7312_v11, %v6161_v25  ;;  %v4685_v7 = vmul.f32 %v7316_v60, %v6161_v25  ;;  %v4247_v21 = vadd.f32 %v4153_v40, %v3927_v31  ;;  %v5992_v25 = vld [vmem:[#allocation2 + $0xc4] ss:$0 sm:$0xff] }
 0x1b9   :  { %v4471_v46 = vsel %vm2058_vm5, %v4469_v32, %v4470_v33  ;;  %v4473_v18 = vsel %vm2058_vm5, %v4470_v33, %v4472_v37  ;;  %v4789_v47 = vrot.slane %v4683_v29, 1  ;;  %v125_v53 = vmul.f32 %v6611_v12, %v89_v39 }
 0x1ba   :  { %v4566_v36 = vadd.f32 %v4471_v46, %v4246_v41  ;;  %v4790_v50 = vrot.slane %v4684_v43, 1  ;;  %v4792_v51 = vrot.slane %v4685_v7, 1  ;;  %v4567_v38 = vadd.f32 %v4473_v18, %v4247_v21  ;;  %v6024_v46 = vld [vmem:[#allocation2 + $0xc6] ss:$0 sm:$0xff] }
 0x1bb   :  { %v126_v10 = vmul.f32 %v6611_v12, %v90_v44  ;;  %v237_v56 = vmul.f32 %v7316_v60, %v5928_v45  ;;  %v238_v61 = vmul.f32 %v7368_v52, %v5928_v45  ;;  %v393_v2 = vmul.f32 %v7312_v11, %v5944_v14 }
 0x1bc   :  { %v4791_v0 = vsel %vm2379_vm6, %v4789_v47, %v4790_v50  ;;  %v4793_v1 = vsel %vm2379_vm6, %v4790_v50, %v4792_v51  ;;  %v394_v4 = vmul.f32 %v7316_v60, %v5944_v14  ;;  %v395_v19 = vmul.f32 %v7368_v52, %v5944_v14 }
 0x1bd   :  { %v4886_v5 = vadd.f32 %v4791_v0, %v4566_v36  ;;  %v4887_v6 = vadd.f32 %v4793_v1, %v4567_v38  ;;  %v269_v35 = vadd.f32 %v237_v56, %v125_v53  ;;  %v270_v30 = vadd.f32 %v238_v61, %v126_v10  ;;  %v6040_v0 = vld [vmem:[#allocation2 + $0xc7] ss:$0 sm:$0xff] }
 0x1be   :  { %v514_v13 = vrot.slane %v393_v2, 7  ;;  %v515_v28 = vrot.slane %v394_v4, 7  ;;  %v714_v42 = vmul.f32 %v7312_v11, %v5960_v63  ;;  %v517_v9 = vrot.slane %v395_v19, 7 }
 0x1bf   :  { %v7461_v16 = vmul.f32 0.5, %v4886_v5  ;;  %v7463_v17 = vmul.f32 0.5, %v4887_v6  ;;  %v4950_v8 = vmul.f32 0.70710677, %v4886_v5  ;;  %v4951_v20 = vmul.f32 0.70710677, %v4887_v6 }
 0x1c0   :  { %v516_v48 = vsel %vm453_vm0, %v514_v13, %v515_v28  ;;  %v715_v23 = vmul.f32 %v7316_v60, %v5960_v63  ;;  %v716_v54 = vmul.f32 %v7368_v52, %v5960_v63  ;;  %v835_v34 = vrot.slane %v714_v42, 6  ;;  %v6056_v6 = vld [vmem:[#allocation2 + $0xc8] ss:$0 sm:$0xff] }
 0x1c1   :  { %6320 = verf.f32 %v4950_v8  ;;  %v590_v49 = vadd.f32 %v516_v48, %v269_v35  ;;  %v1035_v24 = vmul.f32 %v7312_v11, %v5976_v15  ;;  %v518_v57 = vsel %vm453_vm0, %v515_v28, %v517_v9 }
 0x1c2   :  { %6322 = verf.f32 %v4951_v20  ;;  %v836_v26 = vrot.slane %v715_v23, 6  ;;  %v838_v55 = vrot.slane %v716_v54, 6  ;;  %v591_v58 = vadd.f32 %v518_v57, %v270_v30  ;;  %v6072_v54 = vld [vmem:[#allocation2 + $0xc9] ss:$0 sm:$0xff] }
 0x1c3   :  { %v1036_v27 = vmul.f32 %v7316_v60, %v5976_v15  ;;  %v1037_v31 = vmul.f32 %v7368_v52, %v5976_v15  ;;  %v1156_v62 = vrot.slane %v1035_v24, 5  ;;  %v1356_v37 = vmul.f32 %v7312_v11, %v5992_v25 }
 0x1c4   :  { %v837_v32 = vsel %vm774_vm1, %v835_v34, %v836_v26  ;;  %v839_v33 = vsel %vm774_vm1, %v836_v26, %v838_v55  ;;  %v1357_v29 = vmul.f32 %v7316_v60, %v5992_v25  ;;  %v1358_v7 = vmul.f32 %v7368_v52, %v5992_v25  ;;  %v6088_v26 = vld [vmem:[#allocation2 + $0xca] ss:$0 sm:$0xff] }
 0x1c5   :  { %v911_v39 = vadd.f32 %v837_v32, %v590_v49  ;;  %v912_v40 = vadd.f32 %v839_v33, %v591_v58  ;;  %v1157_v41 = vrot.slane %v1036_v27, 5  ;;  %v1159_v43 = vrot.slane %v1037_v31, 5 }
 0x1c6   :  { %v1477_v44 = vrot.slane %v1356_v37, 4  ;;  %v1478_v45 = vrot.slane %v1357_v29, 4  ;;  %v1677_v21 = vmul.f32 %v7312_v11, %v6008_v59  ;;  %v1678_v14 = vmul.f32 %v7316_v60, %v6008_v59 }
 0x1c7   :  { %v1158_v18 = vsel %vm1095_vm2, %v1156_v62, %v1157_v41  ;;  %v1160_v47 = vsel %vm1095_vm2, %v1157_v41, %v1159_v43  ;;  %v1679_v36 = vmul.f32 %v7368_v52, %v6008_v59  ;;  %v1480_v38 = vrot.slane %v1358_v7, 4 }
 0x1c8   :  { %v1232_v50 = vadd.f32 %v1158_v18, %v911_v39  ;;  %v1233_v51 = vadd.f32 %v1160_v47, %v912_v40  ;;  %v1479_v53 = vsel %vm1416_vm3, %v1477_v44, %v1478_v45  ;;  %v1798_v10 = vrot.slane %v1677_v21, 3 }
 0x1c9   :  { %v1799_v56 = vrot.slane %v1678_v14, 3  ;;  %v1801_v61 = vrot.slane %v1679_v36, 3  ;;  %v1998_v63 = vmul.f32 %v7312_v11, %v6024_v46  ;;  %v1481_v1 = vsel %vm1416_vm3, %v1478_v45, %v1480_v38  ;;  %v6104_v14 = vld [vmem:[#allocation2 + $0xcb] ss:$0 sm:$0xff] }
 0x1ca   :  { %v1553_v2 = vadd.f32 %v1479_v53, %v1232_v50  ;;  %v1999_v4 = vmul.f32 %v7316_v60, %v6024_v46  ;;  %v2000_v5 = vmul.f32 %v7368_v52, %v6024_v46  ;;  %v1554_v35 = vadd.f32 %v1481_v1, %v1233_v51  ;;  %v6120_v53 = vld [vmem:[#allocation2 + $0xcc] ss:$0 sm:$0xff] }
 0x1cb   :  { %v1800_v30 = vsel %vm1737_vm4, %v1798_v10, %v1799_v56  ;;  %v1802_v19 = vsel %vm1737_vm4, %v1799_v56, %v1801_v61  ;;  %v2119_v13 = vrot.slane %v1998_v63, 2  ;;  %v2319_v8 = vmul.f32 %v7312_v11, %v6040_v0 }
 0x1cc   :  { %v1874_v28 = vadd.f32 %v1800_v30, %v1553_v2  ;;  %v2120_v42 = vrot.slane %v1999_v4, 2  ;;  %v2122_v15 = vrot.slane %v2000_v5, 2  ;;  %v1875_v20 = vadd.f32 %v1802_v19, %v1554_v35  ;;  %v6136_v35 = vld [vmem:[#allocation2 + $0xcd] ss:$0 sm:$0xff] }
 0x1cd   :  { %v2320_v48 = vmul.f32 %v7316_v60, %v6040_v0  ;;  %v2321_v9 = vmul.f32 %v7368_v52, %v6040_v0  ;;  %v2628_v23 = vmul.f32 %v7312_v11, %v6056_v6  ;;  %v2440_v25 = vrot.slane %v2319_v8, 1 }
 0x1ce   :  { %v6321_v49 = vpop.eup %6320  ;;  %v2121_v34 = vsel %vm2058_vm5, %v2119_v13, %v2120_v42  ;;  %v2123_v24 = vsel %vm2058_vm5, %v2120_v42, %v2122_v15  ;;  %v2629_v57 = vmul.f32 %v7316_v60, %v6056_v6  ;;  %v2784_v33 = vmul.f32 %v7412_v22, %v6072_v54 }
 0x1cf   :  { %v6323_v55 = vpop.eup %6322  ;;  %v5014_v58 = vadd.f32 1.0, %v6321_v49  ;;  %v2195_v27 = vadd.f32 %v2121_v34, %v1874_v28  ;;  %v2196_v31 = vadd.f32 %v2123_v24, %v1875_v20  ;;  %v2441_v62 = vrot.slane %v2320_v48, 1  ;;  %v6152_v49 = vld [vmem:[#allocation2 + $0xce] ss:$0 sm:$0xff] }
 0x1d0   :  { %v5015_v59 = vadd.f32 1.0, %v6323_v55  ;;  %v2443_v32 = vrot.slane %v2321_v9, 1  ;;  %v2785_v37 = vmul.f32 %v7312_v11, %v6072_v54  ;;  %v2786_v40 = vmul.f32 %v7316_v60, %v6072_v54 }
 0x1d1   :  { %v5046_v29 = vmul.f32 %v5014_v58, %v7461_v16  ;;  %v2442_v39 = vsel %vm2379_vm6, %v2440_v25, %v2441_v62  ;;  %v3104_v41 = vmul.f32 %v7412_v22, %v6088_v26  ;;  %v2904_v45 = vrot.slane %v2784_v33, 7 }
 0x1d2   :  { %v5047_v43 = vmul.f32 %v5015_v59, %v7463_v17  ;;  %v2444_v7 = vsel %vm2379_vm6, %v2441_v62, %v2443_v32  ;;  %v2516_v44 = vadd.f32 %v2442_v39, %v2195_v27  ;;  %v2905_v46 = vrot.slane %v2785_v37, 7 }
 0x1d3   :  { %v2517_v21 = vadd.f32 %v2444_v7, %v2196_v31  ;;  %v2907_v18 = vrot.slane %v2786_v40, 7  ;;  %v3105_v47 = vmul.f32 %v7312_v11, %v6088_v26  ;;  %v3106_v50 = vmul.f32 %v7316_v60, %v6088_v26  ;;  %v6168_v31 = vld [vmem:[#allocation2 + $0xcf] ss:$0 sm:$0xff] }
 0x1d4   :  { %v5073_v36 = vpack.c.bf16 %v5047_v43, %v5046_v29  ;;  %v2660_v16 = vadd.f32 %v2628_v23, %v2516_v44  ;;  %v3224_v51 = vrot.slane %v3104_v41, 6  ;;  %v2906_v10 = vsel %vm453_vm0, %v2904_v45, %v2905_v46  ;;  %v91_v45 = vld [vmem:[#allocation2 + $0xd0] sm:$0xff] }
 0x1d5   :  { %v2661_v38 = vadd.f32 %v2629_v57, %v2517_v21  ;;  %v2908_v17 = vsel %vm453_vm0, %v2905_v46, %v2907_v18  ;;  %v3225_v56 = vrot.slane %v3105_v47, 6  ;;  %v3227_v63 = vrot.slane %v3106_v50, 6 }
 0x1d6   :  { %6229 = vmatmul.mubr.bf16.gmra.mxu0 %v5073_v36  ;;  %v2980_v61 = vadd.f32 %v2906_v10, %v2660_v16  ;;  %v3424_v0 = vmul.f32 %v7412_v22, %v6104_v14  ;;  %v3425_v1 = vmul.f32 %v7312_v11, %v6104_v14  ;;  %v3426_v5 = vmul.f32 %v7316_v60, %v6104_v14  ;;  %v92_v14 = vld [vmem:[#allocation2 + $0xd8] sm:$0xff]  ;;  %v5929_v36 = vld [vmem:[#allocation2 + $0xd0] ss:$0 sm:$0xff] }
 0x1d7   :  { %v2981_v2 = vadd.f32 %v2908_v17, %v2661_v38  ;;  %v3226_v4 = vsel %vm774_vm1, %v3224_v51, %v3225_v56  ;;  %v3744_v6 = vmul.f32 %v7412_v22, %v6120_v53  ;;  %v3228_v30 = vsel %vm774_vm1, %v3225_v56, %v3227_v63  ;;  %v5945_v38 = vld [vmem:[#allocation2 + $0xd1] ss:$0 sm:$0xff] }
 0x1d8   :  { %v3300_v19 = vadd.f32 %v3226_v4, %v2980_v61  ;;  %v3544_v13 = vrot.slane %v3424_v0, 5  ;;  %v3545_v28 = vrot.slane %v3425_v1, 5  ;;  %v3547_v15 = vrot.slane %v3426_v5, 5  ;;  %v5961_v4 = vld [vmem:[#allocation2 + $0xd2] ss:$0 sm:$0xff] }
 0x1d9   :  { %v3301_v42 = vadd.f32 %v3228_v30, %v2981_v2  ;;  %v3745_v8 = vmul.f32 %v7312_v11, %v6120_v53  ;;  %v3746_v20 = vmul.f32 %v7316_v60, %v6120_v53  ;;  %v3864_v9 = vrot.slane %v3744_v6, 4 }
 0x1da   :  { %v3546_v48 = vsel %vm1095_vm2, %v3544_v13, %v3545_v28  ;;  %v4064_v23 = vmul.f32 %v7412_v22, %v6136_v35  ;;  %v4065_v54 = vmul.f32 %v7312_v11, %v6136_v35  ;;  %v3548_v34 = vsel %vm1095_vm2, %v3545_v28, %v3547_v15 }
 0x1db   :  { %v3620_v24 = vadd.f32 %v3546_v48, %v3300_v19  ;;  %v3865_v25 = vrot.slane %v3745_v8, 4  ;;  %v3867_v57 = vrot.slane %v3746_v20, 4  ;;  %v3621_v26 = vadd.f32 %v3548_v34, %v3301_v42 }
 0x1dc   :  { %v4066_v55 = vmul.f32 %v7316_v60, %v6136_v35  ;;  %v4184_v58 = vrot.slane %v4064_v23, 3  ;;  %v4185_v27 = vrot.slane %v4065_v54, 3  ;;  %v4384_v32 = vmul.f32 %v7412_v22, %v6152_v49 }
 0x1dd   :  { %v3866_v62 = vsel %vm1416_vm3, %v3864_v9, %v3865_v25  ;;  %v3868_v59 = vsel %vm1416_vm3, %v3865_v25, %v3867_v57  ;;  %v4385_v33 = vmul.f32 %v7312_v11, %v6152_v49  ;;  %v4386_v41 = vmul.f32 %v7316_v60, %v6152_v49 }
 0x1de   :  { %v3940_v37 = vadd.f32 %v3866_v62, %v3620_v24  ;;  %v3941_v29 = vadd.f32 %v3868_v59, %v3621_v26  ;;  %v4186_v39 = vsel %vm1737_vm4, %v4184_v58, %v4185_v27  ;;  %v4187_v40 = vrot.slane %v4066_v55, 3  ;;  %v5977_v26 = vld [vmem:[#allocation2 + $0xd3] ss:$0 sm:$0xff] }
 0x1df   :  { %v4504_v43 = vrot.slane %v4384_v32, 2  ;;  %v4505_v7 = vrot.slane %v4385_v33, 2  ;;  %v4704_v44 = vmul.f32 %v7412_v22, %v6168_v31  ;;  %v4705_v18 = vmul.f32 %v7312_v11, %v6168_v31  ;;  %v7552_v33 = vld [vmem:[#allocation5 + $0x8] sm:$0xff] }
 0x1e0   :  { %v4188_v21 = vsel %vm1737_vm4, %v4185_v27, %v4187_v40  ;;  %v4260_v46 = vadd.f32 %v4186_v39, %v3940_v37  ;;  %v4706_v47 = vmul.f32 %v7316_v60, %v6168_v31  ;;  %v4507_v51 = vrot.slane %v4386_v41, 2  ;;  %v5993_v31 = vld [vmem:[#allocation2 + $0xd4] ss:$0 sm:$0xff]  ;;  %v6009_v40 = vld [vmem:[#allocation2 + $0xd5] ss:$0 sm:$0xff] }
 0x1e1   :  { %v4261_v16 = vadd.f32 %v4188_v21, %v3941_v29  ;;  %v4506_v50 = vsel %vm2058_vm5, %v4504_v43, %v4505_v7  ;;  %v4824_v53 = vrot.slane %v4704_v44, 1  ;;  %v4825_v17 = vrot.slane %v4705_v18, 1  ;;  %v7555_v29 = vld [vmem:[#allocation5 + $0x10] sm:$0xff] }
 0x1e2   :  { %v4580_v10 = vadd.f32 %v4506_v50, %v4260_v46  ;;  %v4827_v56 = vrot.slane %v4706_v47, 1  ;;  %v127_v61 = vmul.f32 %v6611_v12, %v91_v45  ;;  %v4508_v63 = vsel %vm2058_vm5, %v4505_v7, %v4507_v51 }
 0x1e3   :  { %v128_v0 = vmul.f32 %v6611_v12, %v92_v14  ;;  %v239_v1 = vmul.f32 %v7316_v60, %v5929_v36  ;;  %v240_v2 = vmul.f32 %v7368_v52, %v5929_v36  ;;  %v4581_v5 = vadd.f32 %v4508_v63, %v4261_v16 }
 0x1e4   :  { %v4826_v6 = vsel %vm2379_vm6, %v4824_v53, %v4825_v17  ;;  %v4828_v35 = vsel %vm2379_vm6, %v4825_v17, %v4827_v56  ;;  %v396_v30 = vmul.f32 %v7312_v11, %v5945_v38  ;;  %v397_v42 = vmul.f32 %v7316_v60, %v5945_v38 }
 0x1e5   :  { %v4900_v19 = vadd.f32 %v4826_v6, %v4580_v10  ;;  %v271_v13 = vadd.f32 %v239_v1, %v127_v61  ;;  %v272_v28 = vadd.f32 %v240_v2, %v128_v0  ;;  %v4901_v15 = vadd.f32 %v4828_v35, %v4581_v5  ;;  %v6025_v10 = vld [vmem:[#allocation2 + $0xd6] ss:$0 sm:$0xff]  ;;  %v6041_v5 = vld [vmem:[#allocation2 + $0xd7] ss:$0 sm:$0xff] }
 0x1e6   :  { %v398_v8 = vmul.f32 %v7368_v52, %v5945_v38  ;;  %v519_v20 = vrot.slane %v396_v30, 7  ;;  %v717_v48 = vmul.f32 %v7312_v11, %v5961_v4  ;;  %v520_v54 = vrot.slane %v397_v42, 7 }
 0x1e7   :  { %v7543_v9 = vmul.f32 0.5, %v4900_v19  ;;  %v4964_v23 = vmul.f32 0.70710677, %v4900_v19  ;;  %v718_v49 = vmul.f32 %v7316_v60, %v5961_v4  ;;  %v7546_v34 = vmul.f32 0.5, %v4901_v15 }
 0x1e8   :  { %v4965_v24 = vmul.f32 0.70710677, %v4901_v15  ;;  %v522_v25 = vrot.slane %v398_v8, 7  ;;  %v719_v57 = vmul.f32 %v7368_v52, %v5961_v4  ;;  %v521_v55 = vsel %vm453_vm0, %v519_v20, %v520_v54  ;;  %v6057_v8 = vld [vmem:[#allocation2 + $0xd8] ss:$0 sm:$0xff] }
 0x1e9   :  { %6324 = verf.f32 %v4964_v23  ;;  %v840_v58 = vrot.slane %v717_v48, 6  ;;  %v841_v27 = vrot.slane %v718_v49, 6  ;;  %v592_v62 = vadd.f32 %v521_v55, %v271_v13 }
 0x1ea   :  { %6326 = verf.f32 %v4965_v24  ;;  %v523_v11 = vsel %vm453_vm0, %v520_v54, %v522_v25  ;;  %v843_v59 = vrot.slane %v719_v57, 6  ;;  %v1038_v37 = vmul.f32 %v7552_v33, %v5977_v26 }
 0x1eb   :  { %v593_v32 = vadd.f32 %v523_v11, %v272_v28  ;;  %v842_v60 = vsel %vm774_vm1, %v840_v58, %v841_v27  ;;  %v1039_v39 = vmul.f32 %v7555_v29, %v5977_v26  ;;  %v1040_v7 = vmul.f32 %v7368_v52, %v5977_v26  ;;  %v6073_v26 = vld [vmem:[#allocation2 + $0xd9] ss:$0 sm:$0xff] }
 0x1ec   :  { %v844_v41 = vsel %vm774_vm1, %v841_v27, %v843_v59  ;;  %v913_v43 = vadd.f32 %v842_v60, %v592_v62  ;;  %v1359_v44 = vmul.f32 %v7552_v33, %v5993_v31  ;;  %v1161_v21 = vrot.slane %v1038_v37, 5 }
 0x1ed   :  { %v914_v45 = vadd.f32 %v844_v41, %v593_v32  ;;  %v1162_v46 = vrot.slane %v1039_v39, 5  ;;  %v1360_v18 = vmul.f32 %v7555_v29, %v5993_v31  ;;  %v1164_v47 = vrot.slane %v1040_v7, 5 }
 0x1ee   :  { %v1361_v14 = vmul.f32 %v7368_v52, %v5993_v31  ;;  %v1482_v36 = vrot.slane %v1359_v44, 4  ;;  %v1680_v16 = vmul.f32 %v7552_v33, %v6009_v40  ;;  %v1681_v53 = vmul.f32 %v7555_v29, %v6009_v40 }
 0x1ef   :  { %v1163_v50 = vsel %vm1095_vm2, %v1161_v21, %v1162_v46  ;;  %v1483_v51 = vrot.slane %v1360_v18, 4  ;;  %v1682_v38 = vmul.f32 %v7368_v52, %v6009_v40  ;;  %v1165_v17 = vsel %vm1095_vm2, %v1162_v46, %v1164_v47 }
 0x1f0   :  { %v1234_v56 = vadd.f32 %v1163_v50, %v913_v43  ;;  %v1485_v61 = vrot.slane %v1361_v14, 4  ;;  %v1803_v63 = vrot.slane %v1680_v16, 3  ;;  %v1235_v0 = vadd.f32 %v1165_v17, %v914_v45  ;;  %v6089_v43 = vld [vmem:[#allocation2 + $0xda] ss:$0 sm:$0xff] }
 0x1f1   :  { %v1484_v1 = vsel %vm1416_vm3, %v1482_v36, %v1483_v51  ;;  %v1804_v2 = vrot.slane %v1681_v53, 3  ;;  %v1806_v4 = vrot.slane %v1682_v38, 3  ;;  %v2001_v30 = vmul.f32 %v7552_v33, %v6025_v10  ;;  %v6105_v53 = vld [vmem:[#allocation2 + $0xdb] ss:$0 sm:$0xff] }
 0x1f2   :  { %v1486_v6 = vsel %vm1416_vm3, %v1483_v51, %v1485_v61  ;;  %v1555_v35 = vadd.f32 %v1484_v1, %v1234_v56  ;;  %v2002_v19 = vmul.f32 %v7555_v29, %v6025_v10  ;;  %v2003_v15 = vmul.f32 %v7368_v52, %v6025_v10  ;;  %v6121_v56 = vld [vmem:[#allocation2 + $0xdc] ss:$0 sm:$0xff] }
 0x1f3   :  { %v1556_v13 = vadd.f32 %v1486_v6, %v1235_v0  ;;  %v1805_v28 = vsel %vm1737_vm4, %v1803_v63, %v1804_v2  ;;  %v1807_v42 = vsel %vm1737_vm4, %v1804_v2, %v1806_v4  ;;  %v2124_v48 = vrot.slane %v2001_v30, 2 }
 0x1f4   :  { %v1876_v20 = vadd.f32 %v1805_v28, %v1555_v35  ;;  %v2125_v23 = vrot.slane %v2002_v19, 2  ;;  %v2322_v54 = vmul.f32 %v7552_v33, %v6041_v5  ;;  %v2127_v24 = vrot.slane %v2003_v15, 2 }
 0x1f5   :  { %v1877_v49 = vadd.f32 %v1807_v42, %v1556_v13  ;;  %v2323_v25 = vmul.f32 %v7555_v29, %v6041_v5  ;;  %v2324_v57 = vmul.f32 %v7368_v52, %v6041_v5  ;;  %v2630_v31 = vmul.f32 %v7552_v33, %v6057_v8  ;;  %v6137_v13 = vld [vmem:[#allocation2 + $0xdd] ss:$0 sm:$0xff] }
 0x1f6   :  { %v6325_v55 = vpop.eup %6324  ;;  %v2126_v58 = vsel %vm2058_vm5, %v2124_v48, %v2125_v23  ;;  %v2445_v27 = vrot.slane %v2322_v54, 1  ;;  %v2631_v11 = vmul.f32 %v7555_v29, %v6057_v8  ;;  %v2128_v32 = vsel %vm2058_vm5, %v2125_v23, %v2127_v24 }
 0x1f7   :  { %v6327_v62 = vpop.eup %6326  ;;  %v5028_v59 = vadd.f32 1.0, %v6325_v55  ;;  %v2197_v60 = vadd.f32 %v2126_v58, %v1876_v20  ;;  %v2446_v37 = vrot.slane %v2323_v25, 1  ;;  %v2198_v40 = vadd.f32 %v2128_v32, %v1877_v49 }
 0x1f8   :  { %v5029_v39 = vadd.f32 1.0, %v6327_v62  ;;  %v2448_v41 = vrot.slane %v2324_v57, 1  ;;  %v2787_v52 = vmul.f32 %v7412_v22, %v6073_v26  ;;  %v2788_v45 = vmul.f32 %v7552_v33, %v6073_v26 }
 0x1f9   :  { %v5060_v7 = vmul.f32 %v5028_v59, %v7543_v9  ;;  %v2447_v44 = vsel %vm2379_vm6, %v2445_v27, %v2446_v37  ;;  %v2789_v21 = vmul.f32 %v7555_v29, %v6073_v26  ;;  %v3107_v51 = vmul.f32 %v7412_v22, %v6089_v43  ;;  %v6153_v26 = vld [vmem:[#allocation2 + $0xde] ss:$0 sm:$0xff] }
 0x1fa   :  { %v5061_v46 = vmul.f32 %v5029_v39, %v7546_v34  ;;  %v2449_v18 = vsel %vm2379_vm6, %v2446_v37, %v2448_v41  ;;  %v2518_v47 = vadd.f32 %v2447_v44, %v2197_v60  ;;  %v2909_v14 = vrot.slane %v2787_v52, 7  ;;  %v6169_v41 = vld [vmem:[#allocation2 + $0xdf] ss:$0 sm:$0xff] }
 0x1fb   :  { %v2519_v36 = vadd.f32 %v2449_v18, %v2198_v40  ;;  %v2910_v16 = vrot.slane %v2788_v45, 7  ;;  %v2912_v50 = vrot.slane %v2789_v21, 7  ;;  %v3108_v10 = vmul.f32 %v7552_v33, %v6089_v43  ;;  %v77_v45 = vld [vmem:[#allocation2 + $0x60] sm:$0xff] }
 0x1fc   :  { %v5080_v38 = vpack.c.bf16 %v5061_v46, %v5060_v7  ;;  %v2662_v9 = vadd.f32 %v2630_v31, %v2518_v47  ;;  %v3109_v17 = vmul.f32 %v7555_v29, %v6089_v43  ;;  %v3229_v0 = vrot.slane %v3107_v51, 6 }
 0x1fd   :  { %v2663_v61 = vadd.f32 %v2631_v11, %v2519_v36  ;;  %v2911_v34 = vsel %vm453_vm0, %v2909_v14, %v2910_v16  ;;  %v2913_v63 = vsel %vm453_vm0, %v2910_v16, %v2912_v50  ;;  %v3230_v2 = vrot.slane %v3108_v10, 6  ;;  %v78_v14 = vld [vmem:[#allocation2 + $0x68] sm:$0xff] }
 0x1fe   :  { %6244 = vmatprep.mubr.bf16.mxu1 %v5080_v38  ;;  %v2982_v1 = vadd.f32 %v2911_v34, %v2662_v9  ;;  %v3232_v4 = vrot.slane %v3109_v17, 6  ;;  %v3427_v5 = vmul.f32 %v7412_v22, %v6105_v53  ;;  %v3428_v35 = vmul.f32 %v7552_v33, %v6105_v53  ;;  %v5922_v17 = vld [vmem:[#allocation2 + $0x60] ss:$0 sm:$0xff] }
 0x1ff   :  { %v2983_v6 = vadd.f32 %v2913_v63, %v2663_v61  ;;  %v3429_v30 = vmul.f32 %v7555_v29, %v6105_v53  ;;  %v3747_v19 = vmul.f32 %v7412_v22, %v6121_v56  ;;  %v3231_v28 = vsel %vm774_vm1, %v3229_v0, %v3230_v2 }
 0x200   :  { %v3233_v42 = vsel %vm774_vm1, %v3230_v2, %v3232_v4  ;;  %v3549_v15 = vrot.slane %v3427_v5, 5  ;;  %v3748_v8 = vmul.f32 %v7552_v33, %v6121_v56  ;;  %v3302_v20 = vadd.f32 %v3231_v28, %v2982_v1  ;;  %v5954_v1 = vld [vmem:[#allocation2 + $0x62] ss:$0 sm:$0xff] }
 0x201   :  { %v3303_v48 = vadd.f32 %v3233_v42, %v2983_v6  ;;  %v3550_v23 = vrot.slane %v3428_v35, 5  ;;  %v3552_v54 = vrot.slane %v3429_v30, 5  ;;  %v3749_v49 = vmul.f32 %v7555_v29, %v6121_v56  ;;  %v5938_v56 = vld [vmem:[#allocation2 + $0x61] ss:$0 sm:$0xff]  ;;  %v7622_v35 = vld [vmem:[#allocation5 + $0x18] sm:$0xff] }
 0x202   :  { %v3869_v24 = vrot.slane %v3747_v19, 4  ;;  %v3870_v25 = vrot.slane %v3748_v8, 4  ;;  %v4067_v57 = vmul.f32 %v7412_v22, %v6137_v13  ;;  %v4068_v27 = vmul.f32 %v7552_v33, %v6137_v13 }
 0x203   :  { %v3551_v55 = vsel %vm1095_vm2, %v3549_v15, %v3550_v23  ;;  %v3553_v58 = vsel %vm1095_vm2, %v3550_v23, %v3552_v54  ;;  %v4069_v31 = vmul.f32 %v7555_v29, %v6137_v13  ;;  %v3872_v32 = vrot.slane %v3749_v49, 4 }
 0x204   :  { %v3622_v11 = vadd.f32 %v3551_v55, %v3302_v20  ;;  %v3623_v62 = vadd.f32 %v3553_v58, %v3303_v48  ;;  %v3871_v59 = vsel %vm1416_vm3, %v3869_v24, %v3870_v25  ;;  %v4189_v60 = vrot.slane %v4067_v57, 3 }
 0x205   :  { %v4190_v37 = vrot.slane %v4068_v27, 3  ;;  %v4192_v39 = vrot.slane %v4069_v31, 3  ;;  %v4387_v40 = vmul.f32 %v7412_v22, %v6153_v26  ;;  %v3873_v52 = vsel %vm1416_vm3, %v3870_v25, %v3872_v32 }
 0x206   :  { %v3942_v43 = vadd.f32 %v3871_v59, %v3622_v11  ;;  %v4388_v7 = vmul.f32 %v7552_v33, %v6153_v26  ;;  %v4389_v44 = vmul.f32 %v7555_v29, %v6153_v26  ;;  %v3943_v21 = vadd.f32 %v3873_v52, %v3623_v62  ;;  %v5970_v26 = vld [vmem:[#allocation2 + $0x63] ss:$0 sm:$0xff] }
 0x207   :  { %v4191_v46 = vsel %vm1737_vm4, %v4189_v60, %v4190_v37  ;;  %v4193_v18 = vsel %vm1737_vm4, %v4190_v37, %v4192_v39  ;;  %v4509_v47 = vrot.slane %v4387_v40, 2  ;;  %v4707_v51 = vmul.f32 %v7412_v22, %v6169_v41  ;;  %v5986_v60 = vld [vmem:[#allocation2 + $0x64] ss:$0 sm:$0xff] }
 0x208   :  { %v4262_v36 = vadd.f32 %v4191_v46, %v3942_v43  ;;  %v4510_v16 = vrot.slane %v4388_v7, 2  ;;  %v4512_v50 = vrot.slane %v4389_v44, 2  ;;  %v4263_v53 = vadd.f32 %v4193_v18, %v3943_v21  ;;  %v6002_v46 = vld [vmem:[#allocation2 + $0x65] ss:$0 sm:$0xff] }
 0x209   :  { %v4708_v38 = vmul.f32 %v7552_v33, %v6169_v41  ;;  %v4709_v9 = vmul.f32 %v7555_v29, %v6169_v41  ;;  %v113_v10 = vmul.f32 %v6611_v12, %v77_v45  ;;  %v4829_v63 = vrot.slane %v4707_v51, 1 }
 0x20a   :  { %v4511_v61 = vsel %vm2058_vm5, %v4509_v47, %v4510_v16  ;;  %v4513_v34 = vsel %vm2058_vm5, %v4510_v16, %v4512_v50  ;;  %v114_v0 = vmul.f32 %v6611_v12, %v78_v14  ;;  %v225_v6 = vmul.f32 %v7555_v29, %v5922_v17 }
 0x20b   :  { %v4582_v2 = vadd.f32 %v4511_v61, %v4262_v36  ;;  %v4583_v4 = vadd.f32 %v4513_v34, %v4263_v53  ;;  %v4830_v22 = vrot.slane %v4708_v38, 1  ;;  %v4832_v5 = vrot.slane %v4709_v9, 1 }
 0x20c   :  { %v226_v30 = vmul.f32 %v7622_v35, %v5922_v17  ;;  %v375_v19 = vmul.f32 %v7552_v33, %v5938_v56  ;;  %v376_v13 = vmul.f32 %v7555_v29, %v5938_v56  ;;  %v377_v15 = vmul.f32 %v7622_v35, %v5938_v56  ;;  %v6018_v56 = vld [vmem:[#allocation2 + $0x66] ss:$0 sm:$0xff] }
 0x20d   :  { %v4831_v28 = vsel %vm2379_vm6, %v4829_v63, %v4830_v22  ;;  %v4833_v42 = vsel %vm2379_vm6, %v4830_v22, %v4832_v5  ;;  %v696_v8 = vmul.f32 %v7552_v33, %v5954_v1  ;;  %v257_v23 = vadd.f32 %v225_v6, %v113_v10  ;;  %v6034_v5 = vld [vmem:[#allocation2 + $0x67] ss:$0 sm:$0xff] }
 0x20e   :  { %v4902_v20 = vadd.f32 %v4831_v28, %v4582_v2  ;;  %v4903_v48 = vadd.f32 %v4833_v42, %v4583_v4  ;;  %v258_v54 = vadd.f32 %v226_v30, %v114_v0  ;;  %v484_v49 = vrot.slane %v375_v19, 7 }
 0x20f   :  { %v485_v24 = vrot.slane %v376_v13, 7  ;;  %v487_v25 = vrot.slane %v377_v15, 7  ;;  %v697_v57 = vmul.f32 %v7555_v29, %v5954_v1  ;;  %v698_v59 = vmul.f32 %v7622_v35, %v5954_v1 }
 0x210   :  { %v7632_v55 = vmul.f32 0.5, %v4902_v20  ;;  %v7634_v58 = vmul.f32 0.5, %v4903_v48  ;;  %v4966_v27 = vmul.f32 0.70710677, %v4902_v20  ;;  %v4967_v31 = vmul.f32 0.70710677, %v4903_v48 }
 0x211   :  { %v486_v11 = vsel %vm453_vm0, %v484_v49, %v485_v24  ;;  %v488_v62 = vsel %vm453_vm0, %v485_v24, %v487_v25  ;;  %v805_v32 = vrot.slane %v696_v8, 6  ;;  %v806_v40 = vrot.slane %v697_v57, 6  ;;  %v6050_v20 = vld [vmem:[#allocation2 + $0x68] ss:$0 sm:$0xff]  ;;  %v6066_v24 = vld [vmem:[#allocation2 + $0x69] ss:$0 sm:$0xff] }
 0x212   :  { %6328 = verf.f32 %v4966_v27  ;;  %v578_v37 = vadd.f32 %v486_v11, %v257_v23  ;;  %v579_v39 = vadd.f32 %v488_v62, %v258_v54  ;;  %v808_v41 = vrot.slane %v698_v59, 6 }
 0x213   :  { %6330 = verf.f32 %v4967_v31  ;;  %v1017_v52 = vmul.f32 %v7552_v33, %v5970_v26  ;;  %v1018_v43 = vmul.f32 %v7555_v29, %v5970_v26  ;;  %v807_v7 = vsel %vm774_vm1, %v805_v32, %v806_v40 }
 0x214   :  { %v1019_v44 = vmul.f32 %v7622_v35, %v5970_v26  ;;  %v1338_v45 = vmul.f32 %v7552_v33, %v5986_v60  ;;  %v1339_v21 = vmul.f32 %v7555_v29, %v5986_v60  ;;  %v809_v18 = vsel %vm774_vm1, %v806_v40, %v808_v41  ;;  %v7666_v40 = vld [vmem:[#allocation5] sm:$0xff] }
 0x215   :  { %v899_v47 = vadd.f32 %v807_v7, %v578_v37  ;;  %v1126_v14 = vrot.slane %v1017_v52, 5  ;;  %v1127_v36 = vrot.slane %v1018_v43, 5  ;;  %v900_v16 = vadd.f32 %v809_v18, %v579_v39 }
 0x216   :  { %v1129_v50 = vrot.slane %v1019_v44, 5  ;;  %v1340_v51 = vmul.f32 %v7622_v35, %v5986_v60  ;;  %v1447_v53 = vrot.slane %v1338_v45, 4  ;;  %v1448_v9 = vrot.slane %v1339_v21, 4 }
 0x217   :  { %v1128_v38 = vsel %vm1095_vm2, %v1126_v14, %v1127_v36  ;;  %v1659_v10 = vmul.f32 %v7552_v33, %v6002_v46  ;;  %v1660_v17 = vmul.f32 %v7555_v29, %v6002_v46  ;;  %v1661_v0 = vmul.f32 %v7622_v35, %v6002_v46  ;;  %v6082_v14 = vld [vmem:[#allocation2 + $0x6a] ss:$0 sm:$0xff] }
 0x218   :  { %v1130_v61 = vsel %vm1095_vm2, %v1127_v36, %v1129_v50  ;;  %v1220_v34 = vadd.f32 %v1128_v38, %v899_v47  ;;  %v1450_v63 = vrot.slane %v1340_v51, 4  ;;  %v1449_v2 = vsel %vm1416_vm3, %v1447_v53, %v1448_v9 }
 0x219   :  { %v1221_v1 = vadd.f32 %v1130_v61, %v900_v16  ;;  %v1768_v4 = vrot.slane %v1659_v10, 3  ;;  %v1769_v22 = vrot.slane %v1660_v17, 3  ;;  %v1771_v19 = vrot.slane %v1661_v0, 3 }
 0x21a   :  { %v1451_v6 = vsel %vm1416_vm3, %v1448_v9, %v1450_v63  ;;  %v1541_v30 = vadd.f32 %v1449_v2, %v1220_v34  ;;  %v1980_v13 = vmul.f32 %v7552_v33, %v6018_v56  ;;  %v1981_v15 = vmul.f32 %v7555_v29, %v6018_v56  ;;  %v6098_v63 = vld [vmem:[#allocation2 + $0x6b] ss:$0 sm:$0xff] }
 0x21b   :  { %v1542_v28 = vadd.f32 %v1451_v6, %v1221_v1  ;;  %v1770_v42 = vsel %vm1737_vm4, %v1768_v4, %v1769_v22  ;;  %v1982_v8 = vmul.f32 %v7622_v35, %v6018_v56  ;;  %v1772_v48 = vsel %vm1737_vm4, %v1769_v22, %v1771_v19  ;;  %v6114_v4 = vld [vmem:[#allocation2 + $0x6c] ss:$0 sm:$0xff] }
 0x21c   :  { %v1862_v23 = vadd.f32 %v1770_v42, %v1541_v30  ;;  %v2089_v54 = vrot.slane %v1980_v13, 2  ;;  %v2301_v49 = vmul.f32 %v7552_v33, %v6034_v5  ;;  %v2090_v57 = vrot.slane %v1981_v15, 2 }
 0x21d   :  { %v1863_v25 = vadd.f32 %v1772_v48, %v1542_v28  ;;  %v2092_v26 = vrot.slane %v1982_v8, 2  ;;  %v2302_v27 = vmul.f32 %v7555_v29, %v6034_v5  ;;  %v2303_v31 = vmul.f32 %v7622_v35, %v6034_v5  ;;  %v6130_v48 = vld [vmem:[#allocation2 + $0x6d] ss:$0 sm:$0xff] }
 0x21e   :  { %v2410_v11 = vrot.slane %v2301_v49, 1  ;;  %v2616_v62 = vmul.f32 %v7552_v33, %v6050_v20  ;;  %v2617_v59 = vmul.f32 %v7555_v29, %v6050_v20  ;;  %v2091_v60 = vsel %vm2058_vm5, %v2089_v54, %v2090_v57 }
 0x21f   :  { %v6329_v32 = vpop.eup %6328  ;;  %v2093_v37 = vsel %vm2058_vm5, %v2090_v57, %v2092_v26  ;;  %v2411_v39 = vrot.slane %v2302_v27, 1  ;;  %v2766_v41 = vmul.f32 %v7666_v40, %v6066_v24  ;;  %v2183_v7 = vadd.f32 %v2091_v60, %v1862_v23 }
 0x220   :  { %v6331_v52 = vpop.eup %6330  ;;  %v5030_v43 = vadd.f32 1.0, %v6329_v32  ;;  %v2184_v44 = vadd.f32 %v2093_v37, %v1863_v25  ;;  %v2413_v45 = vrot.slane %v2303_v31, 1  ;;  %v2767_v18 = vmul.f32 %v7552_v33, %v6066_v24  ;;  %v6146_v32 = vld [vmem:[#allocation2 + $0x6e] ss:$0 sm:$0xff] }
 0x221   :  { %v5031_v21 = vadd.f32 1.0, %v6331_v52  ;;  %v2412_v46 = vsel %vm2379_vm6, %v2410_v11, %v2411_v39  ;;  %v2768_v47 = vmul.f32 %v7555_v29, %v6066_v24  ;;  %v2874_v51 = vrot.slane %v2766_v41, 7 }
 0x222   :  { %v5062_v36 = vmul.f32 %v5030_v43, %v7632_v55  ;;  %v2414_v16 = vsel %vm2379_vm6, %v2411_v39, %v2413_v45  ;;  %v2504_v50 = vadd.f32 %v2412_v46, %v2183_v7  ;;  %v2875_v9 = vrot.slane %v2767_v18, 7  ;;  %v6162_v45 = vld [vmem:[#allocation2 + $0x6f] ss:$0 sm:$0xff] }
 0x223   :  { %v5063_v53 = vmul.f32 %v5031_v21, %v7634_v58  ;;  %v2505_v38 = vadd.f32 %v2414_v16, %v2184_v44  ;;  %v2877_v10 = vrot.slane %v2768_v47, 7  ;;  %v3086_v56 = vmul.f32 %v7666_v40, %v6082_v14 }
 0x224   :  { %v2648_v17 = vadd.f32 %v2616_v62, %v2504_v50  ;;  %v3087_v61 = vmul.f32 %v7552_v33, %v6082_v14  ;;  %v3088_v34 = vmul.f32 %v7555_v29, %v6082_v14  ;;  %v2876_v55 = vsel %vm453_vm0, %v2874_v51, %v2875_v9  ;;  %v79_v51 = vld [vmem:[#allocation2 + $0x70] sm:$0xff] }
 0x225   :  { %v5081_v0 = vpack.c.bf16 %v5063_v53, %v5062_v36  ;;  %v2649_v1 = vadd.f32 %v2617_v59, %v2505_v38  ;;  %v2878_v2 = vsel %vm453_vm0, %v2875_v9, %v2877_v10  ;;  %v3194_v58 = vrot.slane %v3086_v56, 6  ;;  %v80_v53 = vld [vmem:[#allocation2 + $0x78] sm:$0xff] }
 0x226   :  { %v2968_v22 = vadd.f32 %v2876_v55, %v2648_v17  ;;  %v3195_v5 = vrot.slane %v3087_v61, 6  ;;  %v3197_v6 = vrot.slane %v3088_v34, 6  ;;  %v3406_v19 = vmul.f32 %v7666_v40, %v6098_v63 }
 0x227   :  { %6245 = vmatmul.mubr.bf16.gmra.mxu1 %v5081_v0  ;;  %v2969_v30 = vadd.f32 %v2878_v2, %v2649_v1  ;;  %v3407_v13 = vmul.f32 %v7552_v33, %v6098_v63  ;;  %v3408_v28 = vmul.f32 %v7555_v29, %v6098_v63  ;;  %v3726_v8 = vmul.f32 %v7666_v40, %v6114_v4  ;;  %v5923_v0 = vld [vmem:[#allocation2 + $0x70] ss:$0 sm:$0xff]  ;;  %v5939_v1 = vld [vmem:[#allocation2 + $0x71] ss:$0 sm:$0xff] }
 0x228   :  { %v3196_v42 = vsel %vm774_vm1, %v3194_v58, %v3195_v5  ;;  %v3198_v15 = vsel %vm774_vm1, %v3195_v5, %v3197_v6  ;;  %v3727_v20 = vmul.f32 %v7552_v33, %v6114_v4  ;;  %v3514_v49 = vrot.slane %v3406_v19, 5 }
 0x229   :  { %v3288_v23 = vadd.f32 %v3196_v42, %v2968_v22  ;;  %v3289_v54 = vadd.f32 %v3198_v15, %v2969_v30  ;;  %v3515_v24 = vrot.slane %v3407_v13, 5  ;;  %v3517_v25 = vrot.slane %v3408_v28, 5  ;;  %v5955_v15 = vld [vmem:[#allocation2 + $0x72] ss:$0 sm:$0xff] }
 0x22a   :  { %v3728_v57 = vmul.f32 %v7555_v29, %v6114_v4  ;;  %v3834_v26 = vrot.slane %v3726_v8, 4  ;;  %v3835_v27 = vrot.slane %v3727_v20, 4  ;;  %v4046_v11 = vmul.f32 %v7666_v40, %v6130_v48 }
 0x22b   :  { %v3516_v31 = vsel %vm1095_vm2, %v3514_v49, %v3515_v24  ;;  %v4047_v62 = vmul.f32 %v7552_v33, %v6130_v48  ;;  %v4048_v59 = vmul.f32 %v7555_v29, %v6130_v48  ;;  %v3518_v60 = vsel %vm1095_vm2, %v3515_v24, %v3517_v25 }
 0x22c   :  { %v3608_v37 = vadd.f32 %v3516_v31, %v3288_v23  ;;  %v3836_v39 = vsel %vm1416_vm3, %v3834_v26, %v3835_v27  ;;  %v3837_v41 = vrot.slane %v3728_v57, 4  ;;  %v3609_v52 = vadd.f32 %v3518_v60, %v3289_v54 }
 0x22d   :  { %v4154_v43 = vrot.slane %v4046_v11, 3  ;;  %v4155_v7 = vrot.slane %v4047_v62, 3  ;;  %v4157_v44 = vrot.slane %v4048_v59, 3  ;;  %v4366_v18 = vmul.f32 %v7666_v40, %v6146_v32  ;;  %v5971_v11 = vld [vmem:[#allocation2 + $0x73] ss:$0 sm:$0xff] }
 0x22e   :  { %v3838_v21 = vsel %vm1416_vm3, %v3835_v27, %v3837_v41  ;;  %v3928_v46 = vadd.f32 %v3836_v39, %v3608_v37  ;;  %v4367_v47 = vmul.f32 %v7552_v33, %v6146_v32  ;;  %v4368_v50 = vmul.f32 %v7555_v29, %v6146_v32 }
 0x22f   :  { %v3929_v14 = vadd.f32 %v3838_v21, %v3609_v52  ;;  %v4156_v36 = vsel %vm1737_vm4, %v4154_v43, %v4155_v7  ;;  %v4158_v16 = vsel %vm1737_vm4, %v4155_v7, %v4157_v44  ;;  %v4474_v9 = vrot.slane %v4366_v18, 2  ;;  %v5987_v43 = vld [vmem:[#allocation2 + $0x74] ss:$0 sm:$0xff] }
 0x230   :  { %v4248_v38 = vadd.f32 %v4156_v36, %v3928_v46  ;;  %v4475_v10 = vrot.slane %v4367_v47, 2  ;;  %v4686_v17 = vmul.f32 %v7666_v40, %v6162_v45  ;;  %v4477_v61 = vrot.slane %v4368_v50, 2  ;;  %v6003_v50 = vld [vmem:[#allocation2 + $0x75] ss:$0 sm:$0xff] }
 0x231   :  { %v4249_v56 = vadd.f32 %v4158_v16, %v3929_v14  ;;  %v4687_v34 = vmul.f32 %v7552_v33, %v6162_v45  ;;  %v4688_v63 = vmul.f32 %v7555_v29, %v6162_v45  ;;  %v115_v4 = vmul.f32 %v6611_v12, %v79_v51 }
 0x232   :  { %v4476_v55 = vsel %vm2058_vm5, %v4474_v9, %v4475_v10  ;;  %v4794_v2 = vrot.slane %v4686_v17, 1  ;;  %v116_v22 = vmul.f32 %v6611_v12, %v80_v53  ;;  %v4478_v58 = vsel %vm2058_vm5, %v4475_v10, %v4477_v61 }
 0x233   :  { %v4568_v5 = vadd.f32 %v4476_v55, %v4248_v38  ;;  %v4795_v6 = vrot.slane %v4687_v34, 1  ;;  %v4797_v30 = vrot.slane %v4688_v63, 1  ;;  %v4569_v19 = vadd.f32 %v4478_v58, %v4249_v56  ;;  %v6019_v55 = vld [vmem:[#allocation2 + $0x76] ss:$0 sm:$0xff] }
 0x234   :  { %v227_v13 = vmul.f32 %v7555_v29, %v5923_v0  ;;  %v228_v28 = vmul.f32 %v7622_v35, %v5923_v0  ;;  %v378_v42 = vmul.f32 %v7552_v33, %v5939_v1  ;;  %v379_v48 = vmul.f32 %v7555_v29, %v5939_v1 }
 0x235   :  { %v4796_v8 = vsel %vm2379_vm6, %v4794_v2, %v4795_v6  ;;  %v4798_v20 = vsel %vm2379_vm6, %v4795_v6, %v4797_v30  ;;  %v380_v23 = vmul.f32 %v7622_v35, %v5939_v1  ;;  %v699_v31 = vmul.f32 %v7552_v33, %v5955_v15 }
 0x236   :  { %v4888_v54 = vadd.f32 %v4796_v8, %v4568_v5  ;;  %v4889_v49 = vadd.f32 %v4798_v20, %v4569_v19  ;;  %v259_v24 = vadd.f32 %v227_v13, %v115_v4  ;;  %v260_v25 = vadd.f32 %v228_v28, %v116_v22  ;;  %v6035_v13 = vld [vmem:[#allocation2 + $0x77] ss:$0 sm:$0xff] }
 0x237   :  { %v489_v57 = vrot.slane %v378_v42, 7  ;;  %v490_v26 = vrot.slane %v379_v48, 7  ;;  %v492_v27 = vrot.slane %v380_v23, 7  ;;  %v700_v41 = vmul.f32 %v7555_v29, %v5955_v15 }
 0x238   :  { %v7715_v62 = vmul.f32 0.5, %v4888_v54  ;;  %v7717_v59 = vmul.f32 0.5, %v4889_v49  ;;  %v4952_v32 = vmul.f32 0.70710677, %v4888_v54  ;;  %v4953_v60 = vmul.f32 0.70710677, %v4889_v49 }
 0x239   :  { %v491_v37 = vsel %vm453_vm0, %v489_v57, %v490_v26  ;;  %v493_v39 = vsel %vm453_vm0, %v490_v26, %v492_v27  ;;  %v701_v52 = vmul.f32 %v7622_v35, %v5955_v15  ;;  %v810_v45 = vrot.slane %v699_v31, 6  ;;  %v6051_v49 = vld [vmem:[#allocation2 + $0x78] ss:$0 sm:$0xff]  ;;  %v6067_v27 = vld [vmem:[#allocation2 + $0x79] ss:$0 sm:$0xff] }
 0x23a   :  { %6332 = verf.f32 %v4952_v32  ;;  %v580_v7 = vadd.f32 %v491_v37, %v259_v24  ;;  %v581_v44 = vadd.f32 %v493_v39, %v260_v25  ;;  %v811_v21 = vrot.slane %v700_v41, 6 }
 0x23b   :  { %6334 = verf.f32 %v4953_v60  ;;  %v813_v46 = vrot.slane %v701_v52, 6  ;;  %v1020_v18 = vmul.f32 %v7552_v33, %v5971_v11  ;;  %v1021_v47 = vmul.f32 %v7555_v29, %v5971_v11 }
 0x23c   :  { %v1022_v14 = vmul.f32 %v7622_v35, %v5971_v11  ;;  %v1341_v36 = vmul.f32 %v7552_v33, %v5987_v43  ;;  %v1342_v16 = vmul.f32 %v7555_v29, %v5987_v43  ;;  %v812_v51 = vsel %vm774_vm1, %v810_v45, %v811_v21 }
 0x23d   :  { %v814_v53 = vsel %vm774_vm1, %v811_v21, %v813_v46  ;;  %v1131_v38 = vrot.slane %v1020_v18, 5  ;;  %v1343_v9 = vmul.f32 %v7622_v35, %v5987_v43  ;;  %v901_v10 = vadd.f32 %v812_v51, %v580_v7  ;;  %v6083_v46 = vld [vmem:[#allocation2 + $0x7a] ss:$0 sm:$0xff] }
 0x23e   :  { %v902_v17 = vadd.f32 %v814_v53, %v581_v44  ;;  %v1132_v56 = vrot.slane %v1021_v47, 5  ;;  %v1134_v61 = vrot.slane %v1022_v14, 5  ;;  %v1452_v34 = vrot.slane %v1341_v36, 4 }
 0x23f   :  { %v1453_v63 = vrot.slane %v1342_v16, 4  ;;  %v1455_v0 = vrot.slane %v1343_v9, 4  ;;  %v1662_v1 = vmul.f32 %v7552_v33, %v6003_v50  ;;  %v1663_v22 = vmul.f32 %v7555_v29, %v6003_v50 }
 0x240   :  { %v1133_v2 = vsel %vm1095_vm2, %v1131_v38, %v1132_v56  ;;  %v1135_v4 = vsel %vm1095_vm2, %v1132_v56, %v1134_v61  ;;  %v1664_v58 = vmul.f32 %v7622_v35, %v6003_v50  ;;  %v1983_v8 = vmul.f32 %v7552_v33, %v6019_v55 }
 0x241   :  { %v1222_v5 = vadd.f32 %v1133_v2, %v901_v10  ;;  %v1223_v6 = vadd.f32 %v1135_v4, %v902_v17  ;;  %v1454_v30 = vsel %vm1416_vm3, %v1452_v34, %v1453_v63  ;;  %v1456_v19 = vsel %vm1416_vm3, %v1453_v63, %v1455_v0 }
 0x242   :  { %v1773_v28 = vrot.slane %v1662_v1, 3  ;;  %v1774_v42 = vrot.slane %v1663_v22, 3  ;;  %v1776_v15 = vrot.slane %v1664_v58, 3  ;;  %v1984_v23 = vmul.f32 %v7555_v29, %v6019_v55  ;;  %v6099_v22 = vld [vmem:[#allocation2 + $0x7b] ss:$0 sm:$0xff] }
 0x243   :  { %v1543_v20 = vadd.f32 %v1454_v30, %v1222_v5  ;;  %v1544_v48 = vadd.f32 %v1456_v19, %v1223_v6  ;;  %v1985_v54 = vmul.f32 %v7622_v35, %v6019_v55  ;;  %v2094_v57 = vrot.slane %v1983_v8, 2  ;;  %v6115_v30 = vld [vmem:[#allocation2 + $0x7c] ss:$0 sm:$0xff] }
 0x244   :  { %v1775_v24 = vsel %vm1737_vm4, %v1773_v28, %v1774_v42  ;;  %v1777_v25 = vsel %vm1737_vm4, %v1774_v42, %v1776_v15  ;;  %v2304_v26 = vmul.f32 %v7552_v33, %v6035_v13  ;;  %v2095_v32 = vrot.slane %v1984_v23, 2 }
 0x245   :  { %v1864_v31 = vadd.f32 %v1775_v24, %v1543_v20  ;;  %v1865_v11 = vadd.f32 %v1777_v25, %v1544_v48  ;;  %v2097_v60 = vrot.slane %v1985_v54, 2  ;;  %v2305_v37 = vmul.f32 %v7555_v29, %v6035_v13  ;;  %v6131_v24 = vld [vmem:[#allocation2 + $0x7d] ss:$0 sm:$0xff] }
 0x246   :  { %v2306_v39 = vmul.f32 %v7622_v35, %v6035_v13  ;;  %v2415_v41 = vrot.slane %v2304_v26, 1  ;;  %v2618_v52 = vmul.f32 %v7552_v33, %v6051_v49  ;;  %v2096_v7 = vsel %vm2058_vm5, %v2094_v57, %v2095_v32 }
 0x247   :  { %v6333_v43 = vpop.eup %6332  ;;  %v2098_v44 = vsel %vm2058_vm5, %v2095_v32, %v2097_v60  ;;  %v2619_v45 = vmul.f32 %v7555_v29, %v6051_v49  ;;  %v2769_v21 = vmul.f32 %v7666_v40, %v6067_v27  ;;  %v2185_v14 = vadd.f32 %v2096_v7, %v1864_v31 }
 0x248   :  { %v6335_v18 = vpop.eup %6334  ;;  %v5016_v47 = vadd.f32 1.0, %v6333_v43  ;;  %v2186_v36 = vadd.f32 %v2098_v44, %v1865_v11  ;;  %v2416_v16 = vrot.slane %v2305_v37, 1  ;;  %v2418_v51 = vrot.slane %v2306_v39, 1  ;;  %v6147_v37 = vld [vmem:[#allocation2 + $0x7e] ss:$0 sm:$0xff] }
 0x249   :  { %v5017_v50 = vadd.f32 1.0, %v6335_v18  ;;  %v2770_v53 = vmul.f32 %v7552_v33, %v6067_v27  ;;  %v2771_v38 = vmul.f32 %v7555_v29, %v6067_v27  ;;  %v2879_v17 = vrot.slane %v2769_v21, 7 }
 0x24a   :  { %v5048_v9 = vmul.f32 %v5016_v47, %v7715_v62  ;;  %v2417_v10 = vsel %vm2379_vm6, %v2415_v41, %v2416_v16  ;;  %v3089_v56 = vmul.f32 %v7666_v40, %v6083_v46  ;;  %v2419_v34 = vsel %vm2379_vm6, %v2416_v16, %v2418_v51 }
 0x24b   :  { %v5049_v61 = vmul.f32 %v5017_v50, %v7717_v59  ;;  %v2506_v63 = vadd.f32 %v2417_v10, %v2185_v14  ;;  %v2880_v0 = vrot.slane %v2770_v53, 7  ;;  %v2507_v1 = vadd.f32 %v2419_v34, %v2186_v36  ;;  %v6163_v36 = vld [vmem:[#allocation2 + $0x7f] ss:$0 sm:$0xff] }
 0x24c   :  { %v2882_v55 = vrot.slane %v2771_v38, 7  ;;  %v3090_v2 = vmul.f32 %v7552_v33, %v6083_v46  ;;  %v3091_v4 = vmul.f32 %v7555_v29, %v6083_v46  ;;  %v3199_v6 = vrot.slane %v3089_v56, 6 }
 0x24d   :  { %v5074_v58 = vpack.c.bf16 %v5049_v61, %v5048_v9  ;;  %v2650_v62 = vadd.f32 %v2618_v52, %v2506_v63  ;;  %v2881_v5 = vsel %vm453_vm0, %v2879_v17, %v2880_v0  ;;  %v2651_v19 = vadd.f32 %v2619_v45, %v2507_v1 }
 0x24e   :  { %v2883_v59 = vsel %vm453_vm0, %v2880_v0, %v2882_v55  ;;  %v3200_v13 = vrot.slane %v3090_v2, 6  ;;  %v3202_v28 = vrot.slane %v3091_v4, 6  ;;  %v3409_v15 = vmul.f32 %v7666_v40, %v6099_v22  ;;  %v93_v0 = vld [vmem:[#allocation2 + $0xe0] sm:$0xff] }
 0x24f   :  { %6232 = vmatprep.mubr.bf16.mxu0 %v5074_v58  ;;  %v2970_v42 = vadd.f32 %v2881_v5, %v2650_v62  ;;  %v3410_v8 = vmul.f32 %v7552_v33, %v6099_v22  ;;  %v3411_v20 = vmul.f32 %v7555_v29, %v6099_v22  ;;  %v2971_v48 = vadd.f32 %v2883_v59, %v2651_v19  ;;  %v94_v22 = vld [vmem:[#allocation2 + $0xe8] sm:$0xff]  ;;  %v5930_v58 = vld [vmem:[#allocation2 + $0xe0] ss:$0 sm:$0xff]  ;;  %v5946_v19 = vld [vmem:[#allocation2 + $0xe1] ss:$0 sm:$0xff] }
 0x250   :  { %v3201_v23 = vsel %vm774_vm1, %v3199_v6, %v3200_v13  ;;  %v3203_v54 = vsel %vm774_vm1, %v3200_v13, %v3202_v28  ;;  %v3729_v49 = vmul.f32 %v7666_v40, %v6115_v30  ;;  %v3519_v57 = vrot.slane %v3409_v15, 5 }
 0x251   :  { %v3290_v25 = vadd.f32 %v3201_v23, %v2970_v42  ;;  %v3520_v26 = vrot.slane %v3410_v8, 5  ;;  %v3522_v27 = vrot.slane %v3411_v20, 5  ;;  %v3291_v31 = vadd.f32 %v3203_v54, %v2971_v48  ;;  %v5962_v48 = vld [vmem:[#allocation2 + $0xe2] ss:$0 sm:$0xff] }
 0x252   :  { %v3730_v11 = vmul.f32 %v7552_v33, %v6115_v30  ;;  %v3731_v32 = vmul.f32 %v7555_v29, %v6115_v30  ;;  %v3839_v60 = vrot.slane %v3729_v49, 4  ;;  %v4049_v52 = vmul.f32 %v7666_v40, %v6131_v24  ;;  %v7793_v49 = vld [vmem:[#allocation5 + $0x8] sm:$0xff] }
 0x253   :  { %v3521_v39 = vsel %vm1095_vm2, %v3519_v57, %v3520_v26  ;;  %v3523_v41 = vsel %vm1095_vm2, %v3520_v26, %v3522_v27  ;;  %v4050_v43 = vmul.f32 %v7552_v33, %v6131_v24  ;;  %v4051_v46 = vmul.f32 %v7555_v29, %v6131_v24 }
 0x254   :  { %v3610_v7 = vadd.f32 %v3521_v39, %v3290_v25  ;;  %v3611_v44 = vadd.f32 %v3523_v41, %v3291_v31  ;;  %v3840_v45 = vrot.slane %v3730_v11, 4  ;;  %v3842_v21 = vrot.slane %v3731_v32, 4  ;;  %v7796_v25 = vld [vmem:[#allocation5 + $0x10] sm:$0xff]  ;;  %v5978_v39 = vld [vmem:[#allocation2 + $0xe3] ss:$0 sm:$0xff] }
 0x255   :  { %v4159_v18 = vrot.slane %v4049_v52, 3  ;;  %v4160_v47 = vrot.slane %v4050_v43, 3  ;;  %v4369_v14 = vmul.f32 %v7666_v40, %v6147_v37  ;;  %v4370_v51 = vmul.f32 %v7552_v33, %v6147_v37 }
 0x256   :  { %v3841_v16 = vsel %vm1416_vm3, %v3839_v60, %v3840_v45  ;;  %v3843_v50 = vsel %vm1416_vm3, %v3840_v45, %v3842_v21  ;;  %v4371_v53 = vmul.f32 %v7555_v29, %v6147_v37  ;;  %v4162_v17 = vrot.slane %v4051_v46, 3 }
 0x257   :  { %v3930_v38 = vadd.f32 %v3841_v16, %v3610_v7  ;;  %v3931_v9 = vadd.f32 %v3843_v50, %v3611_v44  ;;  %v4161_v10 = vsel %vm1737_vm4, %v4159_v18, %v4160_v47  ;;  %v4479_v56 = vrot.slane %v4369_v14, 2 }
 0x258   :  { %v4480_v61 = vrot.slane %v4370_v51, 2  ;;  %v4482_v34 = vrot.slane %v4371_v53, 2  ;;  %v4689_v63 = vmul.f32 %v7666_v40, %v6163_v36  ;;  %v4163_v1 = vsel %vm1737_vm4, %v4160_v47, %v4162_v17  ;;  %v6010_v17 = vld [vmem:[#allocation2 + $0xe5] ss:$0 sm:$0xff] }
 0x259   :  { %v4250_v55 = vadd.f32 %v4161_v10, %v3930_v38  ;;  %v4690_v2 = vmul.f32 %v7552_v33, %v6163_v36  ;;  %v4691_v4 = vmul.f32 %v7555_v29, %v6163_v36  ;;  %v4251_v62 = vadd.f32 %v4163_v1, %v3931_v9  ;;  %v5994_v36 = vld [vmem:[#allocation2 + $0xe4] ss:$0 sm:$0xff] }
 0x25a   :  { %v4481_v5 = vsel %vm2058_vm5, %v4479_v56, %v4480_v61  ;;  %v4483_v6 = vsel %vm2058_vm5, %v4480_v61, %v4482_v34  ;;  %v4799_v30 = vrot.slane %v4689_v63, 1  ;;  %v129_v42 = vmul.f32 %v6611_v12, %v93_v0 }
 0x25b   :  { %v4570_v59 = vadd.f32 %v4481_v5, %v4250_v55  ;;  %v4800_v13 = vrot.slane %v4690_v2, 1  ;;  %v4802_v28 = vrot.slane %v4691_v4, 1  ;;  %v4571_v15 = vadd.f32 %v4483_v6, %v4251_v62  ;;  %v6026_v5 = vld [vmem:[#allocation2 + $0xe6] ss:$0 sm:$0xff] }
 0x25c   :  { %v130_v8 = vmul.f32 %v6611_v12, %v94_v22  ;;  %v241_v33 = vmul.f32 %v7555_v29, %v5930_v58  ;;  %v242_v20 = vmul.f32 %v7622_v35, %v5930_v58  ;;  %v399_v24 = vmul.f32 %v7793_v49, %v5946_v19 }
 0x25d   :  { %v4801_v23 = vsel %vm2379_vm6, %v4799_v30, %v4800_v13  ;;  %v4803_v54 = vsel %vm2379_vm6, %v4800_v13, %v4802_v28  ;;  %v400_v57 = vmul.f32 %v7796_v25, %v5946_v19  ;;  %v401_v29 = vmul.f32 %v7622_v35, %v5946_v19 }
 0x25e   :  { %v4890_v26 = vadd.f32 %v4801_v23, %v4570_v59  ;;  %v4891_v27 = vadd.f32 %v4803_v54, %v4571_v15  ;;  %v273_v31 = vadd.f32 %v241_v33, %v129_v42  ;;  %v274_v11 = vadd.f32 %v242_v20, %v130_v8  ;;  %v6042_v23 = vld [vmem:[#allocation2 + $0xe7] ss:$0 sm:$0xff] }
 0x25f   :  { %v524_v32 = vrot.slane %v399_v24, 7  ;;  %v525_v60 = vrot.slane %v400_v57, 7  ;;  %v720_v37 = vmul.f32 %v7793_v49, %v5962_v48  ;;  %v527_v45 = vrot.slane %v401_v29, 7 }
 0x260   :  { %v7801_v41 = vmul.f32 0.5, %v4890_v26  ;;  %v7803_v52 = vmul.f32 0.5, %v4891_v27  ;;  %v4954_v43 = vmul.f32 0.70710677, %v4890_v26  ;;  %v4955_v7 = vmul.f32 0.70710677, %v4891_v27 }
 0x261   :  { %v526_v44 = vsel %vm453_vm0, %v524_v32, %v525_v60  ;;  %v721_v21 = vmul.f32 %v7796_v25, %v5962_v48  ;;  %v722_v46 = vmul.f32 %v7622_v35, %v5962_v48  ;;  %v845_v47 = vrot.slane %v720_v37, 6  ;;  %v6058_v27 = vld [vmem:[#allocation2 + $0xe8] ss:$0 sm:$0xff] }
 0x262   :  { %6336 = verf.f32 %v4954_v43  ;;  %v594_v18 = vadd.f32 %v526_v44, %v273_v31  ;;  %v1041_v14 = vmul.f32 %v7793_v49, %v5978_v39  ;;  %v528_v16 = vsel %vm453_vm0, %v525_v60, %v527_v45 }
 0x263   :  { %6338 = verf.f32 %v4955_v7  ;;  %v846_v50 = vrot.slane %v721_v21, 6  ;;  %v848_v51 = vrot.slane %v722_v46, 6  ;;  %v595_v53 = vadd.f32 %v528_v16, %v274_v11  ;;  %v6074_v46 = vld [vmem:[#allocation2 + $0xe9] ss:$0 sm:$0xff] }
 0x264   :  { %v1042_v38 = vmul.f32 %v7796_v25, %v5978_v39  ;;  %v1043_v9 = vmul.f32 %v7622_v35, %v5978_v39  ;;  %v1166_v10 = vrot.slane %v1041_v14, 5  ;;  %v1362_v34 = vmul.f32 %v7793_v49, %v5994_v36 }
 0x265   :  { %v847_v56 = vsel %vm774_vm1, %v845_v47, %v846_v50  ;;  %v849_v61 = vsel %vm774_vm1, %v846_v50, %v848_v51  ;;  %v1363_v63 = vmul.f32 %v7796_v25, %v5994_v36  ;;  %v1364_v4 = vmul.f32 %v7622_v35, %v5994_v36  ;;  %v6090_v50 = vld [vmem:[#allocation2 + $0xea] ss:$0 sm:$0xff] }
 0x266   :  { %v915_v0 = vadd.f32 %v847_v56, %v594_v18  ;;  %v916_v1 = vadd.f32 %v849_v61, %v595_v53  ;;  %v1167_v55 = vrot.slane %v1042_v38, 5  ;;  %v1169_v2 = vrot.slane %v1043_v9, 5 }
 0x267   :  { %v1487_v22 = vrot.slane %v1362_v34, 4  ;;  %v1488_v58 = vrot.slane %v1363_v63, 4  ;;  %v1683_v62 = vmul.f32 %v7793_v49, %v6010_v17  ;;  %v1684_v19 = vmul.f32 %v7796_v25, %v6010_v17 }
 0x268   :  { %v1168_v6 = vsel %vm1095_vm2, %v1166_v10, %v1167_v55  ;;  %v1170_v30 = vsel %vm1095_vm2, %v1167_v55, %v1169_v2  ;;  %v1685_v59 = vmul.f32 %v7622_v35, %v6010_v17  ;;  %v1490_v15 = vrot.slane %v1364_v4, 4 }
 0x269   :  { %v1236_v13 = vadd.f32 %v1168_v6, %v915_v0  ;;  %v1237_v28 = vadd.f32 %v1170_v30, %v916_v1  ;;  %v1489_v42 = vsel %vm1416_vm3, %v1487_v22, %v1488_v58  ;;  %v1808_v8 = vrot.slane %v1683_v62, 3  ;;  %v6106_v30 = vld [vmem:[#allocation2 + $0xeb] ss:$0 sm:$0xff] }
 0x26a   :  { %v1809_v33 = vrot.slane %v1684_v19, 3  ;;  %v1811_v20 = vrot.slane %v1685_v59, 3  ;;  %v2004_v48 = vmul.f32 %v7793_v49, %v6026_v5  ;;  %v1491_v54 = vsel %vm1416_vm3, %v1488_v58, %v1490_v15 }
 0x26b   :  { %v1557_v24 = vadd.f32 %v1489_v42, %v1236_v13  ;;  %v2005_v57 = vmul.f32 %v7796_v25, %v6026_v5  ;;  %v2006_v26 = vmul.f32 %v7622_v35, %v6026_v5  ;;  %v1558_v31 = vadd.f32 %v1491_v54, %v1237_v28  ;;  %v6122_v28 = vld [vmem:[#allocation2 + $0xec] ss:$0 sm:$0xff] }
 0x26c   :  { %v1810_v11 = vsel %vm1737_vm4, %v1808_v8, %v1809_v33  ;;  %v1812_v29 = vsel %vm1737_vm4, %v1809_v33, %v1811_v20  ;;  %v2129_v32 = vrot.slane %v2004_v48, 2  ;;  %v2325_v43 = vmul.f32 %v7793_v49, %v6042_v23 }
 0x26d   :  { %v1878_v60 = vadd.f32 %v1810_v11, %v1557_v24  ;;  %v2130_v37 = vrot.slane %v2005_v57, 2  ;;  %v2132_v39 = vrot.slane %v2006_v26, 2  ;;  %v1879_v7 = vadd.f32 %v1812_v29, %v1558_v31 }
 0x26e   :  { %v2326_v44 = vmul.f32 %v7796_v25, %v6042_v23  ;;  %v2327_v45 = vmul.f32 %v7622_v35, %v6042_v23  ;;  %v2632_v21 = vmul.f32 %v7793_v49, %v6058_v27  ;;  %v2450_v36 = vrot.slane %v2325_v43, 1 }
 0x26f   :  { %v6337_v18 = vpop.eup %6336  ;;  %v2131_v47 = vsel %vm2058_vm5, %v2129_v32, %v2130_v37  ;;  %v2133_v14 = vsel %vm2058_vm5, %v2130_v37, %v2132_v39  ;;  %v2633_v16 = vmul.f32 %v7796_v25, %v6058_v27  ;;  %v2790_v35 = vmul.f32 %v7666_v40, %v6074_v46  ;;  %v6138_v27 = vld [vmem:[#allocation2 + $0xed] ss:$0 sm:$0xff] }
 0x270   :  { %v6339_v51 = vpop.eup %6338  ;;  %v5018_v53 = vadd.f32 1.0, %v6337_v18  ;;  %v2199_v38 = vadd.f32 %v2131_v47, %v1878_v60  ;;  %v2200_v9 = vadd.f32 %v2133_v14, %v1879_v7  ;;  %v2451_v10 = vrot.slane %v2326_v44, 1 }
 0x271   :  { %v5019_v17 = vadd.f32 1.0, %v6339_v51  ;;  %v2453_v56 = vrot.slane %v2327_v45, 1  ;;  %v2791_v61 = vmul.f32 %v7793_v49, %v6074_v46  ;;  %v2792_v0 = vmul.f32 %v7796_v25, %v6074_v46  ;;  %v6154_v46 = vld [vmem:[#allocation2 + $0xee] ss:$0 sm:$0xff] }
 0x272   :  { %v5050_v34 = vmul.f32 %v5018_v53, %v7801_v41  ;;  %v2452_v63 = vsel %vm2379_vm6, %v2450_v36, %v2451_v10  ;;  %v3110_v1 = vmul.f32 %v7666_v40, %v6090_v50  ;;  %v2914_v22 = vrot.slane %v2790_v35, 7 }
 0x273   :  { %v5051_v55 = vmul.f32 %v5019_v17, %v7803_v52  ;;  %v2454_v2 = vsel %vm2379_vm6, %v2451_v10, %v2453_v56  ;;  %v2520_v4 = vadd.f32 %v2452_v63, %v2199_v38  ;;  %v2915_v62 = vrot.slane %v2791_v61, 7  ;;  %v6170_v38 = vld [vmem:[#allocation2 + $0xef] ss:$0 sm:$0xff] }
 0x274   :  { %v2521_v58 = vadd.f32 %v2454_v2, %v2200_v9  ;;  %v2917_v5 = vrot.slane %v2792_v0, 7  ;;  %v3111_v6 = vmul.f32 %v7793_v49, %v6090_v50  ;;  %v3112_v59 = vmul.f32 %v7796_v25, %v6090_v50 }
 0x275   :  { %v5075_v19 = vpack.c.bf16 %v5051_v55, %v5050_v34  ;;  %v2664_v41 = vadd.f32 %v2632_v21, %v2520_v4  ;;  %v3234_v13 = vrot.slane %v3110_v1, 6  ;;  %v2916_v15 = vsel %vm453_vm0, %v2914_v22, %v2915_v62  ;;  %v95_v4 = vld [vmem:[#allocation2 + $0xf0] sm:$0xff] }
 0x276   :  { %v2665_v42 = vadd.f32 %v2633_v16, %v2521_v58  ;;  %v2918_v52 = vsel %vm453_vm0, %v2915_v62, %v2917_v5  ;;  %v3235_v8 = vrot.slane %v3111_v6, 6  ;;  %v3237_v20 = vrot.slane %v3112_v59, 6  ;;  %v96_v6 = vld [vmem:[#allocation2 + $0xf8] sm:$0xff] }
 0x277   :  { %6233 = vmatmul.mubr.bf16.gmra.mxu0 %v5075_v19  ;;  %v2984_v33 = vadd.f32 %v2916_v15, %v2664_v41  ;;  %v3430_v48 = vmul.f32 %v7666_v40, %v6106_v30  ;;  %v3431_v23 = vmul.f32 %v7793_v49, %v6106_v30  ;;  %v3432_v57 = vmul.f32 %v7796_v25, %v6106_v30  ;;  %v5931_v30 = vld [vmem:[#allocation2 + $0xf0] ss:$0 sm:$0xff] }
 0x278   :  { %v2985_v54 = vadd.f32 %v2918_v52, %v2665_v42  ;;  %v3236_v24 = vsel %vm774_vm1, %v3234_v13, %v3235_v8  ;;  %v3750_v26 = vmul.f32 %v7666_v40, %v6122_v28  ;;  %v3238_v31 = vsel %vm774_vm1, %v3235_v8, %v3237_v20 }
 0x279   :  { %v3304_v11 = vadd.f32 %v3236_v24, %v2984_v33  ;;  %v3554_v29 = vrot.slane %v3430_v48, 5  ;;  %v3555_v32 = vrot.slane %v3431_v23, 5  ;;  %v3557_v37 = vrot.slane %v3432_v57, 5  ;;  %v7876_v48 = vld [vmem:[#allocation5 + $0x18] sm:$0xff] }
 0x27a   :  { %v3305_v60 = vadd.f32 %v3238_v31, %v2985_v54  ;;  %v3751_v39 = vmul.f32 %v7793_v49, %v6122_v28  ;;  %v3752_v43 = vmul.f32 %v7796_v25, %v6122_v28  ;;  %v3874_v44 = vrot.slane %v3750_v26, 4  ;;  %v5947_v28 = vld [vmem:[#allocation2 + $0xf1] ss:$0 sm:$0xff]  ;;  %v5963_v54 = vld [vmem:[#allocation2 + $0xf2] ss:$0 sm:$0xff] }
 0x27b   :  { %v3556_v7 = vsel %vm1095_vm2, %v3554_v29, %v3555_v32  ;;  %v4070_v45 = vmul.f32 %v7666_v40, %v6138_v27  ;;  %v4071_v21 = vmul.f32 %v7793_v49, %v6138_v27  ;;  %v3558_v18 = vsel %vm1095_vm2, %v3555_v32, %v3557_v37 }
 0x27c   :  { %v3624_v47 = vadd.f32 %v3556_v7, %v3304_v11  ;;  %v3875_v14 = vrot.slane %v3751_v39, 4  ;;  %v3877_v36 = vrot.slane %v3752_v43, 4  ;;  %v3625_v16 = vadd.f32 %v3558_v18, %v3305_v60 }
 0x27d   :  { %v4072_v50 = vmul.f32 %v7796_v25, %v6138_v27  ;;  %v4194_v51 = vrot.slane %v4070_v45, 3  ;;  %v4195_v53 = vrot.slane %v4071_v21, 3  ;;  %v4390_v17 = vmul.f32 %v7666_v40, %v6154_v46 }
 0x27e   :  { %v3876_v9 = vsel %vm1416_vm3, %v3874_v44, %v3875_v14  ;;  %v3878_v10 = vsel %vm1416_vm3, %v3875_v14, %v3877_v36  ;;  %v4391_v56 = vmul.f32 %v7793_v49, %v6154_v46  ;;  %v4392_v0 = vmul.f32 %v7796_v25, %v6154_v46  ;;  %v5979_v14 = vld [vmem:[#allocation2 + $0xf3] ss:$0 sm:$0xff] }
 0x27f   :  { %v3944_v35 = vadd.f32 %v3876_v9, %v3624_v47  ;;  %v3945_v61 = vadd.f32 %v3878_v10, %v3625_v16  ;;  %v4196_v34 = vsel %vm1737_vm4, %v4194_v51, %v4195_v53  ;;  %v4197_v63 = vrot.slane %v4072_v50, 3  ;;  %v5995_v51 = vld [vmem:[#allocation2 + $0xf4] ss:$0 sm:$0xff] }
 0x280   :  { %v4514_v1 = vrot.slane %v4390_v17, 2  ;;  %v4515_v55 = vrot.slane %v4391_v56, 2  ;;  %v4710_v2 = vmul.f32 %v7666_v40, %v6170_v38  ;;  %v4711_v62 = vmul.f32 %v7793_v49, %v6170_v38 }
 0x281   :  { %v4198_v22 = vsel %vm1737_vm4, %v4195_v53, %v4197_v63  ;;  %v4264_v58 = vadd.f32 %v4196_v34, %v3944_v35  ;;  %v4712_v5 = vmul.f32 %v7796_v25, %v6170_v38  ;;  %v4517_v59 = vrot.slane %v4392_v0, 2 }
 0x282   :  { %v4265_v19 = vadd.f32 %v4198_v22, %v3945_v61  ;;  %v4516_v41 = vsel %vm2058_vm5, %v4514_v1, %v4515_v55  ;;  %v4834_v13 = vrot.slane %v4710_v2, 1  ;;  %v4835_v15 = vrot.slane %v4711_v62, 1  ;;  %v6011_v61 = vld [vmem:[#allocation2 + $0xf5] ss:$0 sm:$0xff] }
 0x283   :  { %v4584_v42 = vadd.f32 %v4516_v41, %v4264_v58  ;;  %v4837_v52 = vrot.slane %v4712_v5, 1  ;;  %v131_v40 = vmul.f32 %v6611_v12, %v95_v4  ;;  %v4518_v8 = vsel %vm2058_vm5, %v4515_v55, %v4517_v59 }
 0x284   :  { %v132_v33 = vmul.f32 %v6611_v12, %v96_v6  ;;  %v243_v20 = vmul.f32 %v7796_v25, %v5931_v30  ;;  %v244_v23 = vmul.f32 %v7876_v48, %v5931_v30  ;;  %v4585_v24 = vadd.f32 %v4518_v8, %v4265_v19 }
 0x285   :  { %v4836_v57 = vsel %vm2379_vm6, %v4834_v13, %v4835_v15  ;;  %v4838_v26 = vsel %vm2379_vm6, %v4835_v15, %v4837_v52  ;;  %v402_v27 = vmul.f32 %v7793_v49, %v5947_v28  ;;  %v403_v32 = vmul.f32 %v7796_v25, %v5947_v28  ;;  %v6027_v13 = vld [vmem:[#allocation2 + $0xf6] ss:$0 sm:$0xff] }
 0x286   :  { %v4904_v31 = vadd.f32 %v4836_v57, %v4584_v42  ;;  %v275_v11 = vadd.f32 %v243_v20, %v131_v40  ;;  %v276_v29 = vadd.f32 %v244_v23, %v132_v33  ;;  %v4905_v12 = vadd.f32 %v4838_v26, %v4585_v24  ;;  %v6043_v23 = vld [vmem:[#allocation2 + $0xf7] ss:$0 sm:$0xff] }
 0x287   :  { %v404_v60 = vmul.f32 %v7876_v48, %v5947_v28  ;;  %v529_v37 = vrot.slane %v402_v27, 7  ;;  %v723_v39 = vmul.f32 %v7793_v49, %v5963_v54  ;;  %v530_v44 = vrot.slane %v403_v32, 7  ;;  %v6059_v32 = vld [vmem:[#allocation2 + $0xf8] ss:$0 sm:$0xff] }
 0x288   :  { %v7885_v43 = vmul.f32 0.5, %v4904_v31  ;;  %v4968_v7 = vmul.f32 0.70710677, %v4904_v31  ;;  %v724_v45 = vmul.f32 %v7796_v25, %v5963_v54  ;;  %v7888_v21 = vmul.f32 0.5, %v4905_v12 }
 0x289   :  { %v4969_v46 = vmul.f32 0.70710677, %v4905_v12  ;;  %v532_v18 = vrot.slane %v404_v60, 7  ;;  %v725_v47 = vmul.f32 %v7876_v48, %v5963_v54  ;;  %v531_v36 = vsel %vm453_vm0, %v529_v37, %v530_v44 }
 0x28a   :  { %6340 = verf.f32 %v4968_v7  ;;  %v850_v16 = vrot.slane %v723_v39, 6  ;;  %v851_v50 = vrot.slane %v724_v45, 6  ;;  %v596_v38 = vadd.f32 %v531_v36, %v275_v11 }
 0x28b   :  { %6342 = verf.f32 %v4969_v46  ;;  %v533_v53 = vsel %vm453_vm0, %v530_v44, %v532_v18  ;;  %v853_v9 = vrot.slane %v725_v47, 6  ;;  %v1044_v56 = vmul.f32 %v7793_v49, %v5979_v14  ;;  %v6075_v18 = vld [vmem:[#allocation2 + $0xf9] ss:$0 sm:$0xff] }
 0x28c   :  { %v597_v10 = vadd.f32 %v533_v53, %v276_v29  ;;  %v852_v17 = vsel %vm774_vm1, %v850_v16, %v851_v50  ;;  %v1045_v35 = vmul.f32 %v7796_v25, %v5979_v14  ;;  %v1046_v0 = vmul.f32 %v7876_v48, %v5979_v14 }
 0x28d   :  { %v854_v34 = vsel %vm774_vm1, %v851_v50, %v853_v9  ;;  %v917_v63 = vadd.f32 %v852_v17, %v596_v38  ;;  %v1365_v1 = vmul.f32 %v7793_v49, %v5995_v51  ;;  %v1171_v2 = vrot.slane %v1044_v56, 5 }
 0x28e   :  { %v918_v55 = vadd.f32 %v854_v34, %v597_v10  ;;  %v1172_v4 = vrot.slane %v1045_v35, 5  ;;  %v1366_v22 = vmul.f32 %v7796_v25, %v5995_v51  ;;  %v1174_v58 = vrot.slane %v1046_v0, 5  ;;  %v6091_v34 = vld [vmem:[#allocation2 + $0xfa] ss:$0 sm:$0xff] }
 0x28f   :  { %v1367_v62 = vmul.f32 %v7876_v48, %v5995_v51  ;;  %v1492_v5 = vrot.slane %v1365_v1, 4  ;;  %v1686_v6 = vmul.f32 %v7793_v49, %v6011_v61  ;;  %v1687_v41 = vmul.f32 %v7796_v25, %v6011_v61 }
 0x290   :  { %v1173_v30 = vsel %vm1095_vm2, %v1171_v2, %v1172_v4  ;;  %v1493_v19 = vrot.slane %v1366_v22, 4  ;;  %v1688_v59 = vmul.f32 %v7876_v48, %v6011_v61  ;;  %v1175_v28 = vsel %vm1095_vm2, %v1172_v4, %v1174_v58  ;;  %v7920_v61 = vld [vmem:[#allocation5] sm:$0xff] }
 0x291   :  { %v1238_v42 = vadd.f32 %v1173_v30, %v917_v63  ;;  %v1495_v15 = vrot.slane %v1367_v62, 4  ;;  %v1813_v52 = vrot.slane %v1686_v6, 3  ;;  %v1239_v40 = vadd.f32 %v1175_v28, %v918_v55  ;;  %v6123_v28 = vld [vmem:[#allocation2 + $0xfc] ss:$0 sm:$0xff] }
 0x292   :  { %v1494_v8 = vsel %vm1416_vm3, %v1492_v5, %v1493_v19  ;;  %v1814_v33 = vrot.slane %v1687_v41, 3  ;;  %v1816_v20 = vrot.slane %v1688_v59, 3  ;;  %v2007_v57 = vmul.f32 %v7793_v49, %v6027_v13 }
 0x293   :  { %v1496_v54 = vsel %vm1416_vm3, %v1493_v19, %v1495_v15  ;;  %v1559_v24 = vadd.f32 %v1494_v8, %v1238_v42  ;;  %v2008_v26 = vmul.f32 %v7796_v25, %v6027_v13  ;;  %v2009_v29 = vmul.f32 %v7876_v48, %v6027_v13  ;;  %v6107_v19 = vld [vmem:[#allocation2 + $0xfb] ss:$0 sm:$0xff] }
 0x294   :  { %v1560_v27 = vadd.f32 %v1496_v54, %v1239_v40  ;;  %v1815_v31 = vsel %vm1737_vm4, %v1813_v52, %v1814_v33  ;;  %v1817_v11 = vsel %vm1737_vm4, %v1814_v33, %v1816_v20  ;;  %v2134_v60 = vrot.slane %v2007_v57, 2 }
 0x295   :  { %v1880_v12 = vadd.f32 %v1815_v31, %v1559_v24  ;;  %v2135_v37 = vrot.slane %v2008_v26, 2  ;;  %v2328_v39 = vmul.f32 %v7793_v49, %v6043_v23  ;;  %v2137_v44 = vrot.slane %v2009_v29, 2  ;;  %v6139_v26 = vld [vmem:[#allocation2 + $0xfd] ss:$0 sm:$0xff] }
 0x296   :  { %v1881_v7 = vadd.f32 %v1817_v11, %v1560_v27  ;;  %v2329_v45 = vmul.f32 %v7796_v25, %v6043_v23  ;;  %v2330_v46 = vmul.f32 %v7876_v48, %v6043_v23  ;;  %v2634_v16 = vmul.f32 %v7793_v49, %v6059_v32 }
 0x297   :  { %v6341_v47 = vpop.eup %6340  ;;  %v2136_v14 = vsel %vm2058_vm5, %v2134_v60, %v2135_v37  ;;  %v2455_v36 = vrot.slane %v2328_v39, 1  ;;  %v2635_v50 = vmul.f32 %v7796_v25, %v6059_v32  ;;  %v2138_v38 = vsel %vm2058_vm5, %v2135_v37, %v2137_v44 }
 0x298   :  { %v6343_v51 = vpop.eup %6342  ;;  %v5032_v53 = vadd.f32 1.0, %v6341_v47  ;;  %v2201_v9 = vadd.f32 %v2136_v14, %v1880_v12  ;;  %v2456_v10 = vrot.slane %v2329_v45, 1  ;;  %v2202_v56 = vadd.f32 %v2138_v38, %v1881_v7  ;;  %v6222_v38 = vpop.f32.mrf.mxu0 }
 0x299   :  { %v5033_v17 = vadd.f32 1.0, %v6343_v51  ;;  %v2458_v35 = vrot.slane %v2330_v46, 1  ;;  %v2793_v48 = vmul.f32 %v7920_v61, %v6075_v18  ;;  %v2794_v1 = vmul.f32 %v7793_v49, %v6075_v18  ;;  %v6155_v46 = vld [vmem:[#allocation2 + $0xfe] ss:$0 sm:$0xff] }
 0x29a   :  { %v5064_v63 = vmul.f32 %v5032_v53, %v7885_v43  ;;  %v2457_v0 = vsel %vm2379_vm6, %v2455_v36, %v2456_v10  ;;  %v2795_v55 = vmul.f32 %v7796_v25, %v6075_v18  ;;  %v3113_v30 = vmul.f32 %v7920_v61, %v6091_v34 }
 0x29b   :  { %v5065_v2 = vmul.f32 %v5033_v17, %v7888_v21  ;;  %v2459_v4 = vsel %vm2379_vm6, %v2456_v10, %v2458_v35  ;;  %v2522_v22 = vadd.f32 %v2457_v0, %v2201_v9  ;;  %v2919_v58 = vrot.slane %v2793_v48, 7  ;;  %v6171_v35 = vld [vmem:[#allocation2 + $0xff] ss:$0 sm:$0xff] }
 0x29c   :  { %v2523_v62 = vadd.f32 %v2459_v4, %v2202_v56  ;;  %v2920_v5 = vrot.slane %v2794_v1, 7  ;;  %v2922_v6 = vrot.slane %v2795_v55, 7  ;;  %v3114_v59 = vmul.f32 %v7793_v49, %v6091_v34 }
 0x29d   :  { %v5082_v41 = vpack.c.bf16 %v5065_v2, %v5064_v63  ;;  %v2666_v43 = vadd.f32 %v2634_v16, %v2522_v22  ;;  %v3115_v13 = vmul.f32 %v7796_v25, %v6091_v34  ;;  %v3239_v52 = vrot.slane %v3113_v30, 6 }
 0x29e   :  { %v2667_v42 = vadd.f32 %v2635_v50, %v2523_v62  ;;  %v2921_v21 = vsel %vm453_vm0, %v2919_v58, %v2920_v5  ;;  %v2923_v15 = vsel %vm453_vm0, %v2920_v5, %v2922_v6  ;;  %v3240_v8 = vrot.slane %v3114_v59, 6  ;;  %v5182_v6 = vpop.f32.mrf.mxu0 }
 0x29f   :  { %6248 = vmatprep.mubr.bf16.mxu1 %v5082_v41  ;;  %v2986_v40 = vadd.f32 %v2921_v21, %v2666_v43  ;;  %v3242_v33 = vrot.slane %v3115_v13, 6  ;;  %v3433_v20 = vmul.f32 %v7920_v61, %v6107_v19  ;;  %v3434_v54 = vmul.f32 %v7793_v49, %v6107_v19 }
 0x2a0   :  { %v2987_v23 = vadd.f32 %v2923_v15, %v2667_v42  ;;  %v3435_v24 = vmul.f32 %v7796_v25, %v6107_v19  ;;  %v3753_v57 = vmul.f32 %v7920_v61, %v6123_v28  ;;  %v3241_v27 = vsel %vm774_vm1, %v3239_v52, %v3240_v8  ;;  %v6238_v42 = vpop.f32.mrf.mxu1 }
 0x2a1   :  { %v3243_v31 = vsel %vm774_vm1, %v3240_v8, %v3242_v33  ;;  %v3559_v11 = vrot.slane %v3433_v20, 5  ;;  %v3754_v29 = vmul.f32 %v7793_v49, %v6123_v28  ;;  %v3306_v32 = vadd.f32 %v3241_v27, %v2986_v40 }
 0x2a2   :  { %v3307_v12 = vadd.f32 %v3243_v31, %v2987_v23  ;;  %v3560_v60 = vrot.slane %v3434_v54, 5  ;;  %v3562_v37 = vrot.slane %v3435_v24, 5  ;;  %v3755_v39 = vmul.f32 %v7796_v25, %v6123_v28 }
 0x2a3   :  { %v3879_v7 = vrot.slane %v3753_v57, 4  ;;  %v3880_v44 = vrot.slane %v3754_v29, 4  ;;  %v4073_v45 = vmul.f32 %v7920_v61, %v6139_v26  ;;  %v4074_v14 = vmul.f32 %v7793_v49, %v6139_v26  ;;  %v5246_v57 = vpop.f32.mrf.mxu1 }
 0x2a4   :  { %v3561_v18 = vsel %vm1095_vm2, %v3559_v11, %v3560_v60  ;;  %v3563_v47 = vsel %vm1095_vm2, %v3560_v60, %v3562_v37  ;;  %v4075_v36 = vmul.f32 %v7796_v25, %v6139_v26  ;;  %v3882_v53 = vrot.slane %v3755_v39, 4  ;;  %v6433_v11 = vld [vmem:[#allocation2 + $0x10] sm:$0xff]  ;;  %v6435_v39 = vld [vmem:[#allocation2 + $0x18] sm:$0xff] }
 0x2a5   :  { %v3626_v16 = vadd.f32 %v3561_v18, %v3306_v32  ;;  %v3627_v50 = vadd.f32 %v3563_v47, %v3307_v12  ;;  %v3881_v51 = vsel %vm1416_vm3, %v3879_v7, %v3880_v44  ;;  %v4199_v9 = vrot.slane %v4073_v45, 3  ;;  %v6434_v32 = vld [vmem:[#allocation2 + $0x90] sm:$0xff]  ;;  %v6239_v37 = vpop.f32.mrf.mxu1 }
 0x2a6   :  { %v4200_v10 = vrot.slane %v4074_v14, 3  ;;  %v4202_v17 = vrot.slane %v4075_v36, 3  ;;  %v4393_v56 = vmul.f32 %v7920_v61, %v6155_v46  ;;  %v3883_v48 = vsel %vm1416_vm3, %v3880_v44, %v3882_v53  ;;  %v6436_v44 = vld [vmem:[#allocation2] sm:$0xff]  ;;  %v6439_v53 = vld [vmem:[#allocation2 + $0x88] sm:$0xff] }
 0x2a7   :  { %v3946_v34 = vadd.f32 %v3881_v51, %v3626_v16  ;;  %v4394_v63 = vmul.f32 %v7793_v49, %v6155_v46  ;;  %v4395_v0 = vmul.f32 %v7796_v25, %v6155_v46  ;;  %v3947_v1 = vadd.f32 %v3883_v48, %v3627_v50  ;;  %v5249_v47 = vpop.f32.mrf.mxu1  ;;  %v6437_v14 = vld [vmem:[#allocation2 + $0x80] sm:$0xff]  ;;  %v6438_v16 = vld [vmem:[#allocation2 + $0x98] sm:$0xff] }
 0x2a8   :  { %v4201_v55 = vsel %vm1737_vm4, %v4199_v9, %v4200_v10  ;;  %v4203_v2 = vsel %vm1737_vm4, %v4200_v10, %v4202_v17  ;;  %v4519_v4 = vrot.slane %v4393_v56, 2  ;;  %v4713_v5 = vmul.f32 %v7920_v61, %v6171_v35  ;;  %v7963_v61 = vld [vmem:[%s8440_s3] sm:$0xf]  ;;  %s6558_s3 = smov [#allocation8]  }
 0x2a9   :  { %v4266_v22 = vadd.f32 %v4201_v55, %v3946_v34  ;;  %v4520_v58 = vrot.slane %v4394_v63, 2  ;;  %v4522_v62 = vrot.slane %v4395_v0, 2  ;;  %v4267_v30 = vadd.f32 %v4203_v2, %v3947_v1  ;;  %s5903_s9 = sshll.u32 %s6558_s3, 4  ;;  %s5904_s9 = int_to_ptr.vmem [resolvable:$true] %s5903_s9 }
 0x2aa   :  { %v4714_v19 = vmul.f32 %v7793_v49, %v6171_v35  ;;  %v4715_v41 = vmul.f32 %v7796_v25, %v6171_v35  ;;  %v5311_v43 = vsub.s32 1, %v6599_v3  ;;  %v4839_v28 = vrot.slane %v4713_v5, 1  ;;  %v6223_v25 = vpop.f32.mrf.mxu0  ;;  %v6440_v5 = vld [vmem:[#allocation2 + $0x8] sm:$0xff]  ;;  %s6525_s10 = scalar_lea.vmem %s5904_s9, 4096  ;;  %p6530_p2 = scmp.lt.s32.totalorder %s5904_s9, %s5904_s9 }
 0x2ab   :  { %v4521_v59 = vsel %vm2058_vm5, %v4519_v4, %v4520_v58  ;;  %v4523_v13 = vsel %vm2058_vm5, %v4520_v58, %v4522_v62  ;;  %p6526_p1 = scmp.ne.s32.totalorder %s5904_s9, %s6525_s10  ;;  %p6531_p3 = scmp.lt.s32.totalorder %s6525_s10, %s6525_s10 }
 0x2ac   :  { %v4586_v21 = vadd.f32 %v4521_v59, %v4266_v22  ;;  %v4587_v15 = vadd.f32 %v4523_v13, %v4267_v30  ;;  %v4840_v52 = vrot.slane %v4714_v19, 1  ;;  %v4842_v40 = vrot.slane %v4715_v41, 1  ;;  %v5185_v35 = vpop.f32.mrf.mxu0  ;;  %v6242_v41 = vpop.f32.mrf.mxu1 }
 0x2ad   :  { %v7966_v49 = vrot.slane %v7963_v61, %v5311_v43  ;;  %p6532_p4 = por %p6531_p3, %p6530_p2 }
 0x2ae   :  { %v4841_v8 = vsel %vm2379_vm6, %v4839_v28, %v4840_v52  ;;  %v4843_v33 = vsel %vm2379_vm6, %v4840_v52, %v4842_v40  ;;  %v6226_v58 = vpop.f32.mrf.mxu0  ;;  %v6441_v52 = vld [vmem:[#allocation2 + $0x30] sm:$0xff] }
 0x2af   :  { %v4906_v20 = vadd.f32 %v4841_v8, %v4586_v21  ;;  %v4907_v23 = vadd.f32 %v4843_v33, %v4587_v15  ;;  %v5315_v54 = vadd.f32 %v6222_v38, %v7966_v49  ;;  %v5331_v24 = vadd.f32 %v6238_v42, %v7966_v49  ;;  %v5262_v42 = vpop.f32.mrf.mxu1  ;;  %v6442_v33 = vld [vmem:[#allocation2 + $0x38] sm:$0xff]  ;;  %p6533_p5 = pnand %p6532_p4, %p6526_p1 }
 0x2b0   :  { %v5316_v26 = vadd.f32 %v6223_v25, %v7966_v49  ;;  %v5313_v60 = vadd.f32 %v7966_v49, %v5182_v6  ;;  %v5329_v46 = vadd.f32 %v7966_v49, %v5246_v57  ;;  %v5332_v18 = vadd.f32 %v6239_v37, %v7966_v49  ;;  %v5198_v19 = vpop.f32.mrf.mxu0  ;;  %v6443_v57 = vld [vmem:[#allocation2 + $0xb0] sm:$0xff] }
 0x2b1   :  { %v4970_v27 = vmul.f32 0.70710677, %v4906_v20  ;;  %v4971_v31 = vmul.f32 0.70710677, %v4907_v23  ;;  %v7973_v29 = vadd.f32 %v6433_v11, %v5315_v54  ;;  %v7975_v12 = vadd.f32 %v6434_v32, %v5331_v24  ;;  %v6243_v8 = vpop.f32.mrf.mxu1 }
 0x2b2   :  { %v7978_v7 = vadd.f32 %v6435_v39, %v5316_v26  ;;  %v7982_v45 = vadd.f32 %v6436_v44, %v5313_v60  ;;  %v7988_v36 = vadd.f32 %v6437_v14, %v5329_v46  ;;  %v7990_v50 = vadd.f32 %v6438_v16, %v5332_v18  ;;  %v6227_v28 = vpop.f32.mrf.mxu0  ;;  %v6445_v60 = vld [vmem:[#allocation2 + $0x20] sm:$0xff]  ;;  %v6446_v44 = vld [vmem:[#allocation2 + $0x28] sm:$0xff] }
 0x2b3   :  { %6344 = verf.f32 %v4970_v27  ;;  %5413 = vadd.xlane.f32.xlu0 %v7975_v12  ;;  %5381 = vadd.xlane.f32.xlu1 %v7973_v29  ;;  %v5330_v51 = vadd.f32 %v7966_v49, %v5249_v47  ;;  %v5476_v9 = vmul.f32 %v7973_v29, %v7973_v29  ;;  %v4938_v10 = vmul.f32 0.5, %v4906_v20  ;;  %v5265_v32 = vpop.f32.mrf.mxu1  ;;  %v6447_v47 = vld [vmem:[#allocation2 + $0xa0] sm:$0xff]  ;;  %v6448_v16 = vld [vmem:[#allocation2 + $0xa8] sm:$0xff] }
 0x2b4   :  { %6346 = verf.f32 %v4971_v31  ;;  %v4939_v56 = vmul.f32 0.5, %v4907_v23  ;;  %v5492_v0 = vmul.f32 %v7975_v12, %v7975_v12  ;;  %v5477_v1 = vmul.f32 %v7978_v7, %v7978_v7  ;;  %v5201_v54 = vpop.f32.mrf.mxu0  ;;  %v6444_v31 = vld [vmem:[#allocation2 + $0xb8] sm:$0xff] }
 0x2b5   :  { %v7995_v38 = vadd.f32 %v6439_v53, %v5330_v51  ;;  %v5314_v2 = vadd.f32 %v7966_v49, %v5185_v35  ;;  %v5474_v62 = vmul.f32 %v7982_v45, %v7982_v45  ;;  %v5493_v30 = vmul.f32 %v7990_v50, %v7990_v50 }
 0x2b6   :  { %v5490_v43 = vmul.f32 %v7988_v36, %v7988_v36  ;;  %v5319_v13 = vadd.f32 %v6226_v58, %v7966_v49  ;;  %v5320_v21 = vadd.f32 %v6227_v28, %v7966_v49  ;;  %v5335_v25 = vadd.f32 %v6242_v41, %v7966_v49  ;;  %v6449_v58 = vld [vmem:[#allocation2 + $0x50] sm:$0xff] }
 0x2b7   :  { %5377 = vadd.xlane.f32.xlu0 %v7982_v45  ;;  %5383 = vadd.xlane.f32.xlu1 %v7978_v7  ;;  %v8007_v6 = vadd.f32 %v6440_v5, %v5314_v2  ;;  %v5491_v15 = vmul.f32 %v7995_v38, %v7995_v38  ;;  %v5336_v23 = vadd.f32 %v6243_v8, %v7966_v49  ;;  %v6451_v28 = vld [vmem:[#allocation2 + $0xd0] sm:$0xff]  ;;  %v6453_v8 = vld [vmem:[#allocation2 + $0x40] sm:$0xff] }
 0x2b8   :  { %v8020_v40 = vadd.f32 %v6441_v52, %v5319_v13  ;;  %v8023_v20 = vadd.f32 %v6442_v33, %v5320_v21  ;;  %v5317_v24 = vadd.f32 %v7966_v49, %v5198_v19  ;;  %v8029_v26 = vadd.f32 %v6443_v57, %v5335_v25  ;;  %v6450_v19 = vld [vmem:[#allocation2 + $0x58] sm:$0xff] }
 0x2b9   :  { %v5475_v59 = vmul.f32 %v8007_v6, %v8007_v6  ;;  %v5318_v27 = vadd.f32 %v7966_v49, %v5201_v54  ;;  %v8032_v11 = vadd.f32 %v6444_v31, %v5336_v23  ;;  %v5333_v39 = vadd.f32 %v7966_v49, %v5262_v42  ;;  %v6454_v54 = vld [vmem:[#allocation2 + $0x48] sm:$0xff] }
 0x2ba   :  { %v8036_v37 = vadd.f32 %v6445_v60, %v5317_v24  ;;  %v5334_v18 = vadd.f32 %v7966_v49, %v5265_v32  ;;  %v5480_v53 = vmul.f32 %v8020_v40, %v8020_v40  ;;  %v6456_v32 = vld [vmem:[#allocation2 + $0xc8] sm:$0xff] }
 0x2bb   :  { %5409 = vadd.xlane.f32.xlu0 %v7988_v36  ;;  %5415 = vadd.xlane.f32.xlu1 %v7990_v50  ;;  %v8039_v46 = vadd.f32 %v6446_v44, %v5318_v27  ;;  %v8044_v14 = vadd.f32 %v6447_v47, %v5333_v39  ;;  %v6455_v27 = vld [vmem:[#allocation2 + $0xc0] sm:$0xff] }
 0x2bc   :  { %v8046_v51 = vadd.f32 %v6448_v16, %v5334_v18 }
 0x2bd   :  { %v5494_v2 = vmul.f32 %v8044_v14, %v8044_v14 }
 0x2bf   :  { %5510 = vadd.xlane.f32.xlu0 %v5476_v9  ;;  %5411 = vadd.xlane.f32.xlu1 %v7995_v38  ;;  %v5481_v9 = vmul.f32 %v8023_v20, %v8023_v20 }
 0x2c0   :  { %v6345_v17 = vpop.eup %6344 }
 0x2c1   :  { %v6347_v48 = vpop.eup %6346  ;;  %v5034_v34 = vadd.f32 1.0, %v6345_v17  ;;  %v5496_v17 = vmul.f32 %v8029_v26, %v8029_v26 }
 0x2c2   :  { %v5035_v63 = vadd.f32 1.0, %v6347_v48 }
 0x2c3   :  { %v5066_v55 = vmul.f32 %v5034_v34, %v4938_v10  ;;  %5542 = vadd.xlane.f32.xlu0 %v5492_v0  ;;  %5512 = vadd.xlane.f32.xlu1 %v5477_v1  ;;  %v6230_v10 = vpop.f32.mrf.mxu0  ;;  %v5478_v34 = vmul.f32 %v8036_v37, %v8036_v37 }
 0x2c4   :  { %v5067_v4 = vmul.f32 %v5035_v63, %v4939_v56  ;;  %v5497_v56 = vmul.f32 %v8032_v11, %v8032_v11  ;;  %v5479_v63 = vmul.f32 %v8039_v46, %v8039_v46  ;;  %v5323_v0 = vadd.f32 %v6230_v10, %v7966_v49 }
 0x2c5   :  { %v5214_v35 = vpop.f32.mrf.mxu0 }
 0x2c6   :  { %v5083_v22 = vpack.c.bf16 %v5067_v4, %v5066_v55  ;;  %v5321_v13 = vadd.f32 %v7966_v49, %v5214_v35 }
 0x2c7   :  { %5506 = vadd.xlane.f32.xlu0 %v5474_v62  ;;  %5544 = vadd.xlane.f32.xlu1 %v5493_v30  ;;  %v6231_v1 = vpop.f32.mrf.mxu0  ;;  %v8068_v62 = vadd.f32 %v6449_v58, %v5323_v0 }
 0x2c8   :  { %6249 = vmatmul.mubr.bf16.gmra.mxu1 %v5083_v22  ;;  %v5324_v4 = vadd.f32 %v6231_v1, %v7966_v49  ;;  %v5495_v22 = vmul.f32 %v8046_v51, %v8046_v51  ;;  %v8084_v33 = vadd.f32 %v6453_v8, %v5321_v13 }
 0x2c9   :  { %v5484_v39 = vmul.f32 %v8068_v62, %v8068_v62 }
 0x2ca   :  { %v8071_v41 = vadd.f32 %v6450_v19, %v5324_v4  ;;  %v5482_v16 = vmul.f32 %v8084_v33, %v8084_v33 }
 0x2cb   :  { %5538 = vadd.xlane.f32.xlu0 %v5490_v43  ;;  %5508 = vadd.xlane.f32.xlu1 %v5475_v59  ;;  %v5217_v59 = vpop.f32.mrf.mxu0 }
 0x2cc   :  { %v5322_v21 = vadd.f32 %v7966_v49, %v5217_v59  ;;  %v5485_v44 = vmul.f32 %v8071_v41, %v8071_v41 }
 0x2ce   :  { %v8087_v24 = vadd.f32 %v6454_v54, %v5322_v21 }
 0x2cf   :  { %5379 = vadd.xlane.f32.xlu0 %v8007_v6  ;;  %5540 = vadd.xlane.f32.xlu1 %v5491_v15  ;;  %v6452_v15 = vld [vmem:[#allocation2 + $0xd8] sm:$0xff] }
 0x2d3   :  { %5389 = vadd.xlane.f32.xlu0 %v8020_v40  ;;  %5391 = vadd.xlane.f32.xlu1 %v8023_v20 }
 0x2d7   :  { %5421 = vadd.xlane.f32.xlu0 %v8029_v26  ;;  %5423 = vadd.xlane.f32.xlu1 %v8032_v11 }
 0x2db   :  { %5385 = vadd.xlane.f32.xlu0 %v8036_v37  ;;  %5387 = vadd.xlane.f32.xlu1 %v8039_v46 }
 0x2df   :  { %5417 = vadd.xlane.f32.xlu0 %v8044_v14  ;;  %5419 = vadd.xlane.f32.xlu1 %v8046_v51 }
 0x2e3   :  { %5518 = vadd.xlane.f32.xlu0 %v5480_v53  ;;  %5520 = vadd.xlane.f32.xlu1 %v5481_v9  ;;  %v5483_v53 = vmul.f32 %v8087_v24, %v8087_v24 }
 0x2e7   :  { %5550 = vadd.xlane.f32.xlu0 %v5496_v17  ;;  %5552 = vadd.xlane.f32.xlu1 %v5497_v56  ;;  %v6246_v48 = vpop.f32.mrf.mxu1 }
 0x2e8   :  { %v5339_v5 = vadd.f32 %v6246_v48, %v7966_v49  ;;  %v6457_v48 = vld [vmem:[#allocation2 + $0x70] sm:$0xff] }
 0x2e9   :  { %v5278_v55 = vpop.f32.mrf.mxu1 }
 0x2ea   :  { %v8077_v42 = vadd.f32 %v6451_v28, %v5339_v5  ;;  %v5337_v23 = vadd.f32 %v7966_v49, %v5278_v55  ;;  %v6458_v55 = vld [vmem:[#allocation2 + $0x78] sm:$0xff] }
 0x2eb   :  { %5514 = vadd.xlane.f32.xlu0 %v5478_v34  ;;  %5516 = vadd.xlane.f32.xlu1 %v5479_v63  ;;  %v6247_v30 = vpop.f32.mrf.mxu1 }
 0x2ec   :  { %v5340_v43 = vadd.f32 %v6247_v30, %v7966_v49  ;;  %v8092_v31 = vadd.f32 %v6455_v27, %v5337_v23  ;;  %v5500_v18 = vmul.f32 %v8077_v42, %v8077_v42 }
 0x2ed   :  { %v5281_v25 = vpop.f32.mrf.mxu1 }
 0x2ee   :  { %v8080_v52 = vadd.f32 %v6452_v15, %v5340_v43  ;;  %v5338_v57 = vadd.f32 %v7966_v49, %v5281_v25  ;;  %v5498_v9 = vmul.f32 %v8092_v31, %v8092_v31 }
 0x2ef   :  { %5546 = vadd.xlane.f32.xlu0 %v5494_v2  ;;  %5548 = vadd.xlane.f32.xlu1 %v5495_v22 }
 0x2f0   :  { %v8094_v60 = vadd.f32 %v6456_v32, %v5338_v57  ;;  %v5501_v47 = vmul.f32 %v8080_v52, %v8080_v52 }
 0x2f2   :  { %v5499_v10 = vmul.f32 %v8094_v60, %v8094_v60 }
 0x2f3   :  { %5397 = vadd.xlane.f32.xlu0 %v8068_v62  ;;  %5399 = vadd.xlane.f32.xlu1 %v8071_v41 }
 0x2f7   :  { %5429 = vadd.xlane.f32.xlu0 %v8077_v42  ;;  %5431 = vadd.xlane.f32.xlu1 %v8080_v52 }
 0x2fb   :  { %5393 = vadd.xlane.f32.xlu0 %v8084_v33  ;;  %5395 = vadd.xlane.f32.xlu1 %v8087_v24 }
 0x2ff   :  { %5425 = vadd.xlane.f32.xlu0 %v8092_v31  ;;  %5427 = vadd.xlane.f32.xlu1 %v8094_v60 }
 0x303   :  { %5526 = vadd.xlane.f32.xlu0 %v5484_v39  ;;  %5528 = vadd.xlane.f32.xlu1 %v5485_v44 }
 0x307   :  { %5558 = vadd.xlane.f32.xlu0 %v5500_v18  ;;  %5560 = vadd.xlane.f32.xlu1 %v5501_v47 }
 0x30b   :  { %5522 = vadd.xlane.f32.xlu0 %v5482_v16  ;;  %5524 = vadd.xlane.f32.xlu1 %v5483_v53 }
 0x30f   :  { %5554 = vadd.xlane.f32.xlu0 %v5498_v9  ;;  %5556 = vadd.xlane.f32.xlu1 %v5499_v10 }
 0x337   :  { %v6234_v17 = vpop.f32.mrf.mxu0 }
 0x338   :  { %v5327_v56 = vadd.f32 %v6234_v17, %v7966_v49 }
 0x339   :  { %v8115_v35 = vpop.f32.mrf.mxu0 }
 0x33a   :  { %v8117_v34 = vadd.f32 %v6457_v48, %v5327_v56 }
 0x33b   :  { %v6235_v63 = vpop.f32.mrf.mxu0 }
 0x33c   :  { %v5328_v0 = vadd.f32 %v6235_v63, %v7966_v49  ;;  %5405 = vadd.xlane.f32.xlu0 %v8117_v34  ;;  %v5414_v1 = vpop.xlane.xlu0 %5413  ;;  %v5382_v4 = vpop.xlane.xlu1 %5381 }
 0x33d   :  { %v5444_v30 = vmul.f32 0.0078125, %v5382_v4  ;;  %v8124_v59 = vmul.f32 0.0078125, %v5414_v1 }
 0x33e   :  { %v8121_v2 = vadd.f32 %v6458_v55, %v5328_v0 }
 0x33f   :  { %v5604_v13 = vmul.f32 %v5444_v30, %v5444_v30  ;;  %v5620_v23 = vmul.f32 %v8124_v59, %v8124_v59 }
 0x340   :  { %5407 = vadd.xlane.f32.xlu1 %v8121_v2  ;;  %v5378_v22 = vpop.xlane.xlu0 %5377  ;;  %v5384_v58 = vpop.xlane.xlu1 %5383 }
 0x341   :  { %v8126_v15 = vmul.f32 0.0078125, %v5384_v58  ;;  %v8130_v54 = vmul.f32 0.0078125, %v5378_v22 }
 0x343   :  { %v5605_v39 = vmul.f32 %v8126_v15, %v8126_v15  ;;  %v5602_v9 = vmul.f32 %v8130_v54, %v8130_v54 }
 0x344   :  { %v5410_v5 = vpop.xlane.xlu0 %5409  ;;  %v5416_v19 = vpop.xlane.xlu1 %5415 }
 0x345   :  { %v8134_v44 = vmul.f32 0.0078125, %v5416_v19  ;;  %v8138_v10 = vmul.f32 0.0078125, %v5410_v5 }
 0x347   :  { %v5621_v63 = vmul.f32 %v8134_v44, %v8134_v44  ;;  %v5618_v58 = vmul.f32 %v8138_v10, %v8138_v10 }
 0x348   :  { %v5511_v43 = vpop.xlane.xlu0 %5510  ;;  %v5412_v21 = vpop.xlane.xlu1 %5411 }
 0x349   :  { %v5572_v28 = vmul.f32 0.0078125, %v5511_v43 }
 0x34b   :  { %v5636_v25 = vsub.f32 %v5572_v28, %v5604_v13  ;;  %v5796_v13 = vsub.s32 2, %v6599_v3  ;;  %v8145_v28 = vmul.f32 0.0078125, %v5412_v21  ;;  %v5668_v21 = vsub.f32 %v7973_v29, %v5444_v30 }
 0x34c   :  { %v5543_v8 = vpop.xlane.xlu0 %5542  ;;  %v5513_v32 = vpop.xlane.xlu1 %5512 }
 0x34d   :  { %v5700_v57 = vadd.f32 1e-05, %v5636_v25  ;;  %v5588_v27 = vmul.f32 0.0078125, %v5543_v8  ;;  %v5573_v18 = vmul.f32 0.0078125, %v5513_v32 }
 0x34f   :  { %6348 = vrsqrt.f32 %v5700_v57  ;;  %v5652_v47 = vsub.f32 %v5588_v27, %v5620_v23  ;;  %v5637_v16 = vsub.f32 %v5573_v18, %v5605_v39  ;;  %v5832_v57 = vsub.s32 3, %v6599_v3 }
 0x350   :  { %v5507_v53 = vpop.xlane.xlu0 %5506  ;;  %v5545_v48 = vpop.xlane.xlu1 %5544  ;;  %v8151_v18 = vrot.slane %v7963_v61, %v5796_v13 }
 0x351   :  { %v5716_v17 = vadd.f32 1e-05, %v5652_v47  ;;  %v5570_v56 = vmul.f32 0.0078125, %v5507_v53  ;;  %v5701_v0 = vadd.f32 1e-05, %v5637_v16  ;;  %v5589_v1 = vmul.f32 0.0078125, %v5545_v48 }
 0x352   :  { %v5619_v47 = vmul.f32 %v8145_v28, %v8145_v28  ;;  %v8159_v48 = vrot.slane %v7963_v61, %v5832_v57 }
 0x353   :  { %6350 = vrsqrt.f32 %v5716_v17  ;;  %v5634_v55 = vsub.f32 %v5570_v56, %v5602_v9  ;;  %v5653_v4 = vsub.f32 %v5589_v1, %v5621_v63 }
 0x354   :  { %6352 = vrsqrt.f32 %v5701_v0  ;;  %v5539_v22 = vpop.xlane.xlu0 %5538  ;;  %v5509_v5 = vpop.xlane.xlu1 %5508 }
 0x355   :  { %v5698_v19 = vadd.f32 1e-05, %v5634_v55  ;;  %v5586_v43 = vmul.f32 0.0078125, %v5539_v22  ;;  %v5717_v25 = vadd.f32 1e-05, %v5653_v4  ;;  %v5571_v53 = vmul.f32 0.0078125, %v5509_v5 }
 0x356   :  { %v5684_v4 = vsub.f32 %v7975_v12, %v8124_v59 }
 0x357   :  { %6354 = vrsqrt.f32 %v5698_v19  ;;  %v5650_v8 = vsub.f32 %v5586_v43, %v5618_v58  ;;  %v5669_v58 = vsub.f32 %v7978_v7, %v8126_v15 }
 0x358   :  { %6356 = vrsqrt.f32 %v5717_v25  ;;  %v5380_v23 = vpop.xlane.xlu0 %5379  ;;  %v5541_v39 = vpop.xlane.xlu1 %5540 }
 0x359   :  { %v5714_v27 = vadd.f32 1e-05, %v5650_v8  ;;  %v8148_v32 = vmul.f32 0.0078125, %v5380_v23  ;;  %v5587_v16 = vmul.f32 0.0078125, %v5541_v39  ;;  %v5666_v8 = vsub.f32 %v7982_v45, %v8130_v54 }
 0x35a   :  { %v5685_v23 = vsub.f32 %v7990_v50, %v8134_v44  ;;  %v5682_v45 = vsub.f32 %v7988_v36, %v8138_v10  ;;  %v5683_v10 = vsub.f32 %v7995_v38, %v8145_v28 }
 0x35b   :  { %6358 = vrsqrt.f32 %v5714_v27  ;;  %v5603_v9 = vmul.f32 %v8148_v32, %v8148_v32  ;;  %v5651_v3 = vsub.f32 %v5587_v16, %v5619_v47 }
 0x35c   :  { %v6349_v17 = vpop.eup %6348  ;;  %v5390_v56 = vpop.xlane.xlu0 %5389 }
 0x35d   :  { %v5764_v63 = vmul.f32 %v6349_v17, %v5668_v21  ;;  %v5635_v0 = vsub.f32 %v5571_v53, %v5603_v9  ;;  %v5392_v1 = vpop.xlane.xlu1 %5391  ;;  %v5715_v55 = vadd.f32 1e-05, %v5651_v3  ;;  %v8180_v3 = vmul.f32 0.0078125, %v5390_v56 }
 0x35f   :  { %v5800_v29 = vmul.f32 %v8151_v18, %v5764_v63  ;;  %v5699_v30 = vadd.f32 1e-05, %v5635_v0  ;;  %6360 = vrsqrt.f32 %v5715_v55  ;;  %v8183_v55 = vmul.f32 0.0078125, %v5392_v1 }
 0x360   :  { %v6351_v22 = vpop.eup %6350  ;;  %v5422_v19 = vpop.xlane.xlu0 %5421  ;;  %v5608_v1 = vmul.f32 %v8180_v3, %v8180_v3 }
 0x361   :  { %v6353_v43 = vpop.eup %6352  ;;  %v5836_v61 = vadd.f32 %v8159_v48, %v5800_v29  ;;  %v5780_v5 = vmul.f32 %v6351_v22, %v5684_v4  ;;  %6362 = vrsqrt.f32 %v5699_v30  ;;  %v5424_v13 = vpop.xlane.xlu1 %5423  ;;  %v8188_v4 = vmul.f32 0.0078125, %v5422_v19 }
 0x362   :  { %v5765_v25 = vmul.f32 %v6353_v43, %v5669_v58  ;;  %v8190_v29 = vmul.f32 0.0078125, %v5424_v13  ;;  %v5667_v58 = vsub.f32 %v8007_v6, %v8148_v32  ;;  %v5609_v38 = vmul.f32 %v8183_v55, %v8183_v55 }
 0x363   :  { %5868 = vst [vmem:[#allocation8 + $0x10] sm:$0xff] %v5836_v61  ;;  %v5816_v12 = vmul.f32 %v8151_v18, %v5780_v5 }
 0x364   :  { %v6355_v59 = vpop.eup %6354  ;;  %v5801_v7 = vmul.f32 %v8151_v18, %v5765_v25  ;;  %v5386_v15 = vpop.xlane.xlu0 %5385  ;;  %v5625_v6 = vmul.f32 %v8190_v29, %v8190_v29 }
 0x365   :  { %v6357_v57 = vpop.eup %6356  ;;  %v5852_v27 = vadd.f32 %v8159_v48, %v5816_v12  ;;  %v5762_v39 = vmul.f32 %v6355_v59, %v5666_v8  ;;  %v5388_v47 = vpop.xlane.xlu1 %5387  ;;  %v5624_v12 = vmul.f32 %v8188_v4, %v8188_v4 }
 0x366   :  { %v5837_v16 = vadd.f32 %v8159_v48, %v5801_v7  ;;  %v5781_v21 = vmul.f32 %v6357_v57, %v5685_v23  ;;  %v8205_v7 = vmul.f32 0.0078125, %v5386_v15 }
 0x367   :  { %5884 = vst [vmem:[#allocation8 + $0x90] sm:$0xff] %v5852_v27  ;;  %v5798_v54 = vmul.f32 %v8151_v18, %v5762_v39 }
 0x368   :  { %v6359_v53 = vpop.eup %6358  ;;  %5869 = vst [vmem:[#allocation8 + $0x18] sm:$0xff] %v5837_v16  ;;  %v5817_v50 = vmul.f32 %v8151_v18, %v5781_v21  ;;  %v5418_v44 = vpop.xlane.xlu0 %5417  ;;  %v8208_v21 = vmul.f32 0.0078125, %v5388_v47  ;;  %v5606_v15 = vmul.f32 %v8205_v7, %v8205_v7 }
 0x369   :  { %v5834_v9 = vadd.f32 %v8159_v48, %v5798_v54  ;;  %v5778_v17 = vmul.f32 %v6359_v53, %v5682_v45  ;;  %v5420_v63 = vpop.xlane.xlu1 %5419 }
 0x36a   :  { %v5853_v0 = vadd.f32 %v8159_v48, %v5817_v50 }
 0x36b   :  { %5866 = vst [vmem:[#allocation8] sm:$0xff] %v5834_v9  ;;  %v5814_v36 = vmul.f32 %v8151_v18, %v5778_v17 }
 0x36c   :  { %5885 = vst [vmem:[#allocation8 + $0x98] sm:$0xff] %v5853_v0  ;;  %v5519_v30 = vpop.xlane.xlu0 %5518  ;;  %v6361_v22 = vpop.eup %6360  ;;  %v8213_v0 = vmul.f32 0.0078125, %v5418_v44 }
 0x36d   :  { %v5850_v56 = vadd.f32 %v8159_v48, %v5814_v36  ;;  %v5576_v43 = vmul.f32 0.0078125, %v5519_v30  ;;  %v5521_v61 = vpop.xlane.xlu1 %5520  ;;  %v5779_v25 = vmul.f32 %v6361_v22, %v5683_v10  ;;  %v5607_v30 = vmul.f32 %v8208_v21, %v8208_v21 }
 0x36e   :  { %v6363_v5 = vpop.eup %6362  ;;  %v5577_v28 = vmul.f32 0.0078125, %v5521_v61  ;;  %v8217_v22 = vmul.f32 0.0078125, %v5420_v63 }
 0x36f   :  { %5882 = vst [vmem:[#allocation8 + $0x80] sm:$0xff] %v5850_v56  ;;  %v5763_v19 = vmul.f32 %v6363_v5, %v5667_v58  ;;  %v5640_v13 = vsub.f32 %v5576_v43, %v5608_v1  ;;  %v5815_v8 = vmul.f32 %v8151_v18, %v5779_v25  ;;  %v5622_v5 = vmul.f32 %v8213_v0, %v8213_v0 }
 0x370   :  { %v5641_v32 = vsub.f32 %v5577_v28, %v5609_v38  ;;  %v5551_v59 = vpop.xlane.xlu0 %5550  ;;  %v5623_v28 = vmul.f32 %v8217_v22, %v8217_v22 }
 0x371   :  { %v5799_v23 = vmul.f32 %v8151_v18, %v5763_v19  ;;  %v5704_v57 = vadd.f32 1e-05, %v5640_v13  ;;  %v5592_v27 = vmul.f32 0.0078125, %v5551_v59  ;;  %v5553_v39 = vpop.xlane.xlu1 %5552  ;;  %v5851_v16 = vadd.f32 %v8159_v48, %v5815_v8 }
 0x372   :  { %v5705_v45 = vadd.f32 1e-05, %v5641_v32  ;;  %v5593_v54 = vmul.f32 0.0078125, %v5553_v39 }
 0x373   :  { %v5835_v53 = vadd.f32 %v8159_v48, %v5799_v23  ;;  %6364 = vrsqrt.f32 %v5704_v57  ;;  %v5656_v50 = vsub.f32 %v5592_v27, %v5624_v12  ;;  %5883 = vst [vmem:[#allocation8 + $0x88] sm:$0xff] %v5851_v16  ;;  %v5672_v23 = vsub.f32 %v8020_v40, %v8180_v3 }
 0x374   :  { %6366 = vrsqrt.f32 %v5705_v45  ;;  %v5657_v9 = vsub.f32 %v5593_v54, %v5625_v6  ;;  %v5515_v17 = vpop.xlane.xlu0 %5514  ;;  %v5673_v27 = vsub.f32 %v8023_v20, %v8183_v55  ;;  %v5689_v40 = vsub.f32 %v8032_v11, %v8190_v29 }
 0x375   :  { %5867 = vst [vmem:[#allocation8 + $0x8] sm:$0xff] %v5835_v53  ;;  %v5720_v36 = vadd.f32 1e-05, %v5656_v50  ;;  %v5574_v10 = vmul.f32 0.0078125, %v5515_v17  ;;  %v5517_v47 = vpop.xlane.xlu1 %5516  ;;  %v5688_v50 = vsub.f32 %v8029_v26, %v8188_v4  ;;  %v5325_v20 = vadd.f32 %v7966_v49, %v8115_v35 }
 0x376   :  { %v5721_v56 = vadd.f32 1e-05, %v5657_v9  ;;  %v5575_v58 = vmul.f32 0.0078125, %v5517_v47  ;;  %v5671_v35 = vsub.f32 %v8039_v46, %v8208_v21  ;;  %v6460_v46 = vld [vmem:[#allocation2 + $0xf0] sm:$0xff] }
 0x377   :  { %6368 = vrsqrt.f32 %v5720_v36  ;;  %v5638_v1 = vsub.f32 %v5574_v10, %v5606_v15 }
 0x378   :  { %6370 = vrsqrt.f32 %v5721_v56  ;;  %v5639_v43 = vsub.f32 %v5575_v58, %v5607_v30  ;;  %v5547_v61 = vpop.xlane.xlu0 %5546  ;;  %v5670_v56 = vsub.f32 %v8036_v37, %v8205_v7 }
 0x379   :  { %v5702_v44 = vadd.f32 1e-05, %v5638_v1  ;;  %v5590_v25 = vmul.f32 0.0078125, %v5547_v61  ;;  %v5549_v38 = vpop.xlane.xlu1 %5548  ;;  %v5233_v1 = vpop.f32.mrf.mxu0 }
 0x37a   :  { %v5703_v19 = vadd.f32 1e-05, %v5639_v43  ;;  %v5591_v13 = vmul.f32 0.0078125, %v5549_v38 }
 0x37b   :  { %6372 = vrsqrt.f32 %v5702_v44  ;;  %v5654_v63 = vsub.f32 %v5590_v25, %v5622_v5  ;;  %v6459_v25 = vld [vmem:[#allocation2 + $0x60] sm:$0xff] }
 0x37c   :  { %6374 = vrsqrt.f32 %v5703_v19  ;;  %v5655_v8 = vsub.f32 %v5591_v13, %v5623_v28  ;;  %v5398_v12 = vpop.xlane.xlu0 %5397  ;;  %v8250_v37 = vadd.f32 %v6459_v25, %v5325_v20  ;;  %v6461_v20 = vld [vmem:[#allocation2 + $0xf8] sm:$0xff] }
 0x37d   :  { %v5718_v6 = vadd.f32 1e-05, %v5654_v63  ;;  %v5400_v32 = vpop.xlane.xlu1 %5399  ;;  %v8246_v61 = vmul.f32 0.0078125, %v5398_v12  ;;  %v8261_v63 = vmul.f32 %v8117_v34, %v8117_v34 }
 0x37e   :  { %v5719_v59 = vadd.f32 1e-05, %v5655_v8  ;;  %v8253_v19 = vmul.f32 0.0078125, %v5400_v32  ;;  %v5687_v32 = vsub.f32 %v8046_v51, %v8217_v22 }
 0x37f   :  { %6376 = vrsqrt.f32 %v5718_v6  ;;  %v5326_v6 = vadd.f32 %v7966_v49, %v5233_v1 }
 0x380   :  { %v6365_v57 = vpop.eup %6364  ;;  %6378 = vrsqrt.f32 %v5719_v59  ;;  %v5430_v39 = vpop.xlane.xlu0 %5429 }
 0x381   :  { %v6367_v16 = vpop.eup %6366  ;;  %v5768_v45 = vmul.f32 %v6365_v57, %v5672_v23  ;;  %v5432_v54 = vpop.xlane.xlu1 %5431  ;;  %v5686_v23 = vsub.f32 %v8044_v14, %v8213_v0 }
 0x382   :  { %v5769_v53 = vmul.f32 %v6367_v16, %v5673_v27 }
 0x383   :  { %v5804_v9 = vmul.f32 %v8151_v18, %v5768_v45 }
 0x384   :  { %v6369_v17 = vpop.eup %6368  ;;  %v5805_v3 = vmul.f32 %v8151_v18, %v5769_v53  ;;  %v5394_v15 = vpop.xlane.xlu0 %5393  ;;  %v5612_v53 = vmul.f32 %v8246_v61, %v8246_v61 }
 0x385   :  { %v6371_v36 = vpop.eup %6370  ;;  %v5840_v55 = vadd.f32 %v8159_v48, %v5804_v9  ;;  %v5784_v10 = vmul.f32 %v6369_v17, %v5688_v50  ;;  %v8236_v47 = vpop.xlane.xlu1 %5395  ;;  %v8275_v50 = vmul.f32 0.0078125, %v5430_v39  ;;  %v5613_v17 = vmul.f32 %v8253_v19, %v8253_v19 }
 0x386   :  { %v5841_v26 = vadd.f32 %v8159_v48, %v5805_v3  ;;  %v5785_v4 = vmul.f32 %v6371_v36, %v5689_v40  ;;  %v8280_v40 = vmul.f32 0.0078125, %v5432_v54 }
 0x387   :  { %5872 = vst [vmem:[#allocation8 + $0x30] sm:$0xff] %v5840_v55  ;;  %v5820_v11 = vmul.f32 %v8151_v18, %v5784_v10  ;;  %v8286_v10 = vmul.f32 0.0078125, %v5394_v15  ;;  %v5628_v15 = vmul.f32 %v8275_v50, %v8275_v50 }
 0x388   :  { %v6250_v30 = vpop.f32.mrf.mxu1  ;;  %v6373_v29 = vpop.eup %6372  ;;  %5873 = vst [vmem:[#allocation8 + $0x38] sm:$0xff] %v5841_v26  ;;  %v5821_v43 = vmul.f32 %v8151_v18, %v5785_v4 }
 0x389   :  { %v5343_v58 = vadd.f32 %v6250_v30, %v7966_v49  ;;  %v8248_v5 = vpop.xlane.xlu0 %5425  ;;  %v6375_v44 = vpop.eup %6374  ;;  %v5856_v38 = vadd.f32 %v8159_v48, %v5820_v11  ;;  %v5766_v28 = vmul.f32 %v6373_v29, %v5670_v56  ;;  %v6462_v11 = vld [vmem:[#allocation2 + $0x68] sm:$0xff] }
 0x38a   :  { %v5294_v7 = vpop.f32.mrf.mxu1  ;;  %v8255_v13 = vpop.xlane.xlu1 %5427  ;;  %v5857_v8 = vadd.f32 %v8159_v48, %v5821_v43  ;;  %v5767_v12 = vmul.f32 %v6375_v44, %v5671_v35  ;;  %v8289_v29 = vadd.f32 %v6462_v11, %v5326_v6 }
 0x38b   :  { %v8257_v21 = vadd.f32 %v6460_v46, %v5343_v58  ;;  %5888 = vst [vmem:[#allocation8 + $0xb0] sm:$0xff] %v5856_v38  ;;  %v5802_v57 = vmul.f32 %v8151_v18, %v5766_v28  ;;  %v5341_v36 = vadd.f32 %v7966_v49, %v5294_v7  ;;  %v8297_v58 = vmul.f32 0.0078125, %v8236_v47 }
 0x38c   :  { %v6251_v59 = vpop.f32.mrf.mxu1  ;;  %v6377_v27 = vpop.eup %6376  ;;  %5889 = vst [vmem:[#allocation8 + $0xb8] sm:$0xff] %v5857_v8  ;;  %v5803_v45 = vmul.f32 %v8151_v18, %v5767_v12  ;;  %v5629_v28 = vmul.f32 %v8280_v40, %v8280_v40  ;;  %v5610_v12 = vmul.f32 %v8286_v10, %v8286_v10 }
 0x38d   :  { %v5344_v16 = vadd.f32 %v6251_v59, %v7966_v49  ;;  %5437 = vadd.xlane.f32.xlu0 %v8257_v21  ;;  %v5527_v14 = vpop.xlane.xlu0 %5526  ;;  %v6379_v0 = vpop.eup %6378  ;;  %v5838_v51 = vadd.f32 %v8159_v48, %v5802_v57  ;;  %v5782_v22 = vmul.f32 %v6377_v27, %v5686_v23  ;;  %v5611_v23 = vmul.f32 %v8297_v58, %v8297_v58 }
 0x38e   :  { %v5297_v9 = vpop.f32.mrf.mxu1  ;;  %v5529_v3 = vpop.xlane.xlu1 %5528  ;;  %v5839_v39 = vadd.f32 %v8159_v48, %v5803_v45  ;;  %v5783_v4 = vmul.f32 %v6379_v0, %v5687_v32  ;;  %v5580_v30 = vmul.f32 0.0078125, %v5527_v14  ;;  %v8313_v32 = vmul.f32 0.0078125, %v8248_v5  ;;  %v6464_v45 = vld [vmem:[#allocation2 + $0xe8] sm:$0xff] }
 0x38f   :  { %v8283_v55 = vadd.f32 %v6461_v20, %v5344_v16  ;;  %5870 = vst [vmem:[#allocation8 + $0x20] sm:$0xff] %v5838_v51  ;;  %v5818_v26 = vmul.f32 %v8151_v18, %v5782_v22  ;;  %v5581_v56 = vmul.f32 0.0078125, %v5529_v3  ;;  %v5342_v54 = vadd.f32 %v7966_v49, %v5297_v9  ;;  %v6463_v49 = vld [vmem:[#allocation2 + $0xe0] sm:$0xff] }
 0x390   :  { %5871 = vst [vmem:[#allocation8 + $0x28] sm:$0xff] %v5839_v39  ;;  %v5819_v43 = vmul.f32 %v8151_v18, %v5783_v4  ;;  %v5644_v44 = vsub.f32 %v5580_v30, %v5612_v53  ;;  %v8301_v38 = vadd.f32 %v6463_v49, %v5341_v36  ;;  %v8318_v14 = vmul.f32 0.0078125, %v8255_v13 }
 0x391   :  { %5439 = vadd.xlane.f32.xlu1 %v8283_v55  ;;  %5401 = vadd.xlane.f32.xlu0 %v8250_v37  ;;  %v5559_v1 = vpop.xlane.xlu0 %5558  ;;  %v5854_v35 = vadd.f32 %v8159_v48, %v5818_v26  ;;  %v5645_v25 = vsub.f32 %v5581_v56, %v5613_v17  ;;  %v8315_v53 = vadd.f32 %v6464_v45, %v5342_v54 }
 0x392   :  { %v5561_v7 = vpop.xlane.xlu1 %5560  ;;  %v5596_v46 = vmul.f32 0.0078125, %v5559_v1  ;;  %v5855_v47 = vadd.f32 %v8159_v48, %v5819_v43  ;;  %v5708_v6 = vadd.f32 1e-05, %v5644_v44  ;;  %v5486_v5 = vmul.f32 %v8250_v37, %v8250_v37 }
 0x393   :  { %v5597_v8 = vmul.f32 0.0078125, %v5561_v7  ;;  %5886 = vst [vmem:[#allocation8 + $0xa0] sm:$0xff] %v5854_v35  ;;  %v5709_v59 = vadd.f32 1e-05, %v5645_v25  ;;  %v5626_v13 = vmul.f32 %v8313_v32, %v8313_v32  ;;  %v5489_v30 = vmul.f32 %v8121_v2, %v8121_v2 }
 0x394   :  { %v5660_v57 = vsub.f32 %v5596_v46, %v5628_v15  ;;  %5887 = vst [vmem:[#allocation8 + $0xa8] sm:$0xff] %v5855_v47  ;;  %6380 = vrsqrt.f32 %v5708_v6  ;;  %v5627_v56 = vmul.f32 %v8318_v14, %v8318_v14  ;;  %v5487_v35 = vmul.f32 %v8289_v29, %v8289_v29 }
 0x395   :  { %5403 = vadd.xlane.f32.xlu1 %v8289_v29  ;;  %5433 = vadd.xlane.f32.xlu0 %v8301_v38  ;;  %v5661_v27 = vsub.f32 %v5597_v8, %v5629_v28  ;;  %v5523_v16 = vpop.xlane.xlu0 %5522  ;;  %6382 = vrsqrt.f32 %v5709_v59  ;;  %v5502_v43 = vmul.f32 %v8301_v38, %v8301_v38  ;;  %v5676_v25 = vsub.f32 %v8068_v62, %v8246_v61 }
 0x396   :  { %v5578_v0 = vmul.f32 0.0078125, %v5523_v16  ;;  %v5525_v9 = vpop.xlane.xlu1 %5524  ;;  %v5724_v51 = vadd.f32 1e-05, %v5660_v57  ;;  %v5503_v49 = vmul.f32 %v8315_v53, %v8315_v53  ;;  %v5504_v28 = vmul.f32 %v8257_v21, %v8257_v21 }
 0x397   :  { %v5725_v22 = vadd.f32 1e-05, %v5661_v27  ;;  %v5579_v17 = vmul.f32 0.0078125, %v5525_v9  ;;  %v5677_v46 = vsub.f32 %v8071_v41, %v8253_v19  ;;  %v5693_v62 = vsub.f32 %v8080_v52, %v8280_v40 }
 0x398   :  { %v5642_v3 = vsub.f32 %v5578_v0, %v5610_v12  ;;  %6384 = vrsqrt.f32 %v5724_v51  ;;  %v5692_v12 = vsub.f32 %v8077_v42, %v8275_v50  ;;  %v5505_v57 = vmul.f32 %v8283_v55, %v8283_v55 }
 0x399   :  { %5435 = vadd.xlane.f32.xlu1 %v8315_v53  ;;  %5534 = vadd.xlane.f32.xlu0 %v8261_v63  ;;  %v5643_v36 = vsub.f32 %v5579_v17, %v5611_v23  ;;  %v5555_v20 = vpop.xlane.xlu0 %5554  ;;  %6386 = vrsqrt.f32 %v5725_v22  ;;  %v5674_v27 = vsub.f32 %v8084_v33, %v8286_v10  ;;  %v5675_v52 = vsub.f32 %v8087_v24, %v8297_v58 }
 0x39a   :  { %v5706_v39 = vadd.f32 1e-05, %v5642_v3  ;;  %v5594_v26 = vmul.f32 0.0078125, %v5555_v20  ;;  %v5557_v4 = vpop.xlane.xlu1 %5556  ;;  %v5690_v22 = vsub.f32 %v8092_v31, %v8313_v32  ;;  %v5691_v3 = vsub.f32 %v8094_v60, %v8318_v14 }
 0x39b   :  { %v5707_v63 = vadd.f32 1e-05, %v5643_v36  ;;  %v5595_v11 = vmul.f32 0.0078125, %v5557_v4 }
 0x39c   :  { %6388 = vrsqrt.f32 %v5706_v39  ;;  %v5658_v54 = vsub.f32 %v5594_v26, %v5626_v13 }
 0x39d   :  { %5536 = vadd.xlane.f32.xlu1 %v5489_v30  ;;  %5530 = vadd.xlane.f32.xlu0 %v5486_v5  ;;  %6390 = vrsqrt.f32 %v5707_v63  ;;  %v5659_v15 = vsub.f32 %v5595_v11, %v5627_v56 }
 0x39e   :  { %v5722_v1 = vadd.f32 1e-05, %v5658_v54 }
 0x39f   :  { %v5723_v44 = vadd.f32 1e-05, %v5659_v15 }
 0x3a0   :  { %6392 = vrsqrt.f32 %v5722_v1 }
 0x3a1   :  { %5532 = vadd.xlane.f32.xlu1 %v5487_v35  ;;  %5562 = vadd.xlane.f32.xlu0 %v5502_v43  ;;  %6394 = vrsqrt.f32 %v5723_v44  ;;  %v6381_v7 = vpop.eup %6380 }
 0x3a2   :  { %v6383_v8 = vpop.eup %6382  ;;  %v5772_v47 = vmul.f32 %v6381_v7, %v5676_v25 }
 0x3a3   :  { %v5773_v6 = vmul.f32 %v6383_v8, %v5677_v46 }
 0x3a4   :  { %v5808_v61 = vmul.f32 %v8151_v18, %v5772_v47 }
 0x3a5   :  { %5564 = vadd.xlane.f32.xlu1 %v5503_v49  ;;  %5566 = vadd.xlane.f32.xlu0 %v5504_v28  ;;  %v6385_v59 = vpop.eup %6384  ;;  %v5809_v41 = vmul.f32 %v8151_v18, %v5773_v6 }
 0x3a6   :  { %v6387_v23 = vpop.eup %6386  ;;  %v5788_v19 = vmul.f32 %v6385_v59, %v5692_v12  ;;  %v5844_v16 = vadd.f32 %v8159_v48, %v5808_v61 }
 0x3a7   :  { %v5789_v42 = vmul.f32 %v6387_v23, %v5693_v62  ;;  %v5845_v40 = vadd.f32 %v8159_v48, %v5809_v41 }
 0x3a8   :  { %v5824_v45 = vmul.f32 %v8151_v18, %v5788_v19  ;;  %5876 = vst [vmem:[#allocation8 + $0x50] sm:$0xff] %v5844_v16 }
 0x3a9   :  { %v6389_v50 = vpop.eup %6388  ;;  %5568 = vadd.xlane.f32.xlu1 %v5505_v57  ;;  %v5825_v9 = vmul.f32 %v8151_v18, %v5789_v42  ;;  %5877 = vst [vmem:[#allocation8 + $0x58] sm:$0xff] %v5845_v40 }
 0x3aa   :  { %v6391_v0 = vpop.eup %6390  ;;  %v5770_v51 = vmul.f32 %v6389_v50, %v5674_v27  ;;  %v5860_v33 = vadd.f32 %v8159_v48, %v5824_v45 }
 0x3ab   :  { %v5771_v10 = vmul.f32 %v6391_v0, %v5675_v52  ;;  %v5861_v17 = vadd.f32 %v8159_v48, %v5825_v9 }
 0x3ac   :  { %v5806_v24 = vmul.f32 %v8151_v18, %v5770_v51  ;;  %5892 = vst [vmem:[#allocation8 + $0xd0] sm:$0xff] %v5860_v33 }
 0x3ad   :  { %v6393_v58 = vpop.eup %6392  ;;  %v5807_v5 = vmul.f32 %v8151_v18, %v5771_v10  ;;  %5893 = vst [vmem:[#allocation8 + $0xd8] sm:$0xff] %v5861_v17 }
 0x3ae   :  { %v6395_v36 = vpop.eup %6394  ;;  %v5842_v20 = vadd.f32 %v8159_v48, %v5806_v24  ;;  %v5786_v13 = vmul.f32 %v6393_v58, %v5690_v22 }
 0x3af   :  { %v5843_v39 = vadd.f32 %v8159_v48, %v5807_v5  ;;  %v5787_v26 = vmul.f32 %v6395_v36, %v5691_v3 }
 0x3b0   :  { %5874 = vst [vmem:[#allocation8 + $0x40] sm:$0xff] %v5842_v20  ;;  %v5822_v31 = vmul.f32 %v8151_v18, %v5786_v13 }
 0x3b1   :  { %5875 = vst [vmem:[#allocation8 + $0x48] sm:$0xff] %v5843_v39  ;;  %v5823_v32 = vmul.f32 %v8151_v18, %v5787_v26 }
 0x3b2   :  { %v5858_v4 = vadd.f32 %v8159_v48, %v5822_v31 }
 0x3b3   :  { %v5859_v60 = vadd.f32 %v8159_v48, %v5823_v32 }
 0x3b4   :  { %5890 = vst [vmem:[#allocation8 + $0xc0] sm:$0xff] %v5858_v4 }
 0x3b5   :  { %5891 = vst [vmem:[#allocation8 + $0xc8] sm:$0xff] %v5859_v60 }
 0x3c5   :  { %v5406_v14 = vpop.xlane.xlu0 %5405 }
 0x3c6   :  { %v5456_v1 = vmul.f32 0.0078125, %v5406_v14 }
 0x3c8   :  { %v5616_v25 = vmul.f32 %v5456_v1, %v5456_v1  ;;  %v5680_v14 = vsub.f32 %v8117_v34, %v5456_v1 }
 0x3c9   :  { %v5408_v30 = vpop.xlane.xlu1 %5407 }
 0x3ca   :  { %v8372_v35 = vmul.f32 0.0078125, %v5408_v30 }
 0x3cc   :  { %v5617_v46 = vmul.f32 %v8372_v35, %v8372_v35 }
 0x416   :  { %v5438_v56 = vpop.xlane.xlu0 %5437 }
 0x417   :  { %v8384_v19 = vmul.f32 0.0078125, %v5438_v56 }
 0x419   :  { %v5632_v10 = vmul.f32 %v8384_v19, %v8384_v19 }
 0x41a   :  { %v5440_v63 = vpop.xlane.xlu1 %5439  ;;  %v5402_v11 = vpop.xlane.xlu0 %5401 }
 0x41b   :  { %v8374_v7 = vmul.f32 0.0078125, %v5402_v11  ;;  %v8394_v22 = vmul.f32 0.0078125, %v5440_v63 }
 0x41d   :  { %v5614_v59 = vmul.f32 %v8374_v7, %v8374_v7  ;;  %v5633_v31 = vmul.f32 %v8394_v22, %v8394_v22 }
 0x41e   :  { %v5404_v54 = vpop.xlane.xlu1 %5403  ;;  %v5434_v15 = vpop.xlane.xlu0 %5433 }
 0x41f   :  { %v8378_v8 = vmul.f32 0.0078125, %v5404_v54  ;;  %v8380_v47 = vmul.f32 0.0078125, %v5434_v15  ;;  %v5681_v54 = vsub.f32 %v8121_v2, %v8372_v35 }
 0x421   :  { %v5615_v27 = vmul.f32 %v8378_v8, %v8378_v8  ;;  %v5630_v16 = vmul.f32 %v8380_v47, %v8380_v47  ;;  %v5694_v2 = vsub.f32 %v8301_v38, %v8380_v47 }
 0x422   :  { %v5436_v43 = vpop.xlane.xlu1 %5435  ;;  %v5535_v44 = vpop.xlane.xlu0 %5534 }
 0x423   :  { %v5584_v49 = vmul.f32 0.0078125, %v5535_v44  ;;  %v8390_v42 = vmul.f32 0.0078125, %v5436_v43  ;;  %v5678_v44 = vsub.f32 %v8250_v37, %v8374_v7 }
 0x425   :  { %v5648_v28 = vsub.f32 %v5584_v49, %v5616_v25  ;;  %v5631_v17 = vmul.f32 %v8390_v42, %v8390_v42 }
 0x426   :  { %v5537_v12 = vpop.xlane.xlu1 %5536  ;;  %v5531_v6 = vpop.xlane.xlu0 %5530 }
 0x427   :  { %v5712_v62 = vadd.f32 1e-05, %v5648_v28  ;;  %v5585_v61 = vmul.f32 0.0078125, %v5537_v12  ;;  %v5582_v23 = vmul.f32 0.0078125, %v5531_v6  ;;  %v5679_v28 = vsub.f32 %v8289_v29, %v8378_v8 }
 0x429   :  { %6396 = vrsqrt.f32 %v5712_v62  ;;  %v5649_v57 = vsub.f32 %v5585_v61, %v5617_v46  ;;  %v5646_v41 = vsub.f32 %v5582_v23, %v5614_v59  ;;  %v5695_v61 = vsub.f32 %v8315_v53, %v8390_v42 }
 0x42a   :  { %v5533_v50 = vpop.xlane.xlu1 %5532  ;;  %v5563_v52 = vpop.xlane.xlu0 %5562  ;;  %v5696_v23 = vsub.f32 %v8257_v21, %v8384_v19  ;;  %v5697_v53 = vsub.f32 %v8283_v55, %v8394_v22 }
 0x42b   :  { %v5713_v40 = vadd.f32 1e-05, %v5649_v57  ;;  %v5710_v45 = vadd.f32 1e-05, %v5646_v41  ;;  %v5583_v0 = vmul.f32 0.0078125, %v5533_v50  ;;  %v5598_v9 = vmul.f32 0.0078125, %v5563_v52 }
 0x42d   :  { %6398 = vrsqrt.f32 %v5713_v40  ;;  %v5647_v51 = vsub.f32 %v5583_v0, %v5615_v27  ;;  %v5662_v33 = vsub.f32 %v5598_v9, %v5630_v16 }
 0x42e   :  { %6400 = vrsqrt.f32 %v5710_v45  ;;  %v5565_v24 = vpop.xlane.xlu1 %5564  ;;  %v5567_v58 = vpop.xlane.xlu0 %5566 }
 0x42f   :  { %v5711_v3 = vadd.f32 1e-05, %v5647_v51  ;;  %v5726_v5 = vadd.f32 1e-05, %v5662_v33  ;;  %v5599_v36 = vmul.f32 0.0078125, %v5565_v24  ;;  %v5600_v20 = vmul.f32 0.0078125, %v5567_v58 }
 0x431   :  { %6402 = vrsqrt.f32 %v5711_v3  ;;  %v5663_v13 = vsub.f32 %v5599_v36, %v5631_v17  ;;  %v5664_v39 = vsub.f32 %v5600_v20, %v5632_v10 }
 0x432   :  { %6404 = vrsqrt.f32 %v5726_v5  ;;  %v5569_v26 = vpop.xlane.xlu1 %5568 }
 0x433   :  { %v5727_v32 = vadd.f32 1e-05, %v5663_v13  ;;  %v5728_v4 = vadd.f32 1e-05, %v5664_v39  ;;  %v5601_v60 = vmul.f32 0.0078125, %v5569_v26 }
 0x435   :  { %6406 = vrsqrt.f32 %v5727_v32  ;;  %v5665_v30 = vsub.f32 %v5601_v60, %v5633_v31 }
 0x436   :  { %v6397_v56 = vpop.eup %6396  ;;  %6408 = vrsqrt.f32 %v5728_v4 }
 0x437   :  { %v5776_v63 = vmul.f32 %v6397_v56, %v5680_v14  ;;  %v5729_v11 = vadd.f32 1e-05, %v5665_v30 }
 0x439   :  { %v5812_v15 = vmul.f32 %v8151_v18, %v5776_v63  ;;  %6410 = vrsqrt.f32 %v5729_v11 }
 0x43a   :  { %v6399_v43 = vpop.eup %6398 }
 0x43b   :  { %v6401_v25 = vpop.eup %6400  ;;  %v5848_v49 = vadd.f32 %v8159_v48, %v5812_v15  ;;  %v5777_v34 = vmul.f32 %v6399_v43, %v5681_v54 }
 0x43c   :  { %v5774_v1 = vmul.f32 %v6401_v25, %v5678_v44 }
 0x43d   :  { %5880 = vst [vmem:[#allocation8 + $0x70] sm:$0xff] %v5848_v49  ;;  %v5813_v46 = vmul.f32 %v8151_v18, %v5777_v34 }
 0x43e   :  { %v6403_v12 = vpop.eup %6402  ;;  %v5810_v35 = vmul.f32 %v8151_v18, %v5774_v1 }
 0x43f   :  { %v6405_v6 = vpop.eup %6404  ;;  %v5849_v37 = vadd.f32 %v8159_v48, %v5813_v46  ;;  %v5775_v7 = vmul.f32 %v6403_v12, %v5679_v28 }
 0x440   :  { %v5846_v59 = vadd.f32 %v8159_v48, %v5810_v35  ;;  %v5790_v62 = vmul.f32 %v6405_v6, %v5694_v2 }
 0x441   :  { %5881 = vst [vmem:[#allocation8 + $0x78] sm:$0xff] %v5849_v37  ;;  %v5811_v29 = vmul.f32 %v8151_v18, %v5775_v7 }
 0x442   :  { %v6407_v8 = vpop.eup %6406  ;;  %5878 = vst [vmem:[#allocation8 + $0x60] sm:$0xff] %v5846_v59  ;;  %v5826_v38 = vmul.f32 %v8151_v18, %v5790_v62 }
 0x443   :  { %v6409_v47 = vpop.eup %6408  ;;  %v5847_v57 = vadd.f32 %v8159_v48, %v5811_v29  ;;  %v5791_v41 = vmul.f32 %v6407_v8, %v5695_v61 }
 0x444   :  { %v5862_v27 = vadd.f32 %v8159_v48, %v5826_v38  ;;  %v5792_v16 = vmul.f32 %v6409_v47, %v5696_v23 }
 0x445   :  { %5879 = vst [vmem:[#allocation8 + $0x68] sm:$0xff] %v5847_v57  ;;  %v5827_v42 = vmul.f32 %v8151_v18, %v5791_v41 }
 0x446   :  { %v6411_v50 = vpop.eup %6410  ;;  %5894 = vst [vmem:[#allocation8 + $0xe0] sm:$0xff] %v5862_v27  ;;  %v5828_v21 = vmul.f32 %v8151_v18, %v5792_v16 }
 0x447   :  { %v5863_v19 = vadd.f32 %v8159_v48, %v5827_v42  ;;  %v5793_v52 = vmul.f32 %v6411_v50, %v5697_v53 }
 0x448   :  { %v5864_v40 = vadd.f32 %v8159_v48, %v5828_v21 }
 0x449   :  { %5895 = vst [vmem:[#allocation8 + $0xe8] sm:$0xff] %v5863_v19  ;;  %v5829_v45 = vmul.f32 %v8151_v18, %v5793_v52 }
 0x44a   :  { %5896 = vst [vmem:[#allocation8 + $0xf0] sm:$0xff] %v5864_v40 }
 0x44b   :  { %v5865_v55 = vadd.f32 %v8159_v48, %v5829_v45 }
 0x44d   :  { %5897 = vst [vmem:[#allocation8 + $0xf8] sm:$0xff] %v5865_v55 }
 0x44e   :  { %6536 = shalt.err (!%p6533_p5)
}
 0x44f   :  { %5909 = dma.vmem_to_hbm [thread:$0]  %s5904_s9, 4096, %s8441_s4, [#allocation4], %s6553_s20, %s6553_s20, %s6554_s21  }
 0x450   :  { %6549 = dma.done.wait [#allocation4], 4096  }
 0x451   :  { %6550 = vsyncadd [#allocation4], 4294963200 }
 0x452   :  { %5913 = vsyncpa [#allocation3], 1 }
 0x453   :  { %5914 = vsyncpa [#allocation6], 1 }
 0x454   :  { %5915 = vsyncpa [#allocation4], 1 }

</bundles_post_ra>
